<compile_context>
chip_gen: v6e
topology: v6e:2x2x1
jax: 0.10.0
libtpu: 0.0.40
codegen_flags: <defaults>
</compile_context>

<pallas_src>
import math
import functools

import jax
import jax.numpy as jnp
from jax.experimental import pallas as pl
from jax.experimental.pallas import tpu as pltpu


# ----------------------------------------------------------------------------
# small helpers
# ----------------------------------------------------------------------------

def _round_up(x, m):
    return (x + m - 1) // m * m


def _tile(n, cap, align):
    """Tile size: multiple of `align`, at most `cap` (cap % align == 0)."""
    return min(cap, _round_up(n, align))


def _pad2(x, rp, cp):
    r, c = x.shape
    if r == rp and c == cp:
        return x
    return jnp.pad(x, ((0, rp - r), (0, cp - c)))


# ----------------------------------------------------------------------------
# Kernel 1: fused LayerNorm + matmul (+ optional GELU)
#   grid = (M tiles, N tiles), full K per block (K = hidden dim).
# ----------------------------------------------------------------------------

def _ln_matmul_kernel(x_ref, g_ref, b_ref, w_ref, bias_ref, o_ref,
                      *, k_actual, eps, activation):
    x = x_ref[...].astype(jnp.float32)                       # (tm, Kp)
    mean = jnp.sum(x, axis=-1, keepdims=True) / float(k_actual)
    var = jnp.sum(x * x, axis=-1, keepdims=True) / float(k_actual) - mean * mean
    var = jnp.maximum(var, 0.0)
    xn = (x - mean) * jax.lax.rsqrt(var + eps)
    xn = xn * g_ref[...] + b_ref[...]                         # padded cols -> 0
    y = jnp.dot(xn.astype(jnp.bfloat16), w_ref[...],
                preferred_element_type=jnp.float32) + bias_ref[...]
    if activation == "gelu":
        # TODO(synk): HF configs vary between exact-erf and tanh GELU; tanh
        # approximation is used here for guaranteed Mosaic lowering.
        y = jax.nn.gelu(y, approximate=True)
    o_ref[...] = y.astype(o_ref.dtype)


def ln_linear(x, g, b, w, bias, activation=None, eps=1e-5,
              out_dtype=jnp.bfloat16):
    """y = activation(LayerNorm(x) @ w + bias), x:(M,K) w:(K,N) -> (M,N)."""
    M, K = x.shape
    K2, N = w.shape
    assert K == K2
    tm = _tile(M, 256, 8)
    tn = _tile(N, 512, 128)
    Kp = _round_up(K, 128)
    Mp = _round_up(M, tm)
    Np = _round_up(N, tn)

    xp = _pad2(x.astype(jnp.bfloat16), Mp, Kp)
    wp = _pad2(w.astype(jnp.bfloat16), Kp, Np)
    gp = _pad2(g.reshape(1, K).astype(jnp.float32), 1, Kp)
    bp = _pad2(b.reshape(1, K).astype(jnp.float32), 1, Kp)
    biasp = _pad2(bias.reshape(1, N).astype(jnp.float32), 1, Np)

    out = pl.pallas_call(
        functools.partial(_ln_matmul_kernel, k_actual=K, eps=eps,
                          activation=activation),
        out_shape=jax.ShapeDtypeStruct((Mp, Np), out_dtype),
        grid=(Mp // tm, Np // tn),
        in_specs=[
            pl.BlockSpec((tm, Kp), lambda i, j: (i, 0)),
            pl.BlockSpec((1, Kp), lambda i, j: (0, 0)),
            pl.BlockSpec((1, Kp), lambda i, j: (0, 0)),
            pl.BlockSpec((Kp, tn), lambda i, j: (0, j)),
            pl.BlockSpec((1, tn), lambda i, j: (0, j)),
        ],
        out_specs=pl.BlockSpec((tm, tn), lambda i, j: (i, j)),
        compiler_params=pltpu.CompilerParams(
            dimension_semantics=("parallel", "parallel")),
    )(xp, gp, bp, wp, biasp)
    return out[:M, :N]


# ----------------------------------------------------------------------------
# Kernel 2: tiled matmul with K-axis accumulation, bias + residual epilogue
#   grid = (M tiles, N tiles, K tiles), f32 VMEM accumulator scratch.
# ----------------------------------------------------------------------------

def _matmul_resid_kernel(x_ref, w_ref, bias_ref, res_ref, o_ref, acc_ref):
    k = pl.program_id(2)

    @pl.when(k == 0)
    def _():
        acc_ref[...] = jnp.zeros_like(acc_ref)

    acc_ref[...] += jnp.dot(x_ref[...], w_ref[...],
                            preferred_element_type=jnp.float32)

    @pl.when(k == pl.num_programs(2) - 1)
    def _():
        y = acc_ref[...] + bias_ref[...] + res_ref[...].astype(jnp.float32)
        o_ref[...] = y.astype(o_ref.dtype)


def linear_residual(x, w, bias, residual, out_dtype=jnp.bfloat16):
    """y = residual + x @ w + bias, x:(M,K) w:(K,N) residual:(M,N)."""
    M, K = x.shape
    _, N = w.shape
    tm = _tile(M, 256, 8)
    tn = _tile(N, 512, 128)
    tk = _tile(K, 512, 128)
    Mp, Np, Kp = _round_up(M, tm), _round_up(N, tn), _round_up(K, tk)

    xp = _pad2(x.astype(jnp.bfloat16), Mp, Kp)
    wp = _pad2(w.astype(jnp.bfloat16), Kp, Np)
    bp = _pad2(bias.reshape(1, N).astype(jnp.float32), 1, Np)
    rp = _pad2(residual.astype(jnp.bfloat16), Mp, Np)

    out = pl.pallas_call(
        _matmul_resid_kernel,
        out_shape=jax.ShapeDtypeStruct((Mp, Np), out_dtype),
        grid=(Mp // tm, Np // tn, Kp // tk),
        in_specs=[
            pl.BlockSpec((tm, tk), lambda i, j, k: (i, k)),
            pl.BlockSpec((tk, tn), lambda i, j, k: (k, j)),
            pl.BlockSpec((1, tn), lambda i, j, k: (0, j)),
            pl.BlockSpec((tm, tn), lambda i, j, k: (i, j)),
        ],
        out_specs=pl.BlockSpec((tm, tn), lambda i, j, k: (i, j)),
        scratch_shapes=[pltpu.VMEM((tm, tn), jnp.float32)],
        compiler_params=pltpu.CompilerParams(
            dimension_semantics=("parallel", "parallel", "arbitrary")),
    )(xp, wp, bp, rp)
    return out[:M, :N]


# ----------------------------------------------------------------------------
# Kernel 3: flash-style causal attention
#   grid = (B, q tiles, kv tiles); Q rows and packed KV rows are DMA'd
#   separately (only the bytes the kernel touches), heads sliced inside
#   the kernel (no HBM head transposes).
# ----------------------------------------------------------------------------

def _flash_attn_kernel(q_ref, kv_ref, o_ref, m_sc, l_sc, acc_sc,
                       *, n_heads, d_model, d_head, s_actual, scale):
    qi = pl.program_id(1)
    ki = pl.program_id(2)
    nk = pl.num_programs(2)
    tq = q_ref.shape[1]
    tk = kv_ref.shape[1]

    @pl.when(ki == 0)
    def _():
        m_sc[...] = jnp.full_like(m_sc, -jnp.inf)
        l_sc[...] = jnp.zeros_like(l_sc)
        acc_sc[...] = jnp.zeros_like(acc_sc)

    q_end = qi * tq + (tq - 1)
    kv_start = ki * tk

    @pl.when(kv_start <= q_end)                    # skip fully-masked KV tiles
    def _():
        qb = q_ref[0]                               # (tq, D)   bf16
        kvb = kv_ref[0]                             # (tk, 2*D) bf16
        row = qi * tq + jax.lax.broadcasted_iota(jnp.int32, (tq, tk), 0)
        col = ki * tk + jax.lax.broadcasted_iota(jnp.int32, (tq, tk), 1)
        mask = (col <= row) & (col < s_actual)
        for h in range(n_heads):
            qh = qb[:, h * d_head:(h + 1) * d_head]
            kh = kvb[:, h * d_head:(h + 1) * d_head]
            vh = kvb[:, d_model + h * d_head:d_model + (h + 1) * d_head]
            s = jax.lax.dot_general(
                qh, kh, (((1,), (1,)), ((), ())),
                preferred_element_type=jnp.float32) * scale
            s = jnp.where(mask, s, jnp.float32(-1e30))
            m_prev = m_sc[:, h:h + 1]
            m_new = jnp.maximum(m_prev, jnp.max(s, axis=-1, keepdims=True))
            alpha = jnp.exp(m_prev - m_new)
            p = jnp.exp(s - m_new)
            l_sc[:, h:h + 1] = (alpha * l_sc[:, h:h + 1]
                                + jnp.sum(p, axis=-1, keepdims=True))
            acc_sc[:, h * d_head:(h + 1) * d_head] = (
                alpha * acc_sc[:, h * d_head:(h + 1) * d_head]
                + jnp.dot(p.astype(vh.dtype), vh,
                          preferred_element_type=jnp.float32))
            m_sc[:, h:h + 1] = m_new

    @pl.when(ki == nk - 1)
    def _():
        inv_l = pl.reciprocal(l_sc[...], approx=True)        # (tq, H)
        pieces = []
        for h in range(n_heads):
            pieces.append(acc_sc[:, h * d_head:(h + 1) * d_head]
                          * inv_l[:, h:h + 1])
        o_ref[0] = jnp.concatenate(pieces, axis=-1).astype(o_ref.dtype)


def flash_attention(qkv, n_heads, d_model):
    """qkv: (B, S, 3*d_model) packed [q|k|v] -> (B, S, d_model), causal."""
    B, S, three_d = qkv.shape
    assert three_d == 3 * d_model
    d_head = d_model // n_heads
    scale = 1.0 / math.sqrt(d_head)
    tq = _tile(S, 128, 8)
    Sp = _round_up(S, tq)
    nq = Sp // tq

    # split the packed activation so each grid step only DMAs the bytes it
    # actually touches (Q rows: D cols, KV rows: 2D cols).
    q = qkv[:, :, :d_model]
    kv = qkv[:, :, d_model:]
    if Sp != S:
        q = jnp.pad(q, ((0, 0), (0, Sp - S), (0, 0)))
        kv = jnp.pad(kv, ((0, 0), (0, Sp - S), (0, 0)))

    out = pl.pallas_call(
        functools.partial(_flash_attn_kernel, n_heads=n_heads, d_model=d_model,
                          d_head=d_head, s_actual=S, scale=scale),
        out_shape=jax.ShapeDtypeStruct((B, Sp, d_model), jnp.bfloat16),
        grid=(B, nq, nq),
        in_specs=[
            pl.BlockSpec((1, tq, d_model), lambda b, i, j: (b, i, 0)),       # q rows
            pl.BlockSpec((1, tq, 2 * d_model), lambda b, i, j: (b, j, 0)),   # kv rows
        ],
        out_specs=pl.BlockSpec((1, tq, d_model), lambda b, i, j: (b, i, 0)),
        scratch_shapes=[
            pltpu.VMEM((tq, n_heads), jnp.float32),   # running max
            pltpu.VMEM((tq, n_heads), jnp.float32),   # running denom
            pltpu.VMEM((tq, d_model), jnp.float32),   # output accumulator
        ],
        compiler_params=pltpu.CompilerParams(
            dimension_semantics=("parallel", "parallel", "arbitrary")),
    )(q, kv)
    return out[:, :S, :]


# ----------------------------------------------------------------------------
# Kernel 4: standalone LayerNorm (compressor final norm on the kept rows only)
# ----------------------------------------------------------------------------

def _layernorm_kernel(x_ref, g_ref, b_ref, o_ref, *, k_actual, eps):
    x = x_ref[...].astype(jnp.float32)
    mean = jnp.sum(x, axis=-1, keepdims=True) / float(k_actual)
    var = jnp.sum(x * x, axis=-1, keepdims=True) / float(k_actual) - mean * mean
    var = jnp.maximum(var, 0.0)
    xn = (x - mean) * jax.lax.rsqrt(var + eps)
    o_ref[...] = (xn * g_ref[...] + b_ref[...]).astype(o_ref.dtype)


def layernorm(x, g, b, eps=1e-5, out_dtype=jnp.bfloat16):
    M, K = x.shape
    tm = _tile(M, 256, 8)
    Kp = _round_up(K, 128)
    Mp = _round_up(M, tm)
    xp = _pad2(x.astype(jnp.bfloat16), Mp, Kp)
    gp = _pad2(g.reshape(1, K).astype(jnp.float32), 1, Kp)
    bp = _pad2(b.reshape(1, K).astype(jnp.float32), 1, Kp)
    out = pl.pallas_call(
        functools.partial(_layernorm_kernel, k_actual=K, eps=eps),
        out_shape=jax.ShapeDtypeStruct((Mp, Kp), out_dtype),
        grid=(Mp // tm,),
        in_specs=[pl.BlockSpec((tm, Kp), lambda i: (i, 0)),
                  pl.BlockSpec((1, Kp), lambda i: (0, 0)),
                  pl.BlockSpec((1, Kp), lambda i: (0, 0))],
        out_specs=pl.BlockSpec((tm, Kp), lambda i: (i, 0)),
        compiler_params=pltpu.CompilerParams(dimension_semantics=("parallel",)),
    )(xp, gp, bp)
    return out[:M, :K]


# ----------------------------------------------------------------------------
# Kernel 5: fused final-LayerNorm + lm_head + shifted cross-entropy
#   (ignore_index = -100).  grid = (row tiles, vocab tiles); online logsumexp
#   + label pick in VMEM scratch.  Logits are also written out (the module
#   returns them).
# ----------------------------------------------------------------------------

def _ln_lmhead_ce_kernel(h_ref, g_ref, b_ref, w_ref, lbl_ref, logits_ref,
                         loss_ref, m_sc, l_sc, pick_sc,
                         *, k_actual, v_actual, eps):
    j = pl.program_id(1)
    nv = pl.num_programs(1)
    tv = w_ref.shape[1]

    @pl.when(j == 0)
    def _():
        m_sc[...] = jnp.full_like(m_sc, -jnp.inf)
        l_sc[...] = jnp.zeros_like(l_sc)
        pick_sc[...] = jnp.zeros_like(pick_sc)

    # final LayerNorm of the decoder, computed only for the rows that feed
    # the lm_head (the rest of the sequence never reaches this kernel).
    x = h_ref[...].astype(jnp.float32)                          # (tm, Kp)
    mean = jnp.sum(x, axis=-1, keepdims=True) / float(k_actual)
    var = jnp.sum(x * x, axis=-1, keepdims=True) / float(k_actual) - mean * mean
    var = jnp.maximum(var, 0.0)
    xn = (x - mean) * jax.lax.rsqrt(var + eps)
    xn = (xn * g_ref[...] + b_ref[...]).astype(jnp.bfloat16)

    logits = jnp.dot(xn, w_ref[...],
                     preferred_element_type=jnp.float32)        # (tm, tv)
    logits_ref[...] = logits

    col = j * tv + jax.lax.broadcasted_iota(jnp.int32, logits.shape, 1)
    s = jnp.where(col < v_actual, logits, jnp.float32(-1e30))   # mask pad vocab
    m_prev = m_sc[...]
    m_new = jnp.maximum(m_prev, jnp.max(s, axis=-1, keepdims=True))
    alpha = jnp.exp(m_prev - m_new)
    l_sc[...] = alpha * l_sc[...] + jnp.sum(jnp.exp(s - m_new),
                                            axis=-1, keepdims=True)
    m_sc[...] = m_new
    lbl = lbl_ref[...]                                          # (tm, 1) int32
    pick_sc[...] += jnp.sum(jnp.where(col == lbl, logits, 0.0),
                            axis=-1, keepdims=True)

    @pl.when(j == nv - 1)
    def _():
        lse = m_sc[...] + jnp.log(l_sc[...])
        nll = lse - pick_sc[...]
        loss_ref[...] = jnp.where(lbl_ref[...] >= 0, nll, 0.0)


def ln_lm_head_cross_entropy(h, g, b, w, labels_flat, eps=1e-5):
    """h:(M,K) pre-final-LN hidden, w:(K,V), labels_flat:(M,) int32 (-100=ignore).

    Returns (logits (M,V) f32, per_row_nll (M,) f32 with ignored rows = 0)."""
    M, K = h.shape
    _, V = w.shape
    tm = _tile(M, 256, 8)
    tv = _tile(V, 512, 128)
    Kp = _round_up(K, 128)
    Mp = _round_up(M, tm)
    Vp = _round_up(V, tv)

    hp = _pad2(h.astype(jnp.bfloat16), Mp, Kp)
    wp = _pad2(w.astype(jnp.bfloat16), Kp, Vp)
    gp = _pad2(g.reshape(1, K).astype(jnp.float32), 1, Kp)
    bp = _pad2(b.reshape(1, K).astype(jnp.float32), 1, Kp)
    lbl = jnp.full((Mp, 1), -100, jnp.int32).at[:M, 0].set(
        labels_flat.astype(jnp.int32))

    logits, loss = pl.pallas_call(
        functools.partial(_ln_lmhead_ce_kernel, k_actual=K, v_actual=V, eps=eps),
        out_shape=(jax.ShapeDtypeStruct((Mp, Vp), jnp.float32),
                   jax.ShapeDtypeStruct((Mp, 1), jnp.float32)),
        grid=(Mp // tm, Vp // tv),
        in_specs=[
            pl.BlockSpec((tm, Kp), lambda i, j: (i, 0)),
            pl.BlockSpec((1, Kp), lambda i, j: (0, 0)),
            pl.BlockSpec((1, Kp), lambda i, j: (0, 0)),
            pl.BlockSpec((Kp, tv), lambda i, j: (0, j)),
            pl.BlockSpec((tm, 1), lambda i, j: (i, 0)),
        ],
        out_specs=(pl.BlockSpec((tm, tv), lambda i, j: (i, j)),
                   pl.BlockSpec((tm, 1), lambda i, j: (i, 0))),
        scratch_shapes=[pltpu.VMEM((tm, 1), jnp.float32),
                        pltpu.VMEM((tm, 1), jnp.float32),
                        pltpu.VMEM((tm, 1), jnp.float32)],
        compiler_params=pltpu.CompilerParams(
            dimension_semantics=("parallel", "arbitrary")),
    )(hp, gp, bp, wp, lbl)
    return logits[:M, :V], loss[:M, 0]


# ----------------------------------------------------------------------------
# Synthetic "PreTrainedModel": tiny 1-layer pre-LN causal transformer.
# Returns the PRE-final-LayerNorm hidden states; callers apply the final LN
# only on the positions they actually need (or fuse it downstream).
# ----------------------------------------------------------------------------

def transformer_layers(m, inputs_embeds):
    """Returns pre-final-LN hidden states (B, S, D) in bf16."""
    B, S, D = inputs_embeds.shape
    H = m["heads"]
    x = inputs_embeds.astype(jnp.bfloat16).reshape(B * S, D)
    for layer in m["layers"]:
        # fused LN1 + packed QKV projection (one matmul, N = 3D)
        qkv = ln_linear(x, layer["ln1_g"], layer["ln1_b"],
                        layer["w_qkv"], layer["b_qkv"])          # (B*S, 3D)
        attn = flash_attention(qkv.reshape(B, S, 3 * D), H, D)   # (B, S, D)
        # Wo projection with residual fused into epilogue
        x = linear_residual(attn.reshape(B * S, D),
                            layer["wo"], layer["bo"], x)
        # fused LN2 + MLP up-projection + GELU
        up = ln_linear(x, layer["ln2_g"], layer["ln2_b"],
                       layer["w1"], layer["b1"], activation="gelu")
        # MLP down-projection with residual fused into epilogue
        x = linear_residual(up, layer["w2"], layer["b2"], x)
    return x.reshape(B, S, D)


# ----------------------------------------------------------------------------
# CoComForPretrining forward
# ----------------------------------------------------------------------------

def cocom_forward(params, contexts, question, labels):
    comp = params["compressor"]
    dec = params["decoder"]
    B, Lc = contexts.shape
    Cl = params["compression_length"]
    D = dec["hidden"]
    V = dec["vocab"]

    # compression-token embeddings (pure gather, no one-hot matmul)
    min_length = min(Cl, Lc)
    comp_ids = jnp.broadcast_to(
        jnp.arange(min_length, dtype=jnp.int32)[None, :], (B, min_length))
    compression_embeds = jnp.take(params["compression_embed"], comp_ids, axis=0)

    # compressor: [context embeds ; compression embeds]
    ctx_embeds = jnp.take(comp["embed"], contexts, axis=0)
    comp_inputs = jnp.concatenate(
        [ctx_embeds, compression_embeds], axis=1).astype(jnp.bfloat16)
    comp_pre = transformer_layers(comp, comp_inputs)          # pre-final-LN
    # final LN only on the rows we keep (last Cl positions)
    last_rows = comp_pre[:, -Cl:].reshape(B * Cl, D)
    last_hidden = layernorm(last_rows, comp["lnf_g"],
                            comp["lnf_b"]).reshape(B, Cl, D)  # (B, Cl, D)

    # decoder: [question embeds ; compressed states ; sep embed]
    length = labels.shape[1]
    q_embeds = jnp.take(dec["embed"], question, axis=0)
    sep_embed = jnp.broadcast_to(
        dec["embed"][params["sep_token_id"]][None, None, :], (B, 1, D))
    inputs_embeds = jnp.concatenate(
        [q_embeds.astype(jnp.bfloat16),
         last_hidden.astype(jnp.bfloat16),
         sep_embed.astype(jnp.bfloat16)], axis=1)
    dec_pre = transformer_layers(dec, inputs_embeds)          # pre-final-LN
    last_h = dec_pre[:, -length:, :].reshape(B * length, D)   # only kept rows

    # shifted labels: position t predicts labels[:, t+1]; last position ignored
    shift_labels = jnp.concatenate(
        [labels[:, 1:], jnp.full((B, 1), -100, labels.dtype)], axis=1)
    labels_flat = shift_labels.reshape(-1)

    # fused final-LN + lm_head + cross-entropy (logits also produced, as the
    # module returns them)
    logits_flat, per_row_nll = ln_lm_head_cross_entropy(
        last_h, dec["lnf_g"], dec["lnf_b"], dec["lm_head_w"], labels_flat)
    logits = logits_flat.reshape(B, length, V)

    valid = (labels_flat >= 0).astype(jnp.float32)
    loss = jnp.sum(per_row_nll) / jnp.maximum(jnp.sum(valid), 1.0)
    return loss, logits


# ----------------------------------------------------------------------------
# Deterministic parameter init
# ----------------------------------------------------------------------------

def init_tiny_model(key, vocab, hidden, heads, ffn, n_layers=1):
    keys = jax.random.split(key, 2 + 4 * n_layers)
    ki = iter(keys)

    def w(shape, scale=0.02):
        return jax.random.normal(next(ki), shape, jnp.float32) * scale

    D, F = hidden, ffn
    layers = []
    for _ in range(n_layers):
        layers.append(dict(
            ln1_g=jnp.ones((D,), jnp.float32), ln1_b=jnp.zeros((D,), jnp.float32),
            w_qkv=w((D, 3 * D)), b_qkv=jnp.zeros((3 * D,), jnp.float32),
            wo=w((D, D)), bo=jnp.zeros((D,), jnp.float32),
            ln2_g=jnp.ones((D,), jnp.float32), ln2_b=jnp.zeros((D,), jnp.float32),
            w1=w((D, F)), b1=jnp.zeros((F,), jnp.float32),
            w2=w((F, D)), b2=jnp.zeros((D,), jnp.float32),
        ))
    return dict(
        vocab=vocab, hidden=hidden, heads=heads,
        embed=w((vocab, hidden)),
        layers=layers,
        lnf_g=jnp.ones((hidden,), jnp.float32),
        lnf_b=jnp.zeros((hidden,), jnp.float32),
        lm_head_w=w((hidden, vocab)),
    )


def init_cocom_params(key, vocab, hidden, heads, ffn, compression_length,
                      sep_token_id):
    k1, k2, k3 = jax.random.split(key, 3)
    return dict(
        compressor=init_tiny_model(k1, vocab, hidden, heads, ffn),
        decoder=init_tiny_model(k2, vocab, hidden, heads, ffn),
        compression_embed=jax.random.normal(
            k3, (compression_length, hidden), jnp.float32) * 0.02,
        compression_length=compression_length,
        sep_token_id=sep_token_id,
    )


# ----------------------------------------------------------------------------
# main
# ----------------------------------------------------------------------------

if __name__ == "__main__":
    key = jax.random.PRNGKey(0)
    B, Lc, Lq, Ll = 2, 8, 6, 5       # batch, context len, question len, labels len
    V, D, H, F = 64, 32, 2, 64       # vocab, hidden, heads, ffn
    Cl = 4                           # compression_length
    SEP = 2                          # sep_token_id

    kp, kc, kq, kl = jax.random.split(key, 4)
    params = init_cocom_params(kp, V, D, H, F, Cl, SEP)

    contexts = jax.random.randint(kc, (B, Lc), 0, V, dtype=jnp.int32)
    question = jax.random.randint(kq, (B, Lq), 0, V, dtype=jnp.int32)
    labels = jax.random.randint(kl, (B, Ll), 0, V, dtype=jnp.int32)

    fwd = jax.jit(lambda c, q, l: cocom_forward(params, c, q, l))
    loss, logits = fwd(contexts, question, labels)
    jax.block_until_ready((loss, logits))
    assert logits.shape == (B, Ll, V)
    assert bool(jnp.isfinite(loss))
    print("KERNEL_OK")
</pallas_src>

<mosaic_0001>
module attributes {stable_mosaic.version = 11 : i64} {
  func.func @_ln_matmul_kernel(%arg0: i32, %arg1: i32, %arg2: memref<24x128xbf16, #tpu.memory_space<vmem>>, %arg3: memref<1x128xf32, #tpu.memory_space<vmem>>, %arg4: memref<1x128xf32, #tpu.memory_space<vmem>>, %arg5: memref<128x128xbf16, #tpu.memory_space<vmem>>, %arg6: memref<1x128xf32, #tpu.memory_space<vmem>>, %arg7: memref<24x128xbf16, #tpu.memory_space<vmem>>) attributes {dimension_semantics = [#tpu.dimension_semantics<parallel>, #tpu.dimension_semantics<parallel>], iteration_bounds = array<i64: 1, 1>, scalar_prefetch = 0 : i64, scratch_operands = 0 : i64, tpu.core_type = #tpu.core_type<tc>, window_params = [{transform_indices = @transform_0, window_bounds = array<i64: 24, 128>}, {pipeline_mode = #tpu.pipeline_mode<synchronous>, transform_indices = @transform_1, window_bounds = array<i64: 1, 128>}, {pipeline_mode = #tpu.pipeline_mode<synchronous>, transform_indices = @transform_2, window_bounds = array<i64: 1, 128>}, {transform_indices = @transform_3, window_bounds = array<i64: 128, 128>}, {transform_indices = @transform_4, window_bounds = array<i64: 1, 128>}, {transform_indices = @transform_5, window_bounds = array<i64: 24, 128>}]} {
    %c0 = arith.constant 0 : index
    %c0_0 = arith.constant 0 : index
    %0 = vector.load %arg2[%c0, %c0_0] : memref<24x128xbf16, #tpu.memory_space<vmem>>, vector<24x128xbf16>
    %1 = arith.extf %0 : vector<24x128xbf16> to vector<24x128xf32>
    %cst = arith.constant dense<0.000000e+00> : vector<24xf32>
    %2 = vector.multi_reduction <add>, %1, %cst [1] : vector<24x128xf32> to vector<24xf32>
    %3 = vector.shape_cast %2 : vector<24xf32> to vector<24x1xf32>
    %cst_1 = arith.constant 3.200000e+01 : f32
    %4 = vector.broadcast %cst_1 : f32 to vector<24x1xf32>
    %5 = arith.divf %3, %4 : vector<24x1xf32>
    %6 = arith.mulf %1, %1 : vector<24x128xf32>
    %cst_2 = arith.constant dense<0.000000e+00> : vector<24xf32>
    %7 = vector.multi_reduction <add>, %6, %cst_2 [1] : vector<24x128xf32> to vector<24xf32>
    %8 = vector.shape_cast %7 : vector<24xf32> to vector<24x1xf32>
    %cst_3 = arith.constant 3.200000e+01 : f32
    %9 = vector.broadcast %cst_3 : f32 to vector<24x1xf32>
    %10 = arith.divf %8, %9 : vector<24x1xf32>
    %11 = arith.mulf %5, %5 : vector<24x1xf32>
    %12 = arith.subf %10, %11 : vector<24x1xf32>
    %cst_4 = arith.constant 0.000000e+00 : f32
    %13 = vector.broadcast %cst_4 : f32 to vector<24x1xf32>
    %14 = arith.maximumf %12, %13 : vector<24x1xf32>
    %15 = vector.broadcast %5 : vector<24x1xf32> to vector<24x128xf32>
    %16 = arith.subf %1, %15 : vector<24x128xf32>
    %cst_5 = arith.constant 9.99999974E-6 : f32
    %17 = vector.broadcast %cst_5 : f32 to vector<24x1xf32>
    %18 = arith.addf %14, %17 : vector<24x1xf32>
    %19 = math.rsqrt %18 : vector<24x1xf32>
    %20 = vector.broadcast %19 : vector<24x1xf32> to vector<24x128xf32>
    %21 = arith.mulf %16, %20 : vector<24x128xf32>
    %c0_6 = arith.constant 0 : index
    %c0_7 = arith.constant 0 : index
    %22 = vector.load %arg3[%c0_6, %c0_7] : memref<1x128xf32, #tpu.memory_space<vmem>>, vector<1x128xf32>
    %23 = vector.broadcast %22 : vector<1x128xf32> to vector<24x128xf32>
    %24 = arith.mulf %21, %23 : vector<24x128xf32>
    %c0_8 = arith.constant 0 : index
    %c0_9 = arith.constant 0 : index
    %25 = vector.load %arg4[%c0_8, %c0_9] : memref<1x128xf32, #tpu.memory_space<vmem>>, vector<1x128xf32>
    %26 = vector.broadcast %25 : vector<1x128xf32> to vector<24x128xf32>
    %27 = arith.addf %24, %26 : vector<24x128xf32>
    %28 = arith.truncf %27 : vector<24x128xf32> to vector<24x128xbf16>
    %c0_10 = arith.constant 0 : index
    %c0_11 = arith.constant 0 : index
    %29 = vector.load %arg5[%c0_10, %c0_11] : memref<128x128xbf16, #tpu.memory_space<vmem>>, vector<128x128xbf16>
    %cst_12 = arith.constant dense<0.000000e+00> : vector<24x128xf32>
    %30 = tpu.matmul %28, %29, %cst_12 {dimension_numbers = #tpu.dot_dimension_numbers<[1], [0], [0], [1], [0, 0, 1, 1], [], []>} : vector<24x128xbf16>, vector<128x128xbf16>, vector<24x128xf32> -> vector<24x128xf32>
    %c0_13 = arith.constant 0 : index
    %c0_14 = arith.constant 0 : index
    %31 = vector.load %arg6[%c0_13, %c0_14] : memref<1x128xf32, #tpu.memory_space<vmem>>, vector<1x128xf32>
    %32 = vector.broadcast %31 : vector<1x128xf32> to vector<24x128xf32>
    %33 = arith.addf %30, %32 : vector<24x128xf32>
    %34 = arith.truncf %33 : vector<24x128xf32> to vector<24x128xbf16>
    %c0_15 = arith.constant 0 : index
    %c0_16 = arith.constant 0 : index
    %35 = vector.load %arg7[%c0_15, %c0_16] : memref<24x128xbf16, #tpu.memory_space<vmem>>, vector<24x128xbf16>
    tpu.vector_store %arg7[%c0_15, %c0_16], %34 {strides = array<i32>} : memref<24x128xbf16, #tpu.memory_space<vmem>>, vector<24x128xbf16>,
    return
  }
  func.func @transform_0(%arg0: i32, %arg1: i32) -> (i32, i32) {
    %c0_i32 = arith.constant 0 : i32
    %c0_i32_0 = arith.constant 0 : i32
    return %arg0, %c0_i32 : i32, i32
  }
  func.func @transform_1(%arg0: i32, %arg1: i32) -> (i32, i32) {
    %c0_i32 = arith.constant 0 : i32
    %c0_i32_0 = arith.constant 0 : i32
    %c0_i32_1 = arith.constant 0 : i32
    return %c0_i32, %c0_i32_0 : i32, i32
  }
  func.func @transform_2(%arg0: i32, %arg1: i32) -> (i32, i32) {
    %c0_i32 = arith.constant 0 : i32
    %c0_i32_0 = arith.constant 0 : i32
    %c0_i32_1 = arith.constant 0 : i32
    return %c0_i32, %c0_i32_0 : i32, i32
  }
  func.func @transform_3(%arg0: i32, %arg1: i32) -> (i32, i32) {
    %c0_i32 = arith.constant 0 : i32
    %c0_i32_0 = arith.constant 0 : i32
    return %c0_i32, %arg1 : i32, i32
  }
  func.func @transform_4(%arg0: i32, %arg1: i32) -> (i32, i32) {
    %c0_i32 = arith.constant 0 : i32
    %c0_i32_0 = arith.constant 0 : i32
    return %c0_i32, %arg1 : i32, i32
  }
  func.func @transform_5(%arg0: i32, %arg1: i32) -> (i32, i32) {
    %c0_i32 = arith.constant 0 : i32
    return %arg0, %arg1 : i32, i32
  }
}

module attributes {stable_mosaic.version = 11 : i64} {
  func.func @_matmul_resid_kernel(%arg0: i32, %arg1: i32, %arg2: i32, %arg3: memref<24x128xbf16, #tpu.memory_space<vmem>>, %arg4: memref<128x128xbf16, #tpu.memory_space<vmem>>, %arg5: memref<1x128xf32, #tpu.memory_space<vmem>>, %arg6: memref<24x128xbf16, #tpu.memory_space<vmem>>, %arg7: memref<24x128xbf16, #tpu.memory_space<vmem>>, %arg8: memref<24x128xf32, #tpu.memory_space<vmem>>) attributes {dimension_semantics = [#tpu.dimension_semantics<parallel>, #tpu.dimension_semantics<parallel>, #tpu.dimension_semantics<arbitrary>], iteration_bounds = array<i64: 1, 1, 1>, scalar_prefetch = 0 : i64, scratch_operands = 1 : i64, tpu.core_type = #tpu.core_type<tc>, window_params = [{transform_indices = @transform_0, window_bounds = array<i64: 24, 128>}, {transform_indices = @transform_1, window_bounds = array<i64: 128, 128>}, {transform_indices = @transform_2, window_bounds = array<i64: 1, 128>}, {transform_indices = @transform_3, window_bounds = array<i64: 24, 128>}, {transform_indices = @transform_4, window_bounds = array<i64: 24, 128>}]} {
    %c0_i32 = arith.constant 0 : i32
    %0 = arith.cmpi eq, %arg2, %c0_i32 : i32
    %1 = arith.extui %0 : i1 to i32
    %c0_i32_0 = arith.constant 0 : i32
    %2 = arith.cmpi ne, %1, %c0_i32_0 : i32
    scf.if %2 {
      %cst_10 = arith.constant 0.000000e+00 : f32
      %12 = vector.broadcast %cst_10 : f32 to vector<24x128xf32>
      %c0_11 = arith.constant 0 : index
      %c0_12 = arith.constant 0 : index
      %13 = vector.load %arg8[%c0_11, %c0_12] : memref<24x128xf32, #tpu.memory_space<vmem>>, vector<24x128xf32>
      tpu.vector_store %arg8[%c0_11, %c0_12], %12 {strides = array<i32>} : memref<24x128xf32, #tpu.memory_space<vmem>>, vector<24x128xf32>,
    } else {
    }
    %c0 = arith.constant 0 : index
    %c0_1 = arith.constant 0 : index
    %3 = vector.load %arg8[%c0, %c0_1] : memref<24x128xf32, #tpu.memory_space<vmem>>, vector<24x128xf32>
    %c0_2 = arith.constant 0 : index
    %c0_3 = arith.constant 0 : index
    %4 = vector.load %arg3[%c0_2, %c0_3] : memref<24x128xbf16, #tpu.memory_space<vmem>>, vector<24x128xbf16>
    %c0_4 = arith.constant 0 : index
    %c0_5 = arith.constant 0 : index
    %5 = vector.load %arg4[%c0_4, %c0_5] : memref<128x128xbf16, #tpu.memory_space<vmem>>, vector<128x128xbf16>
    %cst = arith.constant dense<0.000000e+00> : vector<24x128xf32>
    %6 = tpu.matmul %4, %5, %cst {dimension_numbers = #tpu.dot_dimension_numbers<[1], [0], [0], [1], [0, 0, 1, 1], [], []>} : vector<24x128xbf16>, vector<128x128xbf16>, vector<24x128xf32> -> vector<24x128xf32>
    %7 = arith.addf %3, %6 : vector<24x128xf32>
    %c0_6 = arith.constant 0 : index
    %c0_7 = arith.constant 0 : index
    %8 = vector.load %arg8[%c0_6, %c0_7] : memref<24x128xf32, #tpu.memory_space<vmem>>, vector<24x128xf32>
    tpu.vector_store %arg8[%c0_6, %c0_7], %7 {strides = array<i32>} : memref<24x128xf32, #tpu.memory_space<vmem>>, vector<24x128xf32>,
    %c0_i32_8 = arith.constant 0 : i32
    %9 = arith.cmpi eq, %arg2, %c0_i32_8 : i32
    %10 = arith.extui %9 : i1 to i32
    %c0_i32_9 = arith.constant 0 : i32
    %11 = arith.cmpi ne, %10, %c0_i32_9 : i32
    scf.if %11 {
      %c0_10 = arith.constant 0 : index
      %c0_11 = arith.constant 0 : index
      %12 = vector.load %arg8[%c0_10, %c0_11] : memref<24x128xf32, #tpu.memory_space<vmem>>, vector<24x128xf32>
      %c0_12 = arith.constant 0 : index
      %c0_13 = arith.constant 0 : index
      %13 = vector.load %arg5[%c0_12, %c0_13] : memref<1x128xf32, #tpu.memory_space<vmem>>, vector<1x128xf32>
      %14 = vector.broadcast %13 : vector<1x128xf32> to vector<24x128xf32>
      %15 = arith.addf %12, %14 : vector<24x128xf32>
      %c0_14 = arith.constant 0 : index
      %c0_15 = arith.constant 0 : index
      %16 = vector.load %arg6[%c0_14, %c0_15] : memref<24x128xbf16, #tpu.memory_space<vmem>>, vector<24x128xbf16>
      %17 = arith.extf %16 : vector<24x128xbf16> to vector<24x128xf32>
      %18 = arith.addf %15, %17 : vector<24x128xf32>
      %19 = arith.truncf %18 : vector<24x128xf32> to vector<24x128xbf16>
      %c0_16 = arith.constant 0 : index
      %c0_17 = arith.constant 0 : index
      %20 = vector.load %arg7[%c0_16, %c0_17] : memref<24x128xbf16, #tpu.memory_space<vmem>>, vector<24x128xbf16>
      tpu.vector_store %arg7[%c0_16, %c0_17], %19 {strides = array<i32>} : memref<24x128xbf16, #tpu.memory_space<vmem>>, vector<24x128xbf16>,
    } else {
    }
    return
  }
  func.func @transform_0(%arg0: i32, %arg1: i32, %arg2: i32) -> (i32, i32) {
    %c0_i32 = arith.constant 0 : i32
    return %arg0, %arg2 : i32, i32
  }
  func.func @transform_1(%arg0: i32, %arg1: i32, %arg2: i32) -> (i32, i32) {
    %c0_i32 = arith.constant 0 : i32
    return %arg2, %arg1 : i32, i32
  }
  func.func @transform_2(%arg0: i32, %arg1: i32, %arg2: i32) -> (i32, i32) {
    %c0_i32 = arith.constant 0 : i32
    %c0_i32_0 = arith.constant 0 : i32
    return %c0_i32, %arg1 : i32, i32
  }
  func.func @transform_3(%arg0: i32, %arg1: i32, %arg2: i32) -> (i32, i32) {
    %c0_i32 = arith.constant 0 : i32
    return %arg0, %arg1 : i32, i32
  }
  func.func @transform_4(%arg0: i32, %arg1: i32, %arg2: i32) -> (i32, i32) {
    %c0_i32 = arith.constant 0 : i32
    return %arg0, %arg1 : i32, i32
  }
}

module attributes {stable_mosaic.version = 11 : i64} {
  func.func @_flash_attn_kernel(%arg0: i32, %arg1: i32, %arg2: i32, %arg3: memref<1x16x32xbf16, #tpu.memory_space<vmem>>, %arg4: memref<1x16x64xbf16, #tpu.memory_space<vmem>>, %arg5: memref<1x16x32xbf16, #tpu.memory_space<vmem>>, %arg6: memref<16x2xf32, #tpu.memory_space<vmem>>, %arg7: memref<16x2xf32, #tpu.memory_space<vmem>>, %arg8: memref<16x32xf32, #tpu.memory_space<vmem>>) attributes {dimension_semantics = [#tpu.dimension_semantics<parallel>, #tpu.dimension_semantics<parallel>, #tpu.dimension_semantics<arbitrary>], iteration_bounds = array<i64: 2, 1, 1>, scalar_prefetch = 0 : i64, scratch_operands = 3 : i64, tpu.core_type = #tpu.core_type<tc>, window_params = [{transform_indices = @transform_0, window_bounds = array<i64: 1, 16, 32>}, {transform_indices = @transform_1, window_bounds = array<i64: 1, 16, 64>}, {transform_indices = @transform_2, window_bounds = array<i64: 1, 16, 32>}]} {
    %c0_i32 = arith.constant 0 : i32
    %0 = arith.cmpi eq, %arg2, %c0_i32 : i32
    %1 = arith.extui %0 : i1 to i32
    %c0_i32_0 = arith.constant 0 : i32
    %2 = arith.cmpi ne, %1, %c0_i32_0 : i32
    scf.if %2 {
      %cst = arith.constant 0xFF800000 : f32
      %12 = vector.broadcast %cst : f32 to vector<16x2xf32>
      %c0 = arith.constant 0 : index
      %c0_5 = arith.constant 0 : index
      %13 = vector.load %arg6[%c0, %c0_5] : memref<16x2xf32, #tpu.memory_space<vmem>>, vector<16x2xf32>
      tpu.vector_store %arg6[%c0, %c0_5], %12 {strides = array<i32>} : memref<16x2xf32, #tpu.memory_space<vmem>>, vector<16x2xf32>,
      %cst_6 = arith.constant 0.000000e+00 : f32
      %14 = vector.broadcast %cst_6 : f32 to vector<16x2xf32>
      %c0_7 = arith.constant 0 : index
      %c0_8 = arith.constant 0 : index
      %15 = vector.load %arg7[%c0_7, %c0_8] : memref<16x2xf32, #tpu.memory_space<vmem>>, vector<16x2xf32>
      tpu.vector_store %arg7[%c0_7, %c0_8], %14 {strides = array<i32>} : memref<16x2xf32, #tpu.memory_space<vmem>>, vector<16x2xf32>,
      %cst_9 = arith.constant 0.000000e+00 : f32
      %16 = vector.broadcast %cst_9 : f32 to vector<16x32xf32>
      %c0_10 = arith.constant 0 : index
      %c0_11 = arith.constant 0 : index
      %17 = vector.load %arg8[%c0_10, %c0_11] : memref<16x32xf32, #tpu.memory_space<vmem>>, vector<16x32xf32>
      tpu.vector_store %arg8[%c0_10, %c0_11], %16 {strides = array<i32>} : memref<16x32xf32, #tpu.memory_space<vmem>>, vector<16x32xf32>,
    } else {
    }
    %c16_i32 = arith.constant 16 : i32
    %3 = arith.muli %arg1, %c16_i32 : i32
    %c15_i32 = arith.constant 15 : i32
    %4 = arith.addi %3, %c15_i32 : i32
    %c16_i32_1 = arith.constant 16 : i32
    %5 = arith.muli %arg2, %c16_i32_1 : i32
    %6 = arith.cmpi sle, %5, %4 : i32
    %7 = arith.extui %6 : i1 to i32
    %c0_i32_2 = arith.constant 0 : i32
    %8 = arith.cmpi ne, %7, %c0_i32_2 : i32
    scf.if %8 {
      %c0 = arith.constant 0 : index
      %c0_5 = arith.constant 0 : index
      %c0_6 = arith.constant 0 : index
      %12 = vector.load %arg3[%c0, %c0_5, %c0_6] : memref<1x16x32xbf16, #tpu.memory_space<vmem>>, vector<1x16x32xbf16>
      %13 = vector.shape_cast %12 : vector<1x16x32xbf16> to vector<16x32xbf16>
      %c0_7 = arith.constant 0 : index
      %c0_8 = arith.constant 0 : index
      %c0_9 = arith.constant 0 : index
      %14 = vector.load %arg4[%c0_7, %c0_8, %c0_9] : memref<1x16x64xbf16, #tpu.memory_space<vmem>>, vector<1x16x64xbf16>
      %15 = vector.shape_cast %14 : vector<1x16x64xbf16> to vector<16x64xbf16>
      %c16_i32_10 = arith.constant 16 : i32
      %16 = arith.muli %arg1, %c16_i32_10 : i32
      %17 = tpu.iota {dimensions = array<i32: 0>} : vector<16x16xi32>
      %18 = vector.broadcast %16 : i32 to vector<16x16xi32>
      %19 = arith.addi %18, %17 : vector<16x16xi32>
      %c16_i32_11 = arith.constant 16 : i32
      %20 = arith.muli %arg2, %c16_i32_11 : i32
      %21 = tpu.iota {dimensions = array<i32: 1>} : vector<16x16xi32>
      %22 = vector.broadcast %20 : i32 to vector<16x16xi32>
      %23 = arith.addi %22, %21 : vector<16x16xi32>
      %24 = arith.cmpi sle, %23, %19 : vector<16x16xi32>
      %c12_i32 = arith.constant 12 : i32
      %25 = vector.broadcast %c12_i32 : i32 to vector<16x16xi32>
      %26 = arith.cmpi slt, %23, %25 : vector<16x16xi32>
      %27 = arith.andi %24, %26 : vector<16x16xi1>
      %28 = vector.extract_strided_slice %13 {offsets = [0, 0], sizes = [16, 16], strides = [1, 1]} : vector<16x32xbf16> to vector<16x16xbf16>
      %29 = vector.extract_strided_slice %15 {offsets = [0, 0], sizes = [16, 16], strides = [1, 1]} : vector<16x64xbf16> to vector<16x16xbf16>
      %30 = vector.extract_strided_slice %15 {offsets = [0, 32], sizes = [16, 16], strides = [1, 1]} : vector<16x64xbf16> to vector<16x16xbf16>
      %cst = arith.constant dense<0.000000e+00> : vector<16x16xf32>
      %31 = tpu.matmul %28, %29, %cst {dimension_numbers = #tpu.dot_dimension_numbers<[1], [1], [0], [0], [0, 0, 1, 0], [], []>} : vector<16x16xbf16>, vector<16x16xbf16>, vector<16x16xf32> -> vector<16x16xf32>
      %cst_12 = arith.constant 2.500000e-01 : f32
      %32 = vector.broadcast %cst_12 : f32 to vector<16x16xf32>
      %33 = arith.mulf %31, %32 : vector<16x16xf32>
      %cst_13 = arith.constant -1.000000e+30 : f32
      %34 = vector.broadcast %cst_13 : f32 to vector<16x16xf32>
      %35 = arith.select %27, %33, %34 : vector<16x16xi1>, vector<16x16xf32>
      %c0_14 = arith.constant 0 : index
      %c0_15 = arith.constant 0 : index
      %36 = vector.load %arg6[%c0_14, %c0_15] : memref<16x2xf32, #tpu.memory_space<vmem>>, vector<16x1xf32>
      %cst_16 = arith.constant dense<0xFF800000> : vector<16xf32>
      %37 = vector.multi_reduction <maximumf>, %35, %cst_16 [1] : vector<16x16xf32> to vector<16xf32>
      %38 = vector.shape_cast %37 : vector<16xf32> to vector<16x1xf32>
      %39 = arith.maximumf %36, %38 : vector<16x1xf32>
      %40 = arith.subf %36, %39 : vector<16x1xf32>
      %41 = math.exp %40 : vector<16x1xf32>
      %42 = vector.broadcast %39 : vector<16x1xf32> to vector<16x16xf32>
      %43 = arith.subf %35, %42 : vector<16x16xf32>
      %44 = math.exp %43 : vector<16x16xf32>
      %c0_17 = arith.constant 0 : index
      %c0_18 = arith.constant 0 : index
      %45 = vector.load %arg7[%c0_17, %c0_18] : memref<16x2xf32, #tpu.memory_space<vmem>>, vector<16x1xf32>
      %46 = arith.mulf %41, %45 : vector<16x1xf32>
      %cst_19 = arith.constant dense<0.000000e+00> : vector<16xf32>
      %47 = vector.multi_reduction <add>, %44, %cst_19 [1] : vector<16x16xf32> to vector<16xf32>
      %48 = vector.shape_cast %47 : vector<16xf32> to vector<16x1xf32>
      %49 = arith.addf %46, %48 : vector<16x1xf32>
      %c0_20 = arith.constant 0 : index
      %c0_21 = arith.constant 0 : index
      %50 = vector.load %arg7[%c0_20, %c0_21] : memref<16x2xf32, #tpu.memory_space<vmem>>, vector<16x1xf32>
      tpu.vector_store %arg7[%c0_20, %c0_21], %49 {strides = array<i32>} : memref<16x2xf32, #tpu.memory_space<vmem>>, vector<16x1xf32>,
      %c0_22 = arith.constant 0 : index
      %c0_23 = arith.constant 0 : index
      %51 = vector.load %arg8[%c0_22, %c0_23] : memref<16x32xf32, #tpu.memory_space<vmem>>, vector<16x16xf32>
      %52 = vector.broadcast %41 : vector<16x1xf32> to vector<16x16xf32>
      %53 = arith.mulf %52, %51 : vector<16x16xf32>
      %54 = arith.truncf %44 : vector<16x16xf32> to vector<16x16xbf16>
      %cst_24 = arith.constant dense<0.000000e+00> : vector<16x16xf32>
      %55 = tpu.matmul %54, %30, %cst_24 {dimension_numbers = #tpu.dot_dimension_numbers<[1], [0], [0], [1], [0, 0, 1, 1], [], []>} : vector<16x16xbf16>, vector<16x16xbf16>, vector<16x16xf32> -> vector<16x16xf32>
      %56 = arith.addf %53, %55 : vector<16x16xf32>
      %c0_25 = arith.constant 0 : index
      %c0_26 = arith.constant 0 : index
      %57 = vector.load %arg8[%c0_25, %c0_26] : memref<16x32xf32, #tpu.memory_space<vmem>>, vector<16x16xf32>
      tpu.vector_store %arg8[%c0_25, %c0_26], %56 {strides = array<i32>} : memref<16x32xf32, #tpu.memory_space<vmem>>, vector<16x16xf32>,
      %c0_27 = arith.constant 0 : index
      %c0_28 = arith.constant 0 : index
      %58 = vector.load %arg6[%c0_27, %c0_28] : memref<16x2xf32, #tpu.memory_space<vmem>>, vector<16x1xf32>
      tpu.vector_store %arg6[%c0_27, %c0_28], %39 {strides = array<i32>} : memref<16x2xf32, #tpu.memory_space<vmem>>, vector<16x1xf32>,
      %59 = vector.extract_strided_slice %13 {offsets = [0, 16], sizes = [16, 16], strides = [1, 1]} : vector<16x32xbf16> to vector<16x16xbf16>
      %60 = vector.extract_strided_slice %15 {offsets = [0, 16], sizes = [16, 16], strides = [1, 1]} : vector<16x64xbf16> to vector<16x16xbf16>
      %61 = vector.extract_strided_slice %15 {offsets = [0, 48], sizes = [16, 16], strides = [1, 1]} : vector<16x64xbf16> to vector<16x16xbf16>
      %cst_29 = arith.constant dense<0.000000e+00> : vector<16x16xf32>
      %62 = tpu.matmul %59, %60, %cst_29 {dimension_numbers = #tpu.dot_dimension_numbers<[1], [1], [0], [0], [0, 0, 1, 0], [], []>} : vector<16x16xbf16>, vector<16x16xbf16>, vector<16x16xf32> -> vector<16x16xf32>
      %cst_30 = arith.constant 2.500000e-01 : f32
      %63 = vector.broadcast %cst_30 : f32 to vector<16x16xf32>
      %64 = arith.mulf %62, %63 : vector<16x16xf32>
      %cst_31 = arith.constant -1.000000e+30 : f32
      %65 = vector.broadcast %cst_31 : f32 to vector<16x16xf32>
      %66 = arith.select %27, %64, %65 : vector<16x16xi1>, vector<16x16xf32>
      %c0_32 = arith.constant 0 : index
      %c1 = arith.constant 1 : index
      %67 = vector.load %arg6[%c0_32, %c1] : memref<16x2xf32, #tpu.memory_space<vmem>>, vector<16x1xf32>
      %cst_33 = arith.constant dense<0xFF800000> : vector<16xf32>
      %68 = vector.multi_reduction <maximumf>, %66, %cst_33 [1] : vector<16x16xf32> to vector<16xf32>
      %69 = vector.shape_cast %68 : vector<16xf32> to vector<16x1xf32>
      %70 = arith.maximumf %67, %69 : vector<16x1xf32>
      %71 = arith.subf %67, %70 : vector<16x1xf32>
      %72 = math.exp %71 : vector<16x1xf32>
      %73 = vector.broadcast %70 : vector<16x1xf32> to vector<16x16xf32>
      %74 = arith.subf %66, %73 : vector<16x16xf32>
      %75 = math.exp %74 : vector<16x16xf32>
      %c0_34 = arith.constant 0 : index
      %c1_35 = arith.constant 1 : index
      %76 = vector.load %arg7[%c0_34, %c1_35] : memref<16x2xf32, #tpu.memory_space<vmem>>, vector<16x1xf32>
      %77 = arith.mulf %72, %76 : vector<16x1xf32>
      %cst_36 = arith.constant dense<0.000000e+00> : vector<16xf32>
      %78 = vector.multi_reduction <add>, %75, %cst_36 [1] : vector<16x16xf32> to vector<16xf32>
      %79 = vector.shape_cast %78 : vector<16xf32> to vector<16x1xf32>
      %80 = arith.addf %77, %79 : vector<16x1xf32>
      %c0_37 = arith.constant 0 : index
      %c1_38 = arith.constant 1 : index
      %81 = vector.load %arg7[%c0_37, %c1_38] : memref<16x2xf32, #tpu.memory_space<vmem>>, vector<16x1xf32>
      tpu.vector_store %arg7[%c0_37, %c1_38], %80 {strides = array<i32>} : memref<16x2xf32, #tpu.memory_space<vmem>>, vector<16x1xf32>,
      %c0_39 = arith.constant 0 : index
      %c16 = arith.constant 16 : index
      %82 = vector.load %arg8[%c0_39, %c16] : memref<16x32xf32, #tpu.memory_space<vmem>>, vector<16x16xf32>
      %83 = vector.broadcast %72 : vector<16x1xf32> to vector<16x16xf32>
      %84 = arith.mulf %83, %82 : vector<16x16xf32>
      %85 = arith.truncf %75 : vector<16x16xf32> to vector<16x16xbf16>
      %cst_40 = arith.constant dense<0.000000e+00> : vector<16x16xf32>
      %86 = tpu.matmul %85, %61, %cst_40 {dimension_numbers = #tpu.dot_dimension_numbers<[1], [0], [0], [1], [0, 0, 1, 1], [], []>} : vector<16x16xbf16>, vector<16x16xbf16>, vector<16x16xf32> -> vector<16x16xf32>
      %87 = arith.addf %84, %86 : vector<16x16xf32>
      %c0_41 = arith.constant 0 : index
      %c16_42 = arith.constant 16 : index
      %88 = vector.load %arg8[%c0_41, %c16_42] : memref<16x32xf32, #tpu.memory_space<vmem>>, vector<16x16xf32>
      tpu.vector_store %arg8[%c0_41, %c16_42], %87 {strides = array<i32>} : memref<16x32xf32, #tpu.memory_space<vmem>>, vector<16x16xf32>,
      %c0_43 = arith.constant 0 : index
      %c1_44 = arith.constant 1 : index
      %89 = vector.load %arg6[%c0_43, %c1_44] : memref<16x2xf32, #tpu.memory_space<vmem>>, vector<16x1xf32>
      tpu.vector_store %arg6[%c0_43, %c1_44], %70 {strides = array<i32>} : memref<16x2xf32, #tpu.memory_space<vmem>>, vector<16x1xf32>,
    } else {
    }
    %c0_i32_3 = arith.constant 0 : i32
    %9 = arith.cmpi eq, %arg2, %c0_i32_3 : i32
    %10 = arith.extui %9 : i1 to i32
    %c0_i32_4 = arith.constant 0 : i32
    %11 = arith.cmpi ne, %10, %c0_i32_4 : i32
    scf.if %11 {
      %c0 = arith.constant 0 : index
      %c0_5 = arith.constant 0 : index
      %12 = vector.load %arg7[%c0, %c0_5] : memref<16x2xf32, #tpu.memory_space<vmem>>, vector<16x2xf32>
      %13 = tpu.reciprocal %12 {approx = true} : vector<16x2xf32> -> vector<16x2xf32>
      %c0_6 = arith.constant 0 : index
      %c0_7 = arith.constant 0 : index
      %14 = vector.load %arg8[%c0_6, %c0_7] : memref<16x32xf32, #tpu.memory_space<vmem>>, vector<16x16xf32>
      %15 = vector.extract_strided_slice %13 {offsets = [0, 0], sizes = [16, 1], strides = [1, 1]} : vector<16x2xf32> to vector<16x1xf32>
      %16 = vector.broadcast %15 : vector<16x1xf32> to vector<16x16xf32>
      %17 = arith.mulf %14, %16 : vector<16x16xf32>
      %c0_8 = arith.constant 0 : index
      %c16 = arith.constant 16 : index
      %18 = vector.load %arg8[%c0_8, %c16] : memref<16x32xf32, #tpu.memory_space<vmem>>, vector<16x16xf32>
      %19 = vector.extract_strided_slice %13 {offsets = [0, 1], sizes = [16, 1], strides = [1, 1]} : vector<16x2xf32> to vector<16x1xf32>
      %20 = vector.broadcast %19 : vector<16x1xf32> to vector<16x16xf32>
      %21 = arith.mulf %18, %20 : vector<16x16xf32>
      %22 = tpu.concatenate %17, %21 in 1 : vector<16x16xf32>, vector<16x16xf32> -> vector<16x32xf32>
      %23 = arith.truncf %22 : vector<16x32xf32> to vector<16x32xbf16>
      %c0_9 = arith.constant 0 : index
      %c0_10 = arith.constant 0 : index
      %c0_11 = arith.constant 0 : index
      %24 = vector.load %arg5[%c0_9, %c0_10, %c0_11] : memref<1x16x32xbf16, #tpu.memory_space<vmem>>, vector<1x16x32xbf16>
      %25 = vector.shape_cast %24 : vector<1x16x32xbf16> to vector<16x32xbf16>
      %26 = vector.shape_cast %23 : vector<16x32xbf16> to vector<1x16x32xbf16>
      tpu.vector_store %arg5[%c0_9, %c0_10, %c0_11], %26 {strides = array<i32>} : memref<1x16x32xbf16, #tpu.memory_space<vmem>>, vector<1x16x32xbf16>,
    } else {
    }
    return
  }
  func.func @transform_0(%arg0: i32, %arg1: i32, %arg2: i32) -> (i32, i32, i32) {
    %c0_i32 = arith.constant 0 : i32
    %c0_i32_0 = arith.constant 0 : i32
    return %arg0, %arg1, %c0_i32 : i32, i32, i32
  }
  func.func @transform_1(%arg0: i32, %arg1: i32, %arg2: i32) -> (i32, i32, i32) {
    %c0_i32 = arith.constant 0 : i32
    %c0_i32_0 = arith.constant 0 : i32
    return %arg0, %arg2, %c0_i32 : i32, i32, i32
  }
  func.func @transform_2(%arg0: i32, %arg1: i32, %arg2: i32) -> (i32, i32, i32) {
    %c0_i32 = arith.constant 0 : i32
    %c0_i32_0 = arith.constant 0 : i32
    return %arg0, %arg1, %c0_i32 : i32, i32, i32
  }
}

module attributes {stable_mosaic.version = 11 : i64} {
  func.func @_ln_matmul_kernel(%arg0: i32, %arg1: i32, %arg2: memref<24x128xbf16, #tpu.memory_space<vmem>>, %arg3: memref<1x128xf32, #tpu.memory_space<vmem>>, %arg4: memref<1x128xf32, #tpu.memory_space<vmem>>, %arg5: memref<128x128xbf16, #tpu.memory_space<vmem>>, %arg6: memref<1x128xf32, #tpu.memory_space<vmem>>, %arg7: memref<24x128xbf16, #tpu.memory_space<vmem>>) attributes {dimension_semantics = [#tpu.dimension_semantics<parallel>, #tpu.dimension_semantics<parallel>], iteration_bounds = array<i64: 1, 1>, scalar_prefetch = 0 : i64, scratch_operands = 0 : i64, tpu.core_type = #tpu.core_type<tc>, window_params = [{transform_indices = @transform_0, window_bounds = array<i64: 24, 128>}, {pipeline_mode = #tpu.pipeline_mode<synchronous>, transform_indices = @transform_1, window_bounds = array<i64: 1, 128>}, {pipeline_mode = #tpu.pipeline_mode<synchronous>, transform_indices = @transform_2, window_bounds = array<i64: 1, 128>}, {transform_indices = @transform_3, window_bounds = array<i64: 128, 128>}, {transform_indices = @transform_4, window_bounds = array<i64: 1, 128>}, {transform_indices = @transform_5, window_bounds = array<i64: 24, 128>}]} {
    %c0 = arith.constant 0 : index
    %c0_0 = arith.constant 0 : index
    %0 = vector.load %arg2[%c0, %c0_0] : memref<24x128xbf16, #tpu.memory_space<vmem>>, vector<24x128xbf16>
    %1 = arith.extf %0 : vector<24x128xbf16> to vector<24x128xf32>
    %cst = arith.constant dense<0.000000e+00> : vector<24xf32>
    %2 = vector.multi_reduction <add>, %1, %cst [1] : vector<24x128xf32> to vector<24xf32>
    %3 = vector.shape_cast %2 : vector<24xf32> to vector<24x1xf32>
    %cst_1 = arith.constant 3.200000e+01 : f32
    %4 = vector.broadcast %cst_1 : f32 to vector<24x1xf32>
    %5 = arith.divf %3, %4 : vector<24x1xf32>
    %6 = arith.mulf %1, %1 : vector<24x128xf32>
    %cst_2 = arith.constant dense<0.000000e+00> : vector<24xf32>
    %7 = vector.multi_reduction <add>, %6, %cst_2 [1] : vector<24x128xf32> to vector<24xf32>
    %8 = vector.shape_cast %7 : vector<24xf32> to vector<24x1xf32>
    %cst_3 = arith.constant 3.200000e+01 : f32
    %9 = vector.broadcast %cst_3 : f32 to vector<24x1xf32>
    %10 = arith.divf %8, %9 : vector<24x1xf32>
    %11 = arith.mulf %5, %5 : vector<24x1xf32>
    %12 = arith.subf %10, %11 : vector<24x1xf32>
    %cst_4 = arith.constant 0.000000e+00 : f32
    %13 = vector.broadcast %cst_4 : f32 to vector<24x1xf32>
    %14 = arith.maximumf %12, %13 : vector<24x1xf32>
    %15 = vector.broadcast %5 : vector<24x1xf32> to vector<24x128xf32>
    %16 = arith.subf %1, %15 : vector<24x128xf32>
    %cst_5 = arith.constant 9.99999974E-6 : f32
    %17 = vector.broadcast %cst_5 : f32 to vector<24x1xf32>
    %18 = arith.addf %14, %17 : vector<24x1xf32>
    %19 = math.rsqrt %18 : vector<24x1xf32>
    %20 = vector.broadcast %19 : vector<24x1xf32> to vector<24x128xf32>
    %21 = arith.mulf %16, %20 : vector<24x128xf32>
    %c0_6 = arith.constant 0 : index
    %c0_7 = arith.constant 0 : index
    %22 = vector.load %arg3[%c0_6, %c0_7] : memref<1x128xf32, #tpu.memory_space<vmem>>, vector<1x128xf32>
    %23 = vector.broadcast %22 : vector<1x128xf32> to vector<24x128xf32>
    %24 = arith.mulf %21, %23 : vector<24x128xf32>
    %c0_8 = arith.constant 0 : index
    %c0_9 = arith.constant 0 : index
    %25 = vector.load %arg4[%c0_8, %c0_9] : memref<1x128xf32, #tpu.memory_space<vmem>>, vector<1x128xf32>
    %26 = vector.broadcast %25 : vector<1x128xf32> to vector<24x128xf32>
    %27 = arith.addf %24, %26 : vector<24x128xf32>
    %28 = arith.truncf %27 : vector<24x128xf32> to vector<24x128xbf16>
    %c0_10 = arith.constant 0 : index
    %c0_11 = arith.constant 0 : index
    %29 = vector.load %arg5[%c0_10, %c0_11] : memref<128x128xbf16, #tpu.memory_space<vmem>>, vector<128x128xbf16>
    %cst_12 = arith.constant dense<0.000000e+00> : vector<24x128xf32>
    %30 = tpu.matmul %28, %29, %cst_12 {dimension_numbers = #tpu.dot_dimension_numbers<[1], [0], [0], [1], [0, 0, 1, 1], [], []>} : vector<24x128xbf16>, vector<128x128xbf16>, vector<24x128xf32> -> vector<24x128xf32>
    %c0_13 = arith.constant 0 : index
    %c0_14 = arith.constant 0 : index
    %31 = vector.load %arg6[%c0_13, %c0_14] : memref<1x128xf32, #tpu.memory_space<vmem>>, vector<1x128xf32>
    %32 = vector.broadcast %31 : vector<1x128xf32> to vector<24x128xf32>
    %33 = arith.addf %30, %32 : vector<24x128xf32>
    %34 = arith.mulf %33, %33 : vector<24x128xf32>
    %35 = arith.mulf %33, %34 : vector<24x128xf32>
    %cst_15 = arith.constant 4.471500e-02 : f32
    %36 = vector.broadcast %cst_15 : f32 to vector<24x128xf32>
    %37 = arith.mulf %36, %35 : vector<24x128xf32>
    %38 = arith.addf %33, %37 : vector<24x128xf32>
    %cst_16 = arith.constant 0.797884583 : f32
    %39 = vector.broadcast %cst_16 : f32 to vector<24x128xf32>
    %40 = arith.mulf %39, %38 : vector<24x128xf32>
    %41 = math.tanh %40 : vector<24x128xf32>
    %cst_17 = arith.constant 1.000000e+00 : f32
    %42 = vector.broadcast %cst_17 : f32 to vector<24x128xf32>
    %43 = arith.addf %42, %41 : vector<24x128xf32>
    %cst_18 = arith.constant 5.000000e-01 : f32
    %44 = vector.broadcast %cst_18 : f32 to vector<24x128xf32>
    %45 = arith.mulf %44, %43 : vector<24x128xf32>
    %46 = arith.mulf %33, %45 : vector<24x128xf32>
    %47 = arith.truncf %46 : vector<24x128xf32> to vector<24x128xbf16>
    %c0_19 = arith.constant 0 : index
    %c0_20 = arith.constant 0 : index
    %48 = vector.load %arg7[%c0_19, %c0_20] : memref<24x128xbf16, #tpu.memory_space<vmem>>, vector<24x128xbf16>
    tpu.vector_store %arg7[%c0_19, %c0_20], %47 {strides = array<i32>} : memref<24x128xbf16, #tpu.memory_space<vmem>>, vector<24x128xbf16>,
    return
  }
  func.func @transform_0(%arg0: i32, %arg1: i32) -> (i32, i32) {
    %c0_i32 = arith.constant 0 : i32
    %c0_i32_0 = arith.constant 0 : i32
    return %arg0, %c0_i32 : i32, i32
  }
  func.func @transform_1(%arg0: i32, %arg1: i32) -> (i32, i32) {
    %c0_i32 = arith.constant 0 : i32
    %c0_i32_0 = arith.constant 0 : i32
    %c0_i32_1 = arith.constant 0 : i32
    return %c0_i32, %c0_i32_0 : i32, i32
  }
  func.func @transform_2(%arg0: i32, %arg1: i32) -> (i32, i32) {
    %c0_i32 = arith.constant 0 : i32
    %c0_i32_0 = arith.constant 0 : i32
    %c0_i32_1 = arith.constant 0 : i32
    return %c0_i32, %c0_i32_0 : i32, i32
  }
  func.func @transform_3(%arg0: i32, %arg1: i32) -> (i32, i32) {
    %c0_i32 = arith.constant 0 : i32
    %c0_i32_0 = arith.constant 0 : i32
    return %c0_i32, %arg1 : i32, i32
  }
  func.func @transform_4(%arg0: i32, %arg1: i32) -> (i32, i32) {
    %c0_i32 = arith.constant 0 : i32
    %c0_i32_0 = arith.constant 0 : i32
    return %c0_i32, %arg1 : i32, i32
  }
  func.func @transform_5(%arg0: i32, %arg1: i32) -> (i32, i32) {
    %c0_i32 = arith.constant 0 : i32
    return %arg0, %arg1 : i32, i32
  }
}

module attributes {stable_mosaic.version = 11 : i64} {
  func.func @_layernorm_kernel(%arg0: i32, %arg1: memref<8x128xbf16, #tpu.memory_space<vmem>>, %arg2: memref<1x128xf32, #tpu.memory_space<vmem>>, %arg3: memref<1x128xf32, #tpu.memory_space<vmem>>, %arg4: memref<8x128xbf16, #tpu.memory_space<vmem>>) attributes {dimension_semantics = [#tpu.dimension_semantics<parallel>], iteration_bounds = array<i64: 1>, scalar_prefetch = 0 : i64, scratch_operands = 0 : i64, tpu.core_type = #tpu.core_type<tc>, window_params = [{transform_indices = @transform_0, window_bounds = array<i64: 8, 128>}, {pipeline_mode = #tpu.pipeline_mode<synchronous>, transform_indices = @transform_1, window_bounds = array<i64: 1, 128>}, {pipeline_mode = #tpu.pipeline_mode<synchronous>, transform_indices = @transform_2, window_bounds = array<i64: 1, 128>}, {transform_indices = @transform_3, window_bounds = array<i64: 8, 128>}]} {
    %c0 = arith.constant 0 : index
    %c0_0 = arith.constant 0 : index
    %0 = vector.load %arg1[%c0, %c0_0] : memref<8x128xbf16, #tpu.memory_space<vmem>>, vector<8x128xbf16>
    %1 = arith.extf %0 : vector<8x128xbf16> to vector<8x128xf32>
    %cst = arith.constant dense<0.000000e+00> : vector<8xf32>
    %2 = vector.multi_reduction <add>, %1, %cst [1] : vector<8x128xf32> to vector<8xf32>
    %3 = vector.shape_cast %2 : vector<8xf32> to vector<8x1xf32>
    %cst_1 = arith.constant 3.200000e+01 : f32
    %4 = vector.broadcast %cst_1 : f32 to vector<8x1xf32>
    %5 = arith.divf %3, %4 : vector<8x1xf32>
    %6 = arith.mulf %1, %1 : vector<8x128xf32>
    %cst_2 = arith.constant dense<0.000000e+00> : vector<8xf32>
    %7 = vector.multi_reduction <add>, %6, %cst_2 [1] : vector<8x128xf32> to vector<8xf32>
    %8 = vector.shape_cast %7 : vector<8xf32> to vector<8x1xf32>
    %cst_3 = arith.constant 3.200000e+01 : f32
    %9 = vector.broadcast %cst_3 : f32 to vector<8x1xf32>
    %10 = arith.divf %8, %9 : vector<8x1xf32>
    %11 = arith.mulf %5, %5 : vector<8x1xf32>
    %12 = arith.subf %10, %11 : vector<8x1xf32>
    %cst_4 = arith.constant 0.000000e+00 : f32
    %13 = vector.broadcast %cst_4 : f32 to vector<8x1xf32>
    %14 = arith.maximumf %12, %13 : vector<8x1xf32>
    %15 = vector.broadcast %5 : vector<8x1xf32> to vector<8x128xf32>
    %16 = arith.subf %1, %15 : vector<8x128xf32>
    %cst_5 = arith.constant 9.99999974E-6 : f32
    %17 = vector.broadcast %cst_5 : f32 to vector<8x1xf32>
    %18 = arith.addf %14, %17 : vector<8x1xf32>
    %19 = math.rsqrt %18 : vector<8x1xf32>
    %20 = vector.broadcast %19 : vector<8x1xf32> to vector<8x128xf32>
    %21 = arith.mulf %16, %20 : vector<8x128xf32>
    %c0_6 = arith.constant 0 : index
    %c0_7 = arith.constant 0 : index
    %22 = vector.load %arg2[%c0_6, %c0_7] : memref<1x128xf32, #tpu.memory_space<vmem>>, vector<1x128xf32>
    %23 = vector.broadcast %22 : vector<1x128xf32> to vector<8x128xf32>
    %24 = arith.mulf %21, %23 : vector<8x128xf32>
    %c0_8 = arith.constant 0 : index
    %c0_9 = arith.constant 0 : index
    %25 = vector.load %arg3[%c0_8, %c0_9] : memref<1x128xf32, #tpu.memory_space<vmem>>, vector<1x128xf32>
    %26 = vector.broadcast %25 : vector<1x128xf32> to vector<8x128xf32>
    %27 = arith.addf %24, %26 : vector<8x128xf32>
    %28 = arith.truncf %27 : vector<8x128xf32> to vector<8x128xbf16>
    %c0_10 = arith.constant 0 : index
    %c0_11 = arith.constant 0 : index
    %29 = vector.load %arg4[%c0_10, %c0_11] : memref<8x128xbf16, #tpu.memory_space<vmem>>, vector<8x128xbf16>
    tpu.vector_store %arg4[%c0_10, %c0_11], %28 {strides = array<i32>} : memref<8x128xbf16, #tpu.memory_space<vmem>>, vector<8x128xbf16>,
    return
  }
  func.func @transform_0(%arg0: i32) -> (i32, i32) {
    %c0_i32 = arith.constant 0 : i32
    %c0_i32_0 = arith.constant 0 : i32
    return %arg0, %c0_i32 : i32, i32
  }
  func.func @transform_1(%arg0: i32) -> (i32, i32) {
    %c0_i32 = arith.constant 0 : i32
    %c0_i32_0 = arith.constant 0 : i32
    %c0_i32_1 = arith.constant 0 : i32
    return %c0_i32, %c0_i32_0 : i32, i32
  }
  func.func @transform_2(%arg0: i32) -> (i32, i32) {
    %c0_i32 = arith.constant 0 : i32
    %c0_i32_0 = arith.constant 0 : i32
    %c0_i32_1 = arith.constant 0 : i32
    return %c0_i32, %c0_i32_0 : i32, i32
  }
  func.func @transform_3(%arg0: i32) -> (i32, i32) {
    %c0_i32 = arith.constant 0 : i32
    %c0_i32_0 = arith.constant 0 : i32
    return %arg0, %c0_i32 : i32, i32
  }
}

module attributes {stable_mosaic.version = 11 : i64} {
  func.func @_flash_attn_kernel(%arg0: i32, %arg1: i32, %arg2: i32, %arg3: memref<1x16x32xbf16, #tpu.memory_space<vmem>>, %arg4: memref<1x16x64xbf16, #tpu.memory_space<vmem>>, %arg5: memref<1x16x32xbf16, #tpu.memory_space<vmem>>, %arg6: memref<16x2xf32, #tpu.memory_space<vmem>>, %arg7: memref<16x2xf32, #tpu.memory_space<vmem>>, %arg8: memref<16x32xf32, #tpu.memory_space<vmem>>) attributes {dimension_semantics = [#tpu.dimension_semantics<parallel>, #tpu.dimension_semantics<parallel>, #tpu.dimension_semantics<arbitrary>], iteration_bounds = array<i64: 2, 1, 1>, scalar_prefetch = 0 : i64, scratch_operands = 3 : i64, tpu.core_type = #tpu.core_type<tc>, window_params = [{transform_indices = @transform_0, window_bounds = array<i64: 1, 16, 32>}, {transform_indices = @transform_1, window_bounds = array<i64: 1, 16, 64>}, {transform_indices = @transform_2, window_bounds = array<i64: 1, 16, 32>}]} {
    %c0_i32 = arith.constant 0 : i32
    %0 = arith.cmpi eq, %arg2, %c0_i32 : i32
    %1 = arith.extui %0 : i1 to i32
    %c0_i32_0 = arith.constant 0 : i32
    %2 = arith.cmpi ne, %1, %c0_i32_0 : i32
    scf.if %2 {
      %cst = arith.constant 0xFF800000 : f32
      %12 = vector.broadcast %cst : f32 to vector<16x2xf32>
      %c0 = arith.constant 0 : index
      %c0_5 = arith.constant 0 : index
      %13 = vector.load %arg6[%c0, %c0_5] : memref<16x2xf32, #tpu.memory_space<vmem>>, vector<16x2xf32>
      tpu.vector_store %arg6[%c0, %c0_5], %12 {strides = array<i32>} : memref<16x2xf32, #tpu.memory_space<vmem>>, vector<16x2xf32>,
      %cst_6 = arith.constant 0.000000e+00 : f32
      %14 = vector.broadcast %cst_6 : f32 to vector<16x2xf32>
      %c0_7 = arith.constant 0 : index
      %c0_8 = arith.constant 0 : index
      %15 = vector.load %arg7[%c0_7, %c0_8] : memref<16x2xf32, #tpu.memory_space<vmem>>, vector<16x2xf32>
      tpu.vector_store %arg7[%c0_7, %c0_8], %14 {strides = array<i32>} : memref<16x2xf32, #tpu.memory_space<vmem>>, vector<16x2xf32>,
      %cst_9 = arith.constant 0.000000e+00 : f32
      %16 = vector.broadcast %cst_9 : f32 to vector<16x32xf32>
      %c0_10 = arith.constant 0 : index
      %c0_11 = arith.constant 0 : index
      %17 = vector.load %arg8[%c0_10, %c0_11] : memref<16x32xf32, #tpu.memory_space<vmem>>, vector<16x32xf32>
      tpu.vector_store %arg8[%c0_10, %c0_11], %16 {strides = array<i32>} : memref<16x32xf32, #tpu.memory_space<vmem>>, vector<16x32xf32>,
    } else {
    }
    %c16_i32 = arith.constant 16 : i32
    %3 = arith.muli %arg1, %c16_i32 : i32
    %c15_i32 = arith.constant 15 : i32
    %4 = arith.addi %3, %c15_i32 : i32
    %c16_i32_1 = arith.constant 16 : i32
    %5 = arith.muli %arg2, %c16_i32_1 : i32
    %6 = arith.cmpi sle, %5, %4 : i32
    %7 = arith.extui %6 : i1 to i32
    %c0_i32_2 = arith.constant 0 : i32
    %8 = arith.cmpi ne, %7, %c0_i32_2 : i32
    scf.if %8 {
      %c0 = arith.constant 0 : index
      %c0_5 = arith.constant 0 : index
      %c0_6 = arith.constant 0 : index
      %12 = vector.load %arg3[%c0, %c0_5, %c0_6] : memref<1x16x32xbf16, #tpu.memory_space<vmem>>, vector<1x16x32xbf16>
      %13 = vector.shape_cast %12 : vector<1x16x32xbf16> to vector<16x32xbf16>
      %c0_7 = arith.constant 0 : index
      %c0_8 = arith.constant 0 : index
      %c0_9 = arith.constant 0 : index
      %14 = vector.load %arg4[%c0_7, %c0_8, %c0_9] : memref<1x16x64xbf16, #tpu.memory_space<vmem>>, vector<1x16x64xbf16>
      %15 = vector.shape_cast %14 : vector<1x16x64xbf16> to vector<16x64xbf16>
      %c16_i32_10 = arith.constant 16 : i32
      %16 = arith.muli %arg1, %c16_i32_10 : i32
      %17 = tpu.iota {dimensions = array<i32: 0>} : vector<16x16xi32>
      %18 = vector.broadcast %16 : i32 to vector<16x16xi32>
      %19 = arith.addi %18, %17 : vector<16x16xi32>
      %c16_i32_11 = arith.constant 16 : i32
      %20 = arith.muli %arg2, %c16_i32_11 : i32
      %21 = tpu.iota {dimensions = array<i32: 1>} : vector<16x16xi32>
      %22 = vector.broadcast %20 : i32 to vector<16x16xi32>
      %23 = arith.addi %22, %21 : vector<16x16xi32>
      %24 = arith.cmpi sle, %23, %19 : vector<16x16xi32>
      %c11_i32 = arith.constant 11 : i32
      %25 = vector.broadcast %c11_i32 : i32 to vector<16x16xi32>
      %26 = arith.cmpi slt, %23, %25 : vector<16x16xi32>
      %27 = arith.andi %24, %26 : vector<16x16xi1>
      %28 = vector.extract_strided_slice %13 {offsets = [0, 0], sizes = [16, 16], strides = [1, 1]} : vector<16x32xbf16> to vector<16x16xbf16>
      %29 = vector.extract_strided_slice %15 {offsets = [0, 0], sizes = [16, 16], strides = [1, 1]} : vector<16x64xbf16> to vector<16x16xbf16>
      %30 = vector.extract_strided_slice %15 {offsets = [0, 32], sizes = [16, 16], strides = [1, 1]} : vector<16x64xbf16> to vector<16x16xbf16>
      %cst = arith.constant dense<0.000000e+00> : vector<16x16xf32>
      %31 = tpu.matmul %28, %29, %cst {dimension_numbers = #tpu.dot_dimension_numbers<[1], [1], [0], [0], [0, 0, 1, 0], [], []>} : vector<16x16xbf16>, vector<16x16xbf16>, vector<16x16xf32> -> vector<16x16xf32>
      %cst_12 = arith.constant 2.500000e-01 : f32
      %32 = vector.broadcast %cst_12 : f32 to vector<16x16xf32>
      %33 = arith.mulf %31, %32 : vector<16x16xf32>
      %cst_13 = arith.constant -1.000000e+30 : f32
      %34 = vector.broadcast %cst_13 : f32 to vector<16x16xf32>
      %35 = arith.select %27, %33, %34 : vector<16x16xi1>, vector<16x16xf32>
      %c0_14 = arith.constant 0 : index
      %c0_15 = arith.constant 0 : index
      %36 = vector.load %arg6[%c0_14, %c0_15] : memref<16x2xf32, #tpu.memory_space<vmem>>, vector<16x1xf32>
      %cst_16 = arith.constant dense<0xFF800000> : vector<16xf32>
      %37 = vector.multi_reduction <maximumf>, %35, %cst_16 [1] : vector<16x16xf32> to vector<16xf32>
      %38 = vector.shape_cast %37 : vector<16xf32> to vector<16x1xf32>
      %39 = arith.maximumf %36, %38 : vector<16x1xf32>
      %40 = arith.subf %36, %39 : vector<16x1xf32>
      %41 = math.exp %40 : vector<16x1xf32>
      %42 = vector.broadcast %39 : vector<16x1xf32> to vector<16x16xf32>
      %43 = arith.subf %35, %42 : vector<16x16xf32>
      %44 = math.exp %43 : vector<16x16xf32>
      %c0_17 = arith.constant 0 : index
      %c0_18 = arith.constant 0 : index
      %45 = vector.load %arg7[%c0_17, %c0_18] : memref<16x2xf32, #tpu.memory_space<vmem>>, vector<16x1xf32>
      %46 = arith.mulf %41, %45 : vector<16x1xf32>
      %cst_19 = arith.constant dense<0.000000e+00> : vector<16xf32>
      %47 = vector.multi_reduction <add>, %44, %cst_19 [1] : vector<16x16xf32> to vector<16xf32>
      %48 = vector.shape_cast %47 : vector<16xf32> to vector<16x1xf32>
      %49 = arith.addf %46, %48 : vector<16x1xf32>
      %c0_20 = arith.constant 0 : index
      %c0_21 = arith.constant 0 : index
      %50 = vector.load %arg7[%c0_20, %c0_21] : memref<16x2xf32, #tpu.memory_space<vmem>>, vector<16x1xf32>
      tpu.vector_store %arg7[%c0_20, %c0_21], %49 {strides = array<i32>} : memref<16x2xf32, #tpu.memory_space<vmem>>, vector<16x1xf32>,
      %c0_22 = arith.constant 0 : index
      %c0_23 = arith.constant 0 : index
      %51 = vector.load %arg8[%c0_22, %c0_23] : memref<16x32xf32, #tpu.memory_space<vmem>>, vector<16x16xf32>
      %52 = vector.broadcast %41 : vector<16x1xf32> to vector<16x16xf32>
      %53 = arith.mulf %52, %51 : vector<16x16xf32>
      %54 = arith.truncf %44 : vector<16x16xf32> to vector<16x16xbf16>
      %cst_24 = arith.constant dense<0.000000e+00> : vector<16x16xf32>
      %55 = tpu.matmul %54, %30, %cst_24 {dimension_numbers = #tpu.dot_dimension_numbers<[1], [0], [0], [1], [0, 0, 1, 1], [], []>} : vector<16x16xbf16>, vector<16x16xbf16>, vector<16x16xf32> -> vector<16x16xf32>
      %56 = arith.addf %53, %55 : vector<16x16xf32>
      %c0_25 = arith.constant 0 : index
      %c0_26 = arith.constant 0 : index
      %57 = vector.load %arg8[%c0_25, %c0_26] : memref<16x32xf32, #tpu.memory_space<vmem>>, vector<16x16xf32>
      tpu.vector_store %arg8[%c0_25, %c0_26], %56 {strides = array<i32>} : memref<16x32xf32, #tpu.memory_space<vmem>>, vector<16x16xf32>,
      %c0_27 = arith.constant 0 : index
      %c0_28 = arith.constant 0 : index
      %58 = vector.load %arg6[%c0_27, %c0_28] : memref<16x2xf32, #tpu.memory_space<vmem>>, vector<16x1xf32>
      tpu.vector_store %arg6[%c0_27, %c0_28], %39 {strides = array<i32>} : memref<16x2xf32, #tpu.memory_space<vmem>>, vector<16x1xf32>,
      %59 = vector.extract_strided_slice %13 {offsets = [0, 16], sizes = [16, 16], strides = [1, 1]} : vector<16x32xbf16> to vector<16x16xbf16>
      %60 = vector.extract_strided_slice %15 {offsets = [0, 16], sizes = [16, 16], strides = [1, 1]} : vector<16x64xbf16> to vector<16x16xbf16>
      %61 = vector.extract_strided_slice %15 {offsets = [0, 48], sizes = [16, 16], strides = [1, 1]} : vector<16x64xbf16> to vector<16x16xbf16>
      %cst_29 = arith.constant dense<0.000000e+00> : vector<16x16xf32>
      %62 = tpu.matmul %59, %60, %cst_29 {dimension_numbers = #tpu.dot_dimension_numbers<[1], [1], [0], [0], [0, 0, 1, 0], [], []>} : vector<16x16xbf16>, vector<16x16xbf16>, vector<16x16xf32> -> vector<16x16xf32>
      %cst_30 = arith.constant 2.500000e-01 : f32
      %63 = vector.broadcast %cst_30 : f32 to vector<16x16xf32>
      %64 = arith.mulf %62, %63 : vector<16x16xf32>
      %cst_31 = arith.constant -1.000000e+30 : f32
      %65 = vector.broadcast %cst_31 : f32 to vector<16x16xf32>
      %66 = arith.select %27, %64, %65 : vector<16x16xi1>, vector<16x16xf32>
      %c0_32 = arith.constant 0 : index
      %c1 = arith.constant 1 : index
      %67 = vector.load %arg6[%c0_32, %c1] : memref<16x2xf32, #tpu.memory_space<vmem>>, vector<16x1xf32>
      %cst_33 = arith.constant dense<0xFF800000> : vector<16xf32>
      %68 = vector.multi_reduction <maximumf>, %66, %cst_33 [1] : vector<16x16xf32> to vector<16xf32>
      %69 = vector.shape_cast %68 : vector<16xf32> to vector<16x1xf32>
      %70 = arith.maximumf %67, %69 : vector<16x1xf32>
      %71 = arith.subf %67, %70 : vector<16x1xf32>
      %72 = math.exp %71 : vector<16x1xf32>
      %73 = vector.broadcast %70 : vector<16x1xf32> to vector<16x16xf32>
      %74 = arith.subf %66, %73 : vector<16x16xf32>
      %75 = math.exp %74 : vector<16x16xf32>
      %c0_34 = arith.constant 0 : index
      %c1_35 = arith.constant 1 : index
      %76 = vector.load %arg7[%c0_34, %c1_35] : memref<16x2xf32, #tpu.memory_space<vmem>>, vector<16x1xf32>
      %77 = arith.mulf %72, %76 : vector<16x1xf32>
      %cst_36 = arith.constant dense<0.000000e+00> : vector<16xf32>
      %78 = vector.multi_reduction <add>, %75, %cst_36 [1] : vector<16x16xf32> to vector<16xf32>
      %79 = vector.shape_cast %78 : vector<16xf32> to vector<16x1xf32>
      %80 = arith.addf %77, %79 : vector<16x1xf32>
      %c0_37 = arith.constant 0 : index
      %c1_38 = arith.constant 1 : index
      %81 = vector.load %arg7[%c0_37, %c1_38] : memref<16x2xf32, #tpu.memory_space<vmem>>, vector<16x1xf32>
      tpu.vector_store %arg7[%c0_37, %c1_38], %80 {strides = array<i32>} : memref<16x2xf32, #tpu.memory_space<vmem>>, vector<16x1xf32>,
      %c0_39 = arith.constant 0 : index
      %c16 = arith.constant 16 : index
      %82 = vector.load %arg8[%c0_39, %c16] : memref<16x32xf32, #tpu.memory_space<vmem>>, vector<16x16xf32>
      %83 = vector.broadcast %72 : vector<16x1xf32> to vector<16x16xf32>
      %84 = arith.mulf %83, %82 : vector<16x16xf32>
      %85 = arith.truncf %75 : vector<16x16xf32> to vector<16x16xbf16>
      %cst_40 = arith.constant dense<0.000000e+00> : vector<16x16xf32>
      %86 = tpu.matmul %85, %61, %cst_40 {dimension_numbers = #tpu.dot_dimension_numbers<[1], [0], [0], [1], [0, 0, 1, 1], [], []>} : vector<16x16xbf16>, vector<16x16xbf16>, vector<16x16xf32> -> vector<16x16xf32>
      %87 = arith.addf %84, %86 : vector<16x16xf32>
      %c0_41 = arith.constant 0 : index
      %c16_42 = arith.constant 16 : index
      %88 = vector.load %arg8[%c0_41, %c16_42] : memref<16x32xf32, #tpu.memory_space<vmem>>, vector<16x16xf32>
      tpu.vector_store %arg8[%c0_41, %c16_42], %87 {strides = array<i32>} : memref<16x32xf32, #tpu.memory_space<vmem>>, vector<16x16xf32>,
      %c0_43 = arith.constant 0 : index
      %c1_44 = arith.constant 1 : index
      %89 = vector.load %arg6[%c0_43, %c1_44] : memref<16x2xf32, #tpu.memory_space<vmem>>, vector<16x1xf32>
      tpu.vector_store %arg6[%c0_43, %c1_44], %70 {strides = array<i32>} : memref<16x2xf32, #tpu.memory_space<vmem>>, vector<16x1xf32>,
    } else {
    }
    %c0_i32_3 = arith.constant 0 : i32
    %9 = arith.cmpi eq, %arg2, %c0_i32_3 : i32
    %10 = arith.extui %9 : i1 to i32
    %c0_i32_4 = arith.constant 0 : i32
    %11 = arith.cmpi ne, %10, %c0_i32_4 : i32
    scf.if %11 {
      %c0 = arith.constant 0 : index
      %c0_5 = arith.constant 0 : index
      %12 = vector.load %arg7[%c0, %c0_5] : memref<16x2xf32, #tpu.memory_space<vmem>>, vector<16x2xf32>
      %13 = tpu.reciprocal %12 {approx = true} : vector<16x2xf32> -> vector<16x2xf32>
      %c0_6 = arith.constant 0 : index
      %c0_7 = arith.constant 0 : index
      %14 = vector.load %arg8[%c0_6, %c0_7] : memref<16x32xf32, #tpu.memory_space<vmem>>, vector<16x16xf32>
      %15 = vector.extract_strided_slice %13 {offsets = [0, 0], sizes = [16, 1], strides = [1, 1]} : vector<16x2xf32> to vector<16x1xf32>
      %16 = vector.broadcast %15 : vector<16x1xf32> to vector<16x16xf32>
      %17 = arith.mulf %14, %16 : vector<16x16xf32>
      %c0_8 = arith.constant 0 : index
      %c16 = arith.constant 16 : index
      %18 = vector.load %arg8[%c0_8, %c16] : memref<16x32xf32, #tpu.memory_space<vmem>>, vector<16x16xf32>
      %19 = vector.extract_strided_slice %13 {offsets = [0, 1], sizes = [16, 1], strides = [1, 1]} : vector<16x2xf32> to vector<16x1xf32>
      %20 = vector.broadcast %19 : vector<16x1xf32> to vector<16x16xf32>
      %21 = arith.mulf %18, %20 : vector<16x16xf32>
      %22 = tpu.concatenate %17, %21 in 1 : vector<16x16xf32>, vector<16x16xf32> -> vector<16x32xf32>
      %23 = arith.truncf %22 : vector<16x32xf32> to vector<16x32xbf16>
      %c0_9 = arith.constant 0 : index
      %c0_10 = arith.constant 0 : index
      %c0_11 = arith.constant 0 : index
      %24 = vector.load %arg5[%c0_9, %c0_10, %c0_11] : memref<1x16x32xbf16, #tpu.memory_space<vmem>>, vector<1x16x32xbf16>
      %25 = vector.shape_cast %24 : vector<1x16x32xbf16> to vector<16x32xbf16>
      %26 = vector.shape_cast %23 : vector<16x32xbf16> to vector<1x16x32xbf16>
      tpu.vector_store %arg5[%c0_9, %c0_10, %c0_11], %26 {strides = array<i32>} : memref<1x16x32xbf16, #tpu.memory_space<vmem>>, vector<1x16x32xbf16>,
    } else {
    }
    return
  }
  func.func @transform_0(%arg0: i32, %arg1: i32, %arg2: i32) -> (i32, i32, i32) {
    %c0_i32 = arith.constant 0 : i32
    %c0_i32_0 = arith.constant 0 : i32
    return %arg0, %arg1, %c0_i32 : i32, i32, i32
  }
  func.func @transform_1(%arg0: i32, %arg1: i32, %arg2: i32) -> (i32, i32, i32) {
    %c0_i32 = arith.constant 0 : i32
    %c0_i32_0 = arith.constant 0 : i32
    return %arg0, %arg2, %c0_i32 : i32, i32, i32
  }
  func.func @transform_2(%arg0: i32, %arg1: i32, %arg2: i32) -> (i32, i32, i32) {
    %c0_i32 = arith.constant 0 : i32
    %c0_i32_0 = arith.constant 0 : i32
    return %arg0, %arg1, %c0_i32 : i32, i32, i32
  }
}

module attributes {stable_mosaic.version = 11 : i64} {
  func.func @_ln_lmhead_ce_kernel(%arg0: i32, %arg1: i32, %arg2: memref<16x128xbf16, #tpu.memory_space<vmem>>, %arg3: memref<1x128xf32, #tpu.memory_space<vmem>>, %arg4: memref<1x128xf32, #tpu.memory_space<vmem>>, %arg5: memref<128x128xbf16, #tpu.memory_space<vmem>>, %arg6: memref<16x1xi32, #tpu.memory_space<vmem>>, %arg7: memref<16x128xf32, #tpu.memory_space<vmem>>, %arg8: memref<16x1xf32, #tpu.memory_space<vmem>>, %arg9: memref<16x1xf32, #tpu.memory_space<vmem>>, %arg10: memref<16x1xf32, #tpu.memory_space<vmem>>, %arg11: memref<16x1xf32, #tpu.memory_space<vmem>>) attributes {dimension_semantics = [#tpu.dimension_semantics<parallel>, #tpu.dimension_semantics<arbitrary>], iteration_bounds = array<i64: 1, 1>, scalar_prefetch = 0 : i64, scratch_operands = 3 : i64, tpu.core_type = #tpu.core_type<tc>, window_params = [{transform_indices = @transform_0, window_bounds = array<i64: 16, 128>}, {pipeline_mode = #tpu.pipeline_mode<synchronous>, transform_indices = @transform_1, window_bounds = array<i64: 1, 128>}, {pipeline_mode = #tpu.pipeline_mode<synchronous>, transform_indices = @transform_2, window_bounds = array<i64: 1, 128>}, {transform_indices = @transform_3, window_bounds = array<i64: 128, 128>}, {transform_indices = @transform_4, window_bounds = array<i64: 16, 1>}, {transform_indices = @transform_5, window_bounds = array<i64: 16, 128>}, {transform_indices = @transform_6, window_bounds = array<i64: 16, 1>}]} {
    %c0_i32 = arith.constant 0 : i32
    %0 = arith.cmpi eq, %arg1, %c0_i32 : i32
    %1 = arith.extui %0 : i1 to i32
    %c0_i32_0 = arith.constant 0 : i32
    %2 = arith.cmpi ne, %1, %c0_i32_0 : i32
    scf.if %2 {
      %cst_37 = arith.constant 0xFF800000 : f32
      %72 = vector.broadcast %cst_37 : f32 to vector<16x1xf32>
      %c0_38 = arith.constant 0 : index
      %c0_39 = arith.constant 0 : index
      %73 = vector.load %arg9[%c0_38, %c0_39] : memref<16x1xf32, #tpu.memory_space<vmem>>, vector<16x1xf32>
      tpu.vector_store %arg9[%c0_38, %c0_39], %72 {strides = array<i32>} : memref<16x1xf32, #tpu.memory_space<vmem>>, vector<16x1xf32>,
      %cst_40 = arith.constant 0.000000e+00 : f32
      %74 = vector.broadcast %cst_40 : f32 to vector<16x1xf32>
      %c0_41 = arith.constant 0 : index
      %c0_42 = arith.constant 0 : index
      %75 = vector.load %arg10[%c0_41, %c0_42] : memref<16x1xf32, #tpu.memory_space<vmem>>, vector<16x1xf32>
      tpu.vector_store %arg10[%c0_41, %c0_42], %74 {strides = array<i32>} : memref<16x1xf32, #tpu.memory_space<vmem>>, vector<16x1xf32>,
      %cst_43 = arith.constant 0.000000e+00 : f32
      %76 = vector.broadcast %cst_43 : f32 to vector<16x1xf32>
      %c0_44 = arith.constant 0 : index
      %c0_45 = arith.constant 0 : index
      %77 = vector.load %arg11[%c0_44, %c0_45] : memref<16x1xf32, #tpu.memory_space<vmem>>, vector<16x1xf32>
      tpu.vector_store %arg11[%c0_44, %c0_45], %76 {strides = array<i32>} : memref<16x1xf32, #tpu.memory_space<vmem>>, vector<16x1xf32>,
    } else {
    }
    %c0 = arith.constant 0 : index
    %c0_1 = arith.constant 0 : index
    %3 = vector.load %arg2[%c0, %c0_1] : memref<16x128xbf16, #tpu.memory_space<vmem>>, vector<16x128xbf16>
    %4 = arith.extf %3 : vector<16x128xbf16> to vector<16x128xf32>
    %cst = arith.constant dense<0.000000e+00> : vector<16xf32>
    %5 = vector.multi_reduction <add>, %4, %cst [1] : vector<16x128xf32> to vector<16xf32>
    %6 = vector.shape_cast %5 : vector<16xf32> to vector<16x1xf32>
    %cst_2 = arith.constant 3.200000e+01 : f32
    %7 = vector.broadcast %cst_2 : f32 to vector<16x1xf32>
    %8 = arith.divf %6, %7 : vector<16x1xf32>
    %9 = arith.mulf %4, %4 : vector<16x128xf32>
    %cst_3 = arith.constant dense<0.000000e+00> : vector<16xf32>
    %10 = vector.multi_reduction <add>, %9, %cst_3 [1] : vector<16x128xf32> to vector<16xf32>
    %11 = vector.shape_cast %10 : vector<16xf32> to vector<16x1xf32>
    %cst_4 = arith.constant 3.200000e+01 : f32
    %12 = vector.broadcast %cst_4 : f32 to vector<16x1xf32>
    %13 = arith.divf %11, %12 : vector<16x1xf32>
    %14 = arith.mulf %8, %8 : vector<16x1xf32>
    %15 = arith.subf %13, %14 : vector<16x1xf32>
    %cst_5 = arith.constant 0.000000e+00 : f32
    %16 = vector.broadcast %cst_5 : f32 to vector<16x1xf32>
    %17 = arith.maximumf %15, %16 : vector<16x1xf32>
    %18 = vector.broadcast %8 : vector<16x1xf32> to vector<16x128xf32>
    %19 = arith.subf %4, %18 : vector<16x128xf32>
    %cst_6 = arith.constant 9.99999974E-6 : f32
    %20 = vector.broadcast %cst_6 : f32 to vector<16x1xf32>
    %21 = arith.addf %17, %20 : vector<16x1xf32>
    %22 = math.rsqrt %21 : vector<16x1xf32>
    %23 = vector.broadcast %22 : vector<16x1xf32> to vector<16x128xf32>
    %24 = arith.mulf %19, %23 : vector<16x128xf32>
    %c0_7 = arith.constant 0 : index
    %c0_8 = arith.constant 0 : index
    %25 = vector.load %arg3[%c0_7, %c0_8] : memref<1x128xf32, #tpu.memory_space<vmem>>, vector<1x128xf32>
    %26 = vector.broadcast %25 : vector<1x128xf32> to vector<16x128xf32>
    %27 = arith.mulf %24, %26 : vector<16x128xf32>
    %c0_9 = arith.constant 0 : index
    %c0_10 = arith.constant 0 : index
    %28 = vector.load %arg4[%c0_9, %c0_10] : memref<1x128xf32, #tpu.memory_space<vmem>>, vector<1x128xf32>
    %29 = vector.broadcast %28 : vector<1x128xf32> to vector<16x128xf32>
    %30 = arith.addf %27, %29 : vector<16x128xf32>
    %31 = arith.truncf %30 : vector<16x128xf32> to vector<16x128xbf16>
    %c0_11 = arith.constant 0 : index
    %c0_12 = arith.constant 0 : index
    %32 = vector.load %arg5[%c0_11, %c0_12] : memref<128x128xbf16, #tpu.memory_space<vmem>>, vector<128x128xbf16>
    %cst_13 = arith.constant dense<0.000000e+00> : vector<16x128xf32>
    %33 = tpu.matmul %31, %32, %cst_13 {dimension_numbers = #tpu.dot_dimension_numbers<[1], [0], [0], [1], [0, 0, 1, 1], [], []>} : vector<16x128xbf16>, vector<128x128xbf16>, vector<16x128xf32> -> vector<16x128xf32>
    %c0_14 = arith.constant 0 : index
    %c0_15 = arith.constant 0 : index
    %34 = vector.load %arg7[%c0_14, %c0_15] : memref<16x128xf32, #tpu.memory_space<vmem>>, vector<16x128xf32>
    tpu.vector_store %arg7[%c0_14, %c0_15], %33 {strides = array<i32>} : memref<16x128xf32, #tpu.memory_space<vmem>>, vector<16x128xf32>,
    %c128_i32 = arith.constant 128 : i32
    %35 = arith.muli %arg1, %c128_i32 : i32
    %36 = tpu.iota {dimensions = array<i32: 1>} : vector<16x128xi32>
    %37 = vector.broadcast %35 : i32 to vector<16x128xi32>
    %38 = arith.addi %37, %36 : vector<16x128xi32>
    %c64_i32 = arith.constant 64 : i32
    %39 = vector.broadcast %c64_i32 : i32 to vector<16x128xi32>
    %40 = arith.cmpi slt, %38, %39 : vector<16x128xi32>
    %cst_16 = arith.constant -1.000000e+30 : f32
    %41 = vector.broadcast %cst_16 : f32 to vector<16x128xf32>
    %42 = arith.select %40, %33, %41 : vector<16x128xi1>, vector<16x128xf32>
    %c0_17 = arith.constant 0 : index
    %c0_18 = arith.constant 0 : index
    %43 = vector.load %arg9[%c0_17, %c0_18] : memref<16x1xf32, #tpu.memory_space<vmem>>, vector<16x1xf32>
    %cst_19 = arith.constant dense<0xFF800000> : vector<16xf32>
    %44 = vector.multi_reduction <maximumf>, %42, %cst_19 [1] : vector<16x128xf32> to vector<16xf32>
    %45 = vector.shape_cast %44 : vector<16xf32> to vector<16x1xf32>
    %46 = arith.maximumf %43, %45 : vector<16x1xf32>
    %47 = arith.subf %43, %46 : vector<16x1xf32>
    %48 = math.exp %47 : vector<16x1xf32>
    %c0_20 = arith.constant 0 : index
    %c0_21 = arith.constant 0 : index
    %49 = vector.load %arg10[%c0_20, %c0_21] : memref<16x1xf32, #tpu.memory_space<vmem>>, vector<16x1xf32>
    %50 = arith.mulf %48, %49 : vector<16x1xf32>
    %51 = vector.broadcast %46 : vector<16x1xf32> to vector<16x128xf32>
    %52 = arith.subf %42, %51 : vector<16x128xf32>
    %53 = math.exp %52 : vector<16x128xf32>
    %cst_22 = arith.constant dense<0.000000e+00> : vector<16xf32>
    %54 = vector.multi_reduction <add>, %53, %cst_22 [1] : vector<16x128xf32> to vector<16xf32>
    %55 = vector.shape_cast %54 : vector<16xf32> to vector<16x1xf32>
    %56 = arith.addf %50, %55 : vector<16x1xf32>
    %c0_23 = arith.constant 0 : index
    %c0_24 = arith.constant 0 : index
    %57 = vector.load %arg10[%c0_23, %c0_24] : memref<16x1xf32, #tpu.memory_space<vmem>>, vector<16x1xf32>
    tpu.vector_store %arg10[%c0_23, %c0_24], %56 {strides = array<i32>} : memref<16x1xf32, #tpu.memory_space<vmem>>, vector<16x1xf32>,
    %c0_25 = arith.constant 0 : index
    %c0_26 = arith.constant 0 : index
    %58 = vector.load %arg9[%c0_25, %c0_26] : memref<16x1xf32, #tpu.memory_space<vmem>>, vector<16x1xf32>
    tpu.vector_store %arg9[%c0_25, %c0_26], %46 {strides = array<i32>} : memref<16x1xf32, #tpu.memory_space<vmem>>, vector<16x1xf32>,
    %c0_27 = arith.constant 0 : index
    %c0_28 = arith.constant 0 : index
    %59 = vector.load %arg6[%c0_27, %c0_28] : memref<16x1xi32, #tpu.memory_space<vmem>>, vector<16x1xi32>
    %c0_29 = arith.constant 0 : index
    %c0_30 = arith.constant 0 : index
    %60 = vector.load %arg11[%c0_29, %c0_30] : memref<16x1xf32, #tpu.memory_space<vmem>>, vector<16x1xf32>
    %61 = vector.broadcast %59 : vector<16x1xi32> to vector<16x128xi32>
    %62 = arith.cmpi eq, %38, %61 : vector<16x128xi32>
    %cst_31 = arith.constant 0.000000e+00 : f32
    %63 = vector.broadcast %cst_31 : f32 to vector<16x128xf32>
    %64 = arith.select %62, %33, %63 : vector<16x128xi1>, vector<16x128xf32>
    %cst_32 = arith.constant dense<0.000000e+00> : vector<16xf32>
    %65 = vector.multi_reduction <add>, %64, %cst_32 [1] : vector<16x128xf32> to vector<16xf32>
    %66 = vector.shape_cast %65 : vector<16xf32> to vector<16x1xf32>
    %67 = arith.addf %60, %66 : vector<16x1xf32>
    %c0_33 = arith.constant 0 : index
    %c0_34 = arith.constant 0 : index
    %68 = vector.load %arg11[%c0_33, %c0_34] : memref<16x1xf32, #tpu.memory_space<vmem>>, vector<16x1xf32>
    tpu.vector_store %arg11[%c0_33, %c0_34], %67 {strides = array<i32>} : memref<16x1xf32, #tpu.memory_space<vmem>>, vector<16x1xf32>,
    %c0_i32_35 = arith.constant 0 : i32
    %69 = arith.cmpi eq, %arg1, %c0_i32_35 : i32
    %70 = arith.extui %69 : i1 to i32
    %c0_i32_36 = arith.constant 0 : i32
    %71 = arith.cmpi ne, %70, %c0_i32_36 : i32
    scf.if %71 {
      %c0_37 = arith.constant 0 : index
      %c0_38 = arith.constant 0 : index
      %72 = vector.load %arg9[%c0_37, %c0_38] : memref<16x1xf32, #tpu.memory_space<vmem>>, vector<16x1xf32>
      %c0_39 = arith.constant 0 : index
      %c0_40 = arith.constant 0 : index
      %73 = vector.load %arg10[%c0_39, %c0_40] : memref<16x1xf32, #tpu.memory_space<vmem>>, vector<16x1xf32>
      %74 = math.log %73 : vector<16x1xf32>
      %75 = arith.addf %72, %74 : vector<16x1xf32>
      %c0_41 = arith.constant 0 : index
      %c0_42 = arith.constant 0 : index
      %76 = vector.load %arg11[%c0_41, %c0_42] : memref<16x1xf32, #tpu.memory_space<vmem>>, vector<16x1xf32>
      %77 = arith.subf %75, %76 : vector<16x1xf32>
      %c0_43 = arith.constant 0 : index
      %c0_44 = arith.constant 0 : index
      %78 = vector.load %arg6[%c0_43, %c0_44] : memref<16x1xi32, #tpu.memory_space<vmem>>, vector<16x1xi32>
      %c0_i32_45 = arith.constant 0 : i32
      %79 = vector.broadcast %c0_i32_45 : i32 to vector<16x1xi32>
      %80 = arith.cmpi sge, %78, %79 : vector<16x1xi32>
      %cst_46 = arith.constant 0.000000e+00 : f32
      %81 = vector.broadcast %cst_46 : f32 to vector<16x1xf32>
      %82 = arith.select %80, %77, %81 : vector<16x1xi1>, vector<16x1xf32>
      %c0_47 = arith.constant 0 : index
      %c0_48 = arith.constant 0 : index
      %83 = vector.load %arg8[%c0_47, %c0_48] : memref<16x1xf32, #tpu.memory_space<vmem>>, vector<16x1xf32>
      tpu.vector_store %arg8[%c0_47, %c0_48], %82 {strides = array<i32>} : memref<16x1xf32, #tpu.memory_space<vmem>>, vector<16x1xf32>,
    } else {
    }
    return
  }
  func.func @transform_0(%arg0: i32, %arg1: i32) -> (i32, i32) {
    %c0_i32 = arith.constant 0 : i32
    %c0_i32_0 = arith.constant 0 : i32
    return %arg0, %c0_i32 : i32, i32
  }
  func.func @transform_1(%arg0: i32, %arg1: i32) -> (i32, i32) {
    %c0_i32 = arith.constant 0 : i32
    %c0_i32_0 = arith.constant 0 : i32
    %c0_i32_1 = arith.constant 0 : i32
    return %c0_i32, %c0_i32_0 : i32, i32
  }
  func.func @transform_2(%arg0: i32, %arg1: i32) -> (i32, i32) {
    %c0_i32 = arith.constant 0 : i32
    %c0_i32_0 = arith.constant 0 : i32
    %c0_i32_1 = arith.constant 0 : i32
    return %c0_i32, %c0_i32_0 : i32, i32
  }
  func.func @transform_3(%arg0: i32, %arg1: i32) -> (i32, i32) {
    %c0_i32 = arith.constant 0 : i32
    %c0_i32_0 = arith.constant 0 : i32
    return %c0_i32, %arg1 : i32, i32
  }
  func.func @transform_4(%arg0: i32, %arg1: i32) -> (i32, i32) {
    %c0_i32 = arith.constant 0 : i32
    %c0_i32_0 = arith.constant 0 : i32
    return %arg0, %c0_i32 : i32, i32
  }
  func.func @transform_5(%arg0: i32, %arg1: i32) -> (i32, i32) {
    %c0_i32 = arith.constant 0 : i32
    return %arg0, %arg1 : i32, i32
  }
  func.func @transform_6(%arg0: i32, %arg1: i32) -> (i32, i32) {
    %c0_i32 = arith.constant 0 : i32
    %c0_i32_0 = arith.constant 0 : i32
    return %arg0, %c0_i32 : i32, i32
  }
}

</mosaic_0001>

<bundles_post_ra>
// kernel: _lambda_.12
= control target key start
LH: loop header
LB: loop body
LE: loop exit
PB: predicated region body
PF: predicated region fallthrough
CT: control target
= control target key end

     0   :  { %s394_s0 = inlined_call_operand.vmem [shape: bf16[24,128], index: 0, kind: input, shape index: {}]   ;;  %s395_s3 = inlined_call_operand.vmem [shape: bf16[128,128], index: 3, kind: input, shape index: {}]   ;;  %s396_s1 = inlined_call_operand.vmem [shape: f32[1,128], index: 1, kind: input, shape index: {}]   ;;  %s397_s2 = inlined_call_operand.vmem [shape: f32[1,128], index: 2, kind: input, shape index: {}]   ;;  %s398_s4 = inlined_call_operand.vmem [shape: f32[1,128], index: 4, kind: input, shape index: {}]   ;;  %s399_s5 = inlined_call_operand.vmem [shape: bf16[24,128], index: 5, kind: output, shape index: {}]  }
   0x1   :  { %v23_v0 = vld [vmem:[%s394_s0 + $0x8] sm:$0xf]  ;;  %v249_v1 = vld [vmem:[%s394_s0] sm:$0xff]   ;;  %v287_v8 = vld [vmem:[%s395_s3 + $0x38] sm:$0xff]  }
   0x2   :  { %v337_v2 = vunpack.c.l.bf16 %v23_v0  ;;  %v339_v3 = vunpack.c.l.bf16 %v249_v1  ;;  %v343_v4 = vunpack.c.h.bf16 %v249_v1  ;;  %267 = vmatprep.subr.bf16.mxu0 %v287_v8  ;;  %v288_v9 = vld [vmem:[%s395_s3 + $0x30] sm:$0xff]   ;;  %v289_v10 = vld [vmem:[%s395_s3 + $0x28] sm:$0xff]   ;;  %v290_v11 = vld [vmem:[%s395_s3 + $0x20] sm:$0xff]  }
   0x3   :  { %268 = vmatpush3.bf16.msra.mxu0 %v287_v8  ;;  %v291_v12 = vld [vmem:[%s395_s3 + $0x18] sm:$0xff]   ;;  %v292_v13 = vld [vmem:[%s395_s3 + $0x10] sm:$0xff]   ;;  %v293_v14 = vld [vmem:[%s395_s3 + $0x8] sm:$0xff]  }
   0x4   :  { %31 = vadd.xlane.f32.xlu1 %v337_v2  ;;  %27 = vadd.xlane.f32.xlu0 %v339_v3  ;;  %v37_v5 = vmul.f32 %v339_v3, %v339_v3  ;;  %v38_v6 = vmul.f32 %v343_v4, %v343_v4  ;;  %v39_v7 = vmul.f32 %v337_v2, %v337_v2  ;;  %v294_v15 = vld [vmem:[%s395_s3] sm:$0xff]  }
   0x5   :  { %269 = vmatprep.subr.bf16.mxu0 %v288_v9  ;;  %v231_v43 = vld [vmem:[%s396_s1] ss:$0 sm:$0xff] }
   0x6   :  { %v232_v50 = vld [vmem:[%s397_s2] ss:$0 sm:$0xff] }
   0x7   :  { %270 = vmatpush3.bf16.msra.mxu0 %v288_v9  ;;  %v233_v59 = vld [vmem:[%s398_s4] ss:$0 sm:$0xff] }
   0x8   :  { %29 = vadd.xlane.f32.xlu0 %v343_v4  ;;  %40 = vadd.xlane.f32.xlu1 %v37_v5 }
   0x9   :  { %271 = vmatprep.subr.bf16.mxu0 %v289_v10 }
   0xb   :  { %272 = vmatpush3.bf16.msra.mxu0 %v289_v10 }
   0xc   :  { %42 = vadd.xlane.f32.xlu0 %v38_v6  ;;  %44 = vadd.xlane.f32.xlu1 %v39_v7 }
   0xd   :  { %273 = vmatprep.subr.bf16.mxu0 %v290_v11 }
   0xf   :  { %274 = vmatpush3.bf16.msra.mxu0 %v290_v11 }
  0x10   :  { %275 = vmatprep.subr.bf16.mxu0 %v291_v12 }
  0x13   :  { %276 = vmatpush3.bf16.msra.mxu0 %v291_v12 }
  0x14   :  { %277 = vmatprep.subr.bf16.mxu0 %v292_v13 }
  0x17   :  { %278 = vmatpush3.bf16.msra.mxu0 %v292_v13 }
  0x18   :  { %279 = vmatprep.subr.bf16.mxu0 %v293_v14 }
  0x1b   :  { %280 = vmatpush3.bf16.msra.mxu0 %v293_v14 }
  0x1c   :  { %281 = vmatprep.subr.bf16.mxu0 %v294_v15 }
  0x1f   :  { %282 = vmatpush3.bf16.msra.mxu0 %v294_v15 }
  0x8d   :  { %v32_v16 = vpop.xlane.xlu1 %31  ;;  %v28_v17 = vpop.xlane.xlu0 %27 }
  0x8e   :  { %v34_v18 = vmul.f32 0.03125, %v28_v17  ;;  %v36_v19 = vmul.f32 0.03125, %v32_v16 }
  0x90   :  { %v49_v22 = vmul.f32 %v34_v18, %v34_v18  ;;  %v51_v26 = vmul.f32 %v36_v19, %v36_v19  ;;  %v58_v40 = vsub.f32 %v339_v3, %v34_v18  ;;  %v60_v46 = vsub.f32 %v337_v2, %v36_v19 }
  0x91   :  { %v30_v20 = vpop.xlane.xlu0 %29  ;;  %v41_v21 = vpop.xlane.xlu1 %40 }
  0x92   :  { %v35_v23 = vmul.f32 0.03125, %v30_v20  ;;  %v46_v24 = vmul.f32 0.03125, %v41_v21 }
  0x94   :  { %v52_v25 = vsub.f32 %v46_v24, %v49_v22  ;;  %v50_v29 = vmul.f32 %v35_v23, %v35_v23  ;;  %v59_v44 = vsub.f32 %v343_v4, %v35_v23 }
  0x95   :  { %v43_v27 = vpop.xlane.xlu0 %42  ;;  %v45_v28 = vpop.xlane.xlu1 %44 }
  0x96   :  { %v55_v30 = vmax.f32 %v52_v25, 0.0  ;;  %v47_v31 = vmul.f32 0.03125, %v43_v27  ;;  %v48_v32 = vmul.f32 0.03125, %v45_v28 }
  0x98   :  { %v61_v33 = vadd.f32 1e-05, %v55_v30  ;;  %v53_v34 = vsub.f32 %v47_v31, %v50_v29  ;;  %v54_v35 = vsub.f32 %v48_v32, %v51_v26 }
  0x9a   :  { %295 = vrsqrt.f32 %v61_v33  ;;  %v56_v36 = vmax.f32 %v53_v34, 0.0  ;;  %v57_v37 = vmax.f32 %v54_v35, 0.0 }
  0x9c   :  { %v62_v38 = vadd.f32 1e-05, %v56_v36  ;;  %v63_v39 = vadd.f32 1e-05, %v57_v37 }
  0x9e   :  { %297 = vrsqrt.f32 %v62_v38 }
  0x9f   :  { %299 = vrsqrt.f32 %v63_v39 }
  0xa7   :  { %v296_v41 = vpop.eup %295 }
  0xa8   :  { %v67_v42 = vmul.f32 %v296_v41, %v58_v40 }
  0xaa   :  { %v77_v49 = vmul.f32 %v231_v43, %v67_v42 }
  0xab   :  { %v298_v45 = vpop.eup %297 }
  0xac   :  { %v300_v47 = vpop.eup %299  ;;  %v68_v48 = vmul.f32 %v298_v45, %v59_v44  ;;  %v87_v54 = vadd.f32 %v232_v50, %v77_v49 }
  0xad   :  { %v69_v51 = vmul.f32 %v300_v47, %v60_v46 }
  0xae   :  { %v78_v52 = vmul.f32 %v231_v43, %v68_v48 }
  0xaf   :  { %v79_v53 = vmul.f32 %v231_v43, %v69_v51 }
  0xb0   :  { %v88_v55 = vadd.f32 %v232_v50, %v78_v52 }
  0xb1   :  { %v89_v56 = vadd.f32 %v232_v50, %v79_v53 }
  0xb2   :  { %v90_v57 = vpack.c.bf16 %v88_v55, %v87_v54 }
  0xb3   :  { %v91_v58 = vpack.c.bf16 %v89_v56, %v89_v56 }
  0xb4   :  { %283 = vmatprep.mubr.bf16.mxu0 %v90_v57 }
  0xb5   :  { %284 = vmatmul.mubr.bf16.vlgmr.msra.gmra.mxu0 %v91_v58 }
 0x175   :  { %v285_v60 = vpop.f32.mrf.mxu0 }
 0x176   :  { %v206_v61 = vadd.f32 %v285_v60, %v233_v59 }
 0x177   :  { %v197_v62 = vpop.f32.mrf.mxu0 }
 0x178   :  { %v247_v63 = vpack.c.bf16 %v206_v61, %v206_v61  ;;  %v198_v2 = vadd.f32 %v233_v59, %v197_v62 }
 0x179   :  { %v286_v0 = vpop.f32.mrf.mxu0 }
 0x17a   :  { %226 = vst [vmem:[%s399_s5 + $0x8] sm:$0xf] %v247_v63 }
 0x17b   :  { %v200_v1 = vpop.f32.mrf.mxu0 }
 0x17c   :  { %v201_v3 = vadd.f32 %v233_v59, %v200_v1 }
 0x17e   :  { %v255_v4 = vpack.c.bf16 %v201_v3, %v198_v2 }
 0x180   :  { %256 = vst [vmem:[%s399_s5] sm:$0xff] %v255_v4  }

// kernel: _lambda_.15
= control target key start
LH: loop header
LB: loop body
LE: loop exit
PB: predicated region body
PF: predicated region fallthrough
CT: control target
= control target key end

     0   :  { %s427_s0 = inlined_call_operand.vmem [shape: bf16[24,128], index: 0, kind: input, shape index: {}]   ;;  %s428_s3 = inlined_call_operand.vmem [shape: bf16[128,128], index: 3, kind: input, shape index: {}]   ;;  %s429_s1 = inlined_call_operand.vmem [shape: f32[1,128], index: 1, kind: input, shape index: {}]   ;;  %s430_s2 = inlined_call_operand.vmem [shape: f32[1,128], index: 2, kind: input, shape index: {}]   ;;  %s431_s4 = inlined_call_operand.vmem [shape: f32[1,128], index: 4, kind: input, shape index: {}]   ;;  %s432_s5 = inlined_call_operand.vmem [shape: bf16[24,128], index: 5, kind: output, shape index: {}]  }
   0x1   :  { %v23_v0 = vld [vmem:[%s427_s0 + $0x8] sm:$0xf]  ;;  %v276_v1 = vld [vmem:[%s427_s0] sm:$0xff]   ;;  %v314_v8 = vld [vmem:[%s428_s3 + $0x38] sm:$0xff]  }
   0x2   :  { %v370_v2 = vunpack.c.l.bf16 %v23_v0  ;;  %v372_v3 = vunpack.c.l.bf16 %v276_v1  ;;  %v376_v4 = vunpack.c.h.bf16 %v276_v1  ;;  %294 = vmatprep.subr.bf16.mxu0 %v314_v8  ;;  %v315_v9 = vld [vmem:[%s428_s3 + $0x30] sm:$0xff]   ;;  %v316_v10 = vld [vmem:[%s428_s3 + $0x28] sm:$0xff]   ;;  %v317_v11 = vld [vmem:[%s428_s3 + $0x20] sm:$0xff]  }
   0x3   :  { %295 = vmatpush3.bf16.msra.mxu0 %v314_v8  ;;  %v318_v12 = vld [vmem:[%s428_s3 + $0x18] sm:$0xff]   ;;  %v319_v13 = vld [vmem:[%s428_s3 + $0x10] sm:$0xff]   ;;  %v320_v14 = vld [vmem:[%s428_s3 + $0x8] sm:$0xff]  }
   0x4   :  { %31 = vadd.xlane.f32.xlu1 %v370_v2  ;;  %27 = vadd.xlane.f32.xlu0 %v372_v3  ;;  %v37_v5 = vmul.f32 %v372_v3, %v372_v3  ;;  %v38_v6 = vmul.f32 %v376_v4, %v376_v4  ;;  %v39_v7 = vmul.f32 %v370_v2, %v370_v2  ;;  %v321_v15 = vld [vmem:[%s428_s3] sm:$0xff]  }
   0x5   :  { %296 = vmatprep.subr.bf16.mxu0 %v315_v9  ;;  %v258_v43 = vld [vmem:[%s429_s1] ss:$0 sm:$0xff] }
   0x6   :  { %v259_v50 = vld [vmem:[%s430_s2] ss:$0 sm:$0xff] }
   0x7   :  { %297 = vmatpush3.bf16.msra.mxu0 %v315_v9  ;;  %v260_v59 = vld [vmem:[%s431_s4] ss:$0 sm:$0xff] }
   0x8   :  { %29 = vadd.xlane.f32.xlu0 %v376_v4  ;;  %40 = vadd.xlane.f32.xlu1 %v37_v5 }
   0x9   :  { %298 = vmatprep.subr.bf16.mxu0 %v316_v10 }
   0xb   :  { %299 = vmatpush3.bf16.msra.mxu0 %v316_v10 }
   0xc   :  { %42 = vadd.xlane.f32.xlu0 %v38_v6  ;;  %44 = vadd.xlane.f32.xlu1 %v39_v7 }
   0xd   :  { %300 = vmatprep.subr.bf16.mxu0 %v317_v11 }
   0xf   :  { %301 = vmatpush3.bf16.msra.mxu0 %v317_v11 }
  0x10   :  { %302 = vmatprep.subr.bf16.mxu0 %v318_v12 }
  0x13   :  { %303 = vmatpush3.bf16.msra.mxu0 %v318_v12 }
  0x14   :  { %304 = vmatprep.subr.bf16.mxu0 %v319_v13 }
  0x17   :  { %305 = vmatpush3.bf16.msra.mxu0 %v319_v13 }
  0x18   :  { %306 = vmatprep.subr.bf16.mxu0 %v320_v14 }
  0x1b   :  { %307 = vmatpush3.bf16.msra.mxu0 %v320_v14 }
  0x1c   :  { %308 = vmatprep.subr.bf16.mxu0 %v321_v15 }
  0x1f   :  { %309 = vmatpush3.bf16.msra.mxu0 %v321_v15 }
  0x8d   :  { %v32_v16 = vpop.xlane.xlu1 %31  ;;  %v28_v17 = vpop.xlane.xlu0 %27 }
  0x8e   :  { %v34_v18 = vmul.f32 0.03125, %v28_v17  ;;  %v36_v19 = vmul.f32 0.03125, %v32_v16 }
  0x90   :  { %v49_v22 = vmul.f32 %v34_v18, %v34_v18  ;;  %v51_v26 = vmul.f32 %v36_v19, %v36_v19  ;;  %v58_v40 = vsub.f32 %v372_v3, %v34_v18  ;;  %v60_v46 = vsub.f32 %v370_v2, %v36_v19 }
  0x91   :  { %v30_v20 = vpop.xlane.xlu0 %29  ;;  %v41_v21 = vpop.xlane.xlu1 %40 }
  0x92   :  { %v35_v23 = vmul.f32 0.03125, %v30_v20  ;;  %v46_v24 = vmul.f32 0.03125, %v41_v21 }
  0x94   :  { %v52_v25 = vsub.f32 %v46_v24, %v49_v22  ;;  %v50_v29 = vmul.f32 %v35_v23, %v35_v23  ;;  %v59_v44 = vsub.f32 %v376_v4, %v35_v23 }
  0x95   :  { %v43_v27 = vpop.xlane.xlu0 %42  ;;  %v45_v28 = vpop.xlane.xlu1 %44 }
  0x96   :  { %v55_v30 = vmax.f32 %v52_v25, 0.0  ;;  %v47_v31 = vmul.f32 0.03125, %v43_v27  ;;  %v48_v32 = vmul.f32 0.03125, %v45_v28 }
  0x98   :  { %v61_v33 = vadd.f32 1e-05, %v55_v30  ;;  %v53_v34 = vsub.f32 %v47_v31, %v50_v29  ;;  %v54_v35 = vsub.f32 %v48_v32, %v51_v26 }
  0x9a   :  { %322 = vrsqrt.f32 %v61_v33  ;;  %v56_v36 = vmax.f32 %v53_v34, 0.0  ;;  %v57_v37 = vmax.f32 %v54_v35, 0.0 }
  0x9c   :  { %v62_v38 = vadd.f32 1e-05, %v56_v36  ;;  %v63_v39 = vadd.f32 1e-05, %v57_v37 }
  0x9e   :  { %324 = vrsqrt.f32 %v62_v38 }
  0x9f   :  { %326 = vrsqrt.f32 %v63_v39 }
  0xa7   :  { %v323_v41 = vpop.eup %322 }
  0xa8   :  { %v67_v42 = vmul.f32 %v323_v41, %v58_v40 }
  0xaa   :  { %v77_v49 = vmul.f32 %v258_v43, %v67_v42 }
  0xab   :  { %v325_v45 = vpop.eup %324 }
  0xac   :  { %v327_v47 = vpop.eup %326  ;;  %v68_v48 = vmul.f32 %v325_v45, %v59_v44  ;;  %v87_v54 = vadd.f32 %v259_v50, %v77_v49 }
  0xad   :  { %v69_v51 = vmul.f32 %v327_v47, %v60_v46 }
  0xae   :  { %v78_v52 = vmul.f32 %v258_v43, %v68_v48 }
  0xaf   :  { %v79_v53 = vmul.f32 %v258_v43, %v69_v51 }
  0xb0   :  { %v88_v55 = vadd.f32 %v259_v50, %v78_v52 }
  0xb1   :  { %v89_v56 = vadd.f32 %v259_v50, %v79_v53 }
  0xb2   :  { %v90_v57 = vpack.c.bf16 %v88_v55, %v87_v54 }
  0xb3   :  { %v91_v58 = vpack.c.bf16 %v89_v56, %v89_v56 }
  0xb4   :  { %310 = vmatprep.mubr.bf16.mxu0 %v90_v57 }
  0xb5   :  { %311 = vmatmul.mubr.bf16.vlgmr.msra.gmra.mxu0 %v91_v58 }
 0x175   :  { %v312_v60 = vpop.f32.mrf.mxu0 }
 0x176   :  { %v206_v61 = vadd.f32 %v312_v60, %v260_v59 }
 0x177   :  { %v197_v62 = vpop.f32.mrf.mxu0 }
 0x178   :  { %v213_v63 = vmul.f32 %v206_v61, %v206_v61  ;;  %v198_v0 = vadd.f32 %v260_v59, %v197_v62 }
 0x179   :  { %v313_v1 = vpop.f32.mrf.mxu0 }
 0x17a   :  { %v216_v2 = vmul.f32 %v213_v63, %v206_v61  ;;  %v211_v3 = vmul.f32 %v198_v0, %v198_v0 }
 0x17b   :  { %v200_v4 = vpop.f32.mrf.mxu0 }
 0x17c   :  { %v219_v5 = vmul.f32 0.044715, %v216_v2  ;;  %v214_v6 = vmul.f32 %v211_v3, %v198_v0  ;;  %v201_v7 = vadd.f32 %v260_v59, %v200_v4 }
 0x17e   :  { %v222_v8 = vadd.f32 %v219_v5, %v206_v61  ;;  %v217_v9 = vmul.f32 0.044715, %v214_v6  ;;  %v212_v10 = vmul.f32 %v201_v7, %v201_v7 }
 0x180   :  { %v225_v11 = vmul.f32 0.7978846, %v222_v8  ;;  %v220_v12 = vadd.f32 %v217_v9, %v198_v0  ;;  %v215_v13 = vmul.f32 %v212_v10, %v201_v7 }
 0x182   :  { %328 = vtanh.f32 %v225_v11  ;;  %v223_v14 = vmul.f32 0.7978846, %v220_v12  ;;  %v218_v15 = vmul.f32 0.044715, %v215_v13 }
 0x184   :  { %330 = vtanh.f32 %v223_v14  ;;  %v221_v16 = vadd.f32 %v218_v15, %v201_v7 }
 0x186   :  { %v224_v17 = vmul.f32 0.7978846, %v221_v16 }
 0x188   :  { %332 = vtanh.f32 %v224_v17 }
 0x18f   :  { %v329_v18 = vpop.eup %328 }
 0x190   :  { %v231_v19 = vadd.f32 1.0, %v329_v18 }
 0x191   :  { %v331_v20 = vpop.eup %330 }
 0x192   :  { %v234_v21 = vmul.f32 0.5, %v231_v19  ;;  %v229_v22 = vadd.f32 1.0, %v331_v20 }
 0x194   :  { %v237_v23 = vmul.f32 %v234_v21, %v206_v61  ;;  %v232_v26 = vmul.f32 0.5, %v229_v22 }
 0x195   :  { %v333_v24 = vpop.eup %332 }
 0x196   :  { %v274_v25 = vpack.c.bf16 %v237_v23, %v237_v23  ;;  %v230_v27 = vadd.f32 1.0, %v333_v24  ;;  %v235_v29 = vmul.f32 %v232_v26, %v198_v0 }
 0x198   :  { %253 = vst [vmem:[%s432_s5 + $0x8] sm:$0xf] %v274_v25  ;;  %v233_v28 = vmul.f32 0.5, %v230_v27 }
 0x19a   :  { %v236_v30 = vmul.f32 %v233_v28, %v201_v7 }
 0x19c   :  { %v282_v31 = vpack.c.bf16 %v236_v30, %v235_v29 }
 0x19e   :  { %283 = vst [vmem:[%s432_s5] sm:$0xff] %v282_v31  }

// kernel: _lambda_.14
= control target key start
LH: loop header
LB: loop body
LE: loop exit
PB: predicated region body
PF: predicated region fallthrough
CT: control target
= control target key end

     0   :  { %s340_s1 = inlined_call_operand.vmem [shape: bf16[128,128], index: 1, kind: input, shape index: {}]   ;;  %s341_s0 = inlined_call_operand.vmem [shape: bf16[24,128], index: 0, kind: input, shape index: {}]   ;;  %s342_s3 = inlined_call_operand.vmem [shape: bf16[24,128], index: 3, kind: input, shape index: {}]   ;;  %s343_s2 = inlined_call_operand.vmem [shape: f32[1,128], index: 2, kind: input, shape index: {}]   ;;  %s344_s4 = inlined_call_operand.vmem [shape: bf16[24,128], index: 4, kind: output, shape index: {}]  }
   0x1   :  { %v260_v0 = vld [vmem:[%s340_s1 + $0x38] sm:$0xff]   ;;  %v261_v1 = vld [vmem:[%s340_s1 + $0x30] sm:$0xff]   ;;  %v262_v2 = vld [vmem:[%s340_s1 + $0x28] sm:$0xff]  }
   0x2   :  { %240 = vmatprep.subr.bf16.mxu0 %v260_v0  ;;  %v263_v3 = vld [vmem:[%s340_s1 + $0x20] sm:$0xff]   ;;  %v264_v5 = vld [vmem:[%s340_s1 + $0x18] sm:$0xff]   ;;  %v265_v6 = vld [vmem:[%s340_s1 + $0x10] sm:$0xff]  }
   0x3   :  { %241 = vmatpush3.bf16.msra.mxu0 %v260_v0  ;;  %v268_v4 = vld [vmem:[%s341_s0] sm:$0xff]   ;;  %v266_v7 = vld [vmem:[%s340_s1 + $0x8] sm:$0xff]  }
   0x4   :  { %242 = vmatprep.subr.bf16.mxu0 %v261_v1  ;;  %256 = vmatprep.mubr.bf16.mxu0 %v268_v4  ;;  %v267_v8 = vld [vmem:[%s340_s1] sm:$0xff]   ;;  %v269_v9 = vld [vmem:[%s341_s0 + $0x8] ss:$0 sps:$4 sm:$0xff]  }
   0x5   :  { %v177_v10 = vld [vmem:[%s342_s3 + $0x8] sm:$0xf]  ;;  %v214_v11 = vld [vmem:[%s343_s2] ss:$0 sm:$0xff] }
   0x6   :  { %v180_v12 = vunpack.c.l.bf16 %v177_v10  ;;  %v222_v16 = vld [vmem:[%s342_s3] sm:$0xff]  }
   0x7   :  { %243 = vmatpush3.bf16.msra.mxu0 %v261_v1  ;;  %v223_v21 = vunpack.c.l.bf16 %v222_v16  ;;  %v224_v22 = vunpack.c.h.bf16 %v222_v16 }
   0x8   :  { %244 = vmatprep.subr.bf16.mxu0 %v262_v2 }
   0xb   :  { %245 = vmatpush3.bf16.msra.mxu0 %v262_v2 }
   0xc   :  { %246 = vmatprep.subr.bf16.mxu0 %v263_v3 }
   0xf   :  { %247 = vmatpush3.bf16.msra.mxu0 %v263_v3 }
  0x10   :  { %248 = vmatprep.subr.bf16.mxu0 %v264_v5 }
  0x13   :  { %249 = vmatpush3.bf16.msra.mxu0 %v264_v5 }
  0x14   :  { %250 = vmatprep.subr.bf16.mxu0 %v265_v6 }
  0x17   :  { %251 = vmatpush3.bf16.msra.mxu0 %v265_v6 }
  0x18   :  { %252 = vmatprep.subr.bf16.mxu0 %v266_v7 }
  0x1b   :  { %253 = vmatpush3.bf16.msra.mxu0 %v266_v7 }
  0x1c   :  { %254 = vmatprep.subr.bf16.mxu0 %v267_v8 }
  0x1f   :  { %255 = vmatpush3.bf16.msra.mxu0 %v267_v8 }
  0x22   :  { %257 = vmatmul.mubr.bf16.vlgmr.msra.gmra.mxu0 %v269_v9 }
  0xe2   :  { %v258_v13 = vpop.f32.mrf.mxu0 }
  0xe3   :  { %v174_v14 = vadd.f32 %v258_v13, %v214_v11 }
  0xe4   :  { %v139_v15 = vpop.f32.mrf.mxu0 }
  0xe5   :  { %v183_v17 = vadd.f32 %v180_v12, %v174_v14  ;;  %v172_v20 = vadd.f32 %v214_v11, %v139_v15 }
  0xe6   :  { %v259_v18 = vpop.f32.mrf.mxu0 }
  0xe7   :  { %v220_v19 = vpack.c.bf16 %v183_v17, %v183_v17  ;;  %v181_v25 = vadd.f32 %v223_v21, %v172_v20 }
  0xe8   :  { %v142_v23 = vpop.f32.mrf.mxu0 }
  0xe9   :  { %199 = vst [vmem:[%s344_s4 + $0x8] sm:$0xf] %v220_v19  ;;  %v173_v24 = vadd.f32 %v214_v11, %v142_v23 }
  0xeb   :  { %v182_v26 = vadd.f32 %v224_v22, %v173_v24 }
  0xed   :  { %v228_v27 = vpack.c.bf16 %v182_v26, %v181_v25 }
  0xef   :  { %229 = vst [vmem:[%s344_s4] sm:$0xff] %v228_v27  }

// kernel: _lambda_.13
= control target key start
LH: loop header
LB: loop body
LE: loop exit
PB: predicated region body
PF: predicated region fallthrough
CT: control target
= control target key end

     0   :  { %s942_s9 = smov 0   ;;  %s944_s10 = smov 0   ;;  %s1084_s0 = inlined_call_operand.vmem [shape: bf16[2,16,32], index: 0, kind: input, shape index: {}]   ;;  %s1085_s1 = inlined_call_operand.vmem [shape: bf16[2,16,64], index: 1, kind: input, shape index: {}]   ;;  %s1086_s2 = inlined_call_operand.vmem [shape: bf16[2,16,32], index: 2, kind: output, shape index: {}]  }
   0x1   :  { %s946_s11 = smov 0  }
   0x2 LB: > { %s31_s12 = sadd.s32 1, %s912_s10  ;;  %p778_p0 = scmp.ge.s32.totalorder %s916_s11, 1  ;;  %s916_s11 = sphi %s946_s11, %s12_s11   ;;  %s912_s10 = sphi %s944_s10, %s1092_s10   ;;  %s908_s9 = sphi %s942_s9, %s1091_s9  }
   0x3   : > { %p33_p1 = scmp.ge.s32.totalorder %s31_s12, 2  ;;  %p157_p2 = scmp.lt.s32.totalorder %s916_s11, 3 }
   0x5   : > { %s1094_s12 = smov (%p33_p1, %s31_s12), 0  ;;  %p158_p3 = pnand %p778_p0, %p157_p2 }
   0x6   : > { %p197_p4 = scmp.lt.s32.totalorder (!%p158_p3), %s908_s9, 1  ;;  %s922_s20 = smov (!%p158_p3), 96  }
   0x7   : > { %161 = sbr.rel (%p158_p3) target bundleno = 1338 (0x53a), region = 28  ;;  %s923_s21 = smov (!%p158_p3), 112  }
   0x8   : > { %s925_s22 = smov (!%p158_p3), 80   ;;  %s926_s23 = smov (!%p158_p3), 16  }
   0xc   : > { %v918_v0 = vmov 0.0   ;;  %vm919_vm0 = vmmov 0   ;;  %s1096_s9 = smov (!%p197_p4, %s908_s9), 1  ;;  %vm275_vm1 = vcmask 130048   ;;  %vm231_vm2 = vcmask 15360  }
   0xd   : > { %808 = vmatprep.subr.bf16.mxu0 %v918_v0  ;;  %810 = vmatprep.mubr.msk.bf16.mxu0 %vm919_vm0, %v918_v0  ;;  %s966_s13 = sshll.u32 %s1096_s9, 3  ;;  %v920_v4 = vmov -inf   ;;  %234 = vst.msk [vmem:[#allocation3] sm:$0xff] %vm231_vm2, %v918_v0  ;;  %235 = vst.msk [vmem:[#allocation3 + $0x8] sm:$0xff] %vm231_vm2, %v918_v0  ;;  %v250_v5 = vlaneseq  ;;  %v921_v21 = vmov 0   ;;  %vm371_vm8 = vcmask 7168  }
   0xe   : > { %814 = vmatprep.subr.bf16.mxu1 %v918_v0  ;;  %816 = vmatprep.mubr.msk.bf16.mxu1 %vm919_vm0, %v918_v0  ;;  %s214_s16 = scalar_lea.vmem %s1085_s1, %s966_s13  ;;  %s204_s19 = scalar_lea.vmem %s1084_s0, %s966_s13  ;;  %232 = vst.msk [vmem:[#allocation2] sm:$0xff] %vm231_vm2, %v920_v4  ;;  %233 = vst.msk [vmem:[#allocation2 + $0x8] sm:$0xff] %vm231_vm2, %v920_v4  ;;  %v924_v57 = vmov 1   ;;  %vm541_vm9 = vcmask 15368   ;;  %vm236_vm10 = vcmask 261120   ;;  %vm616_vm11 = vcmask 261248  }
   0xf   : > { %v972_v1 = vld [vmem:[%s214_s16] sm:$0xff]   ;;  %v251_v6 = vshrl.u32 %v250_v5, 7  ;;  %v257_v7 = vand.u32 127, %v250_v5  ;;  %865 = vset.pattern.permute.xlu1 %v921_v21  ;;  %867 = vset.pattern.permute.xlu0 %v924_v57  ;;  %237 = vst.msk [vmem:[#allocation4] sm:$0xff] %vm236_vm10, %v918_v0  ;;  %238 = vst.msk [vmem:[#allocation4 + $0x8] sm:$0xff] %vm236_vm10, %v918_v0  ;;  %s224_s26 = scalar_lea.vmem %s1086_s2, %s966_s13  ;;  %vm663_vm12 = vcmask 257024  }
  0x10   : > { %v280_v2 = vsel %vm275_vm1, %v972_v1, 0  ;;  %v873_v3 = vld [vmem:[%s204_s19] sm:$0xff]  }
  0x11   : > { %809 = vmatpush3.bf16.xpose.msra.mxu0 %v280_v2  ;;  %vm260_vm3 = vcmp.le.s32.totalorder %v257_v7, %v251_v6  ;;  %vm262_vm4 = vcmp.lt.s32.totalorder %v257_v7, 12  ;;  %v252_v8 = vadd.s32 8, %v251_v6 }
  0x12   : > { %826 = vmatprep.subr.bf16.mxu0 %v918_v0  ;;  %vm986_vm5 = vmand %vm260_vm3, %vm262_vm4 }
  0x13   : > { %vm261_vm6 = vcmp.le.s32.totalorder %v257_v7, %v252_v8 }
  0x14   : > { %vm993_vm7 = vmand %vm261_vm6, %vm262_vm4 }
  0x15   : > { %v1002_v22 = vld [vmem:[#allocation2] sm:$0xff]  ;;  %v1007_v25 = vld [vmem:[#allocation2 + $0x8] sm:$0xff] }
  0x18   : > { %811 = vmatmul.mubr.msk.bf16.vlgmr.msra.gmra.mxu0 %vm275_vm1, %v873_v3 }
  0x19   : > { %828 = vmatprep.mubr.msk.bf16.mxu0 %vm919_vm0, %v918_v0 }
  0xd8   : > { %v316_v9 = vpop.f32.mrf.mxu0 }
  0xd9   : > { %v323_v11 = vmul.f32 0.25, %v316_v9 }
  0xda   : > { %v812_v12 = vpop.f32.mrf.mxu0 }
  0xdb   : > { %v325_v13 = vsel %vm986_vm5, %v323_v11, -1e+30 }
  0xdc   : > { %v319_v14 = vpop.f32.mrf.mxu0  ;;  %v329_v15 = vsel %vm275_vm1, %v325_v13, -inf }
  0xdd   : > { %v324_v17 = vmul.f32 0.25, %v319_v14  ;;  %330 = vmax.xlane.f32.xlu0 %v329_v15 }
  0xde   : > { %v813_v18 = vpop.f32.mrf.mxu0 }
  0xdf   : > { %v326_v19 = vsel %vm993_vm7, %v324_v17, -1e+30 }
  0xe0   : > { %v332_v20 = vsel %vm275_vm1, %v326_v19, -inf }
  0xe1   : > { %333 = vmax.xlane.f32.xlu0 %v332_v20 }
  0xf7   : > { %389 = vrot.lane.b32.xlu0 %v972_v1, %s922_s20 }
 0x166   : > { %v331_v23 = vpop.xlane.xlu0 %330 }
 0x167   : > { %v1005_v24 = vmax.f32 %v1002_v22, %v331_v23 }
 0x169   : > { %v337_v26 = vsub.f32 %v1002_v22, %v1005_v24  ;;  %440 = vst.msk [vmem:[#allocation2] sm:$0xff] %vm371_vm8, %v1005_v24  ;;  %345 = vperm.xlu1 %865, %v1005_v24  }
 0x16a   : > { %v334_v27 = vpop.xlane.xlu0 %333 }
 0x16b   : > { %v1015_v28 = vmax.f32 %v1007_v25, %v334_v27  ;;  %v339_v17 = vmul.f32 1.442695, %v337_v26  ;;  %v360_v26 = vld [vmem:[#allocation3 + $0x8] sm:$0xff] }
 0x16d   : > { %v338_v29 = vsub.f32 %v1007_v25, %v1015_v28  ;;  %441 = vst.msk [vmem:[#allocation2 + $0x8] sm:$0xff] %vm371_vm8, %v1015_v28  ;;  %350 = vperm.xlu1 %865, %v1015_v28   ;;  %v359_v28 = vld [vmem:[#allocation3] sm:$0xff] }
 0x16e   : > { %v390_v30 = vpop.permute.xlu0 %389 }
 0x16f   : > { %815 = vmatpush3.bf16.msra.mxu1 %v390_v30  ;;  %v341_v20 = vmul.f32 1.442695, %v338_v29 }
 0x170   : > { %820 = vmatprep.subr.bf16.mxu1 %v918_v0  ;;  %v497_v58 = vld [vmem:[#allocation2] sm:$0xff] }
 0x171   : > { %444 = vrot.lane.b32.xlu1 %v972_v1, %s923_s21 }
 0x172   : > { %866 = vset.pattern.permute.xlu1 %v924_v57 }
 0x174   : > { %v498_v61 = vld [vmem:[#allocation2 + $0x8] sm:$0xff] }
 0x175   : > { %442 = vrot.lane.b32.xlu1 %v873_v3, %s923_s21 }
 0x1e4   : > { %v346_v31 = vpop.permute.xlu1 %345 }
 0x1e5   : > { %v353_v32 = vsub.f32 %v325_v13, %v346_v31 }
 0x1e7   : > { %v355_v33 = vmul.f32 1.442695, %v353_v32 }
 0x1e8   : > { %v351_v34 = vpop.permute.xlu1 %350 }
 0x1e9   : > { %v354_v35 = vsub.f32 %v326_v19, %v351_v34  ;;  %874 = vpow2.f32 %v355_v33 }
 0x1eb   : > { %v357_v36 = vmul.f32 1.442695, %v354_v35 }
 0x1ec   : > { %v445_v37 = vpop.permute.xlu1 %444 }
 0x1ed   : > { %876 = vpow2.f32 %v357_v36  ;;  %v450_v40 = vsel %vm275_vm1, %v445_v37, 0 }
 0x1f0   : > { %v443_v42 = vpop.permute.xlu1 %442 }
 0x1f6   : > { %v875_v38 = vpop.eup %874 }
 0x1f7   : > { %v363_v6 = vsel %vm275_vm1, %v875_v38, 0.0 }
 0x1fa   : > { %v877_v39 = vpop.eup %876 }
 0x1fb   : > { %v388_v41 = vpack.c.bf16 %v877_v39, %v875_v38  ;;  %v366_v3 = vsel %vm275_vm1, %v877_v39, 0.0 }
 0x1fd   : > { %817 = vmatmul.mubr.msk.bf16.vlgmr.msra.gmra.mxu1 %vm275_vm1, %v388_v41  ;;  %v374_v41 = vld [vmem:[#allocation4] sm:$0xff] }
 0x1fe   : > { %821 = vmatpush3.bf16.xpose.msra.mxu1 %v450_v40  ;;  %822 = vmatprep.mubr.msk.bf16.mxu1 %vm919_vm0, %v918_v0 }
 0x205   : > { %823 = vmatmul.mubr.msk.bf16.vlgmr.msra.gmra.mxu1 %vm275_vm1, %v443_v42 }
 0x2bd   : > { %v1029_v43 = vpop.f32.mrf.mxu1 }
 0x2bf   : > { %v818_v44 = vpop.f32.mrf.mxu1 }
 0x2c1   : > { %v1031_v45 = vpop.f32.mrf.mxu1 }
 0x2c3   : > { %v819_v46 = vpop.f32.mrf.mxu1 }
 0x2c4   : > { %v375_v46 = vld [vmem:[#allocation4 + $0x8] sm:$0xff] }
 0x2c5   : > { %v486_v47 = vpop.f32.mrf.mxu1 }
 0x2c6   : > { %v493_v48 = vmul.f32 0.25, %v486_v47 }
 0x2c7   : > { %v824_v49 = vpop.f32.mrf.mxu1 }
 0x2c8   : > { %v495_v50 = vsel %vm986_vm5, %v493_v48, -1e+30 }
 0x2c9   : > { %v489_v51 = vpop.f32.mrf.mxu1  ;;  %v499_v52 = vsel %vm275_vm1, %v495_v50, -inf }
 0x2ca   : > { %v494_v53 = vmul.f32 0.25, %v489_v51  ;;  %500 = vmax.xlane.f32.xlu1 %v499_v52 }
 0x2cb   : > { %v825_v54 = vpop.f32.mrf.mxu1 }
 0x2cc   : > { %v496_v55 = vsel %vm993_vm7, %v494_v53, -1e+30 }
 0x2cd   : > { %v502_v56 = vsel %vm275_vm1, %v496_v55, -inf }
 0x2ce   : > { %503 = vmax.xlane.f32.xlu0 %v502_v56 }
 0x353   : > { %v501_v59 = vpop.xlane.xlu1 %500 }
 0x354   : > { %v505_v60 = vmax.f32 %v497_v58, %v501_v59 }
 0x356   : > { %619 = vst.msk [vmem:[#allocation2] sm:$0xff] %vm541_vm9, %v505_v60  ;;  %515 = vperm.xlu1 %866, %v505_v60   ;;  %v507_v4 = vsub.f32 %v497_v58, %v505_v60 }
 0x357   : > { %v504_v62 = vpop.xlane.xlu0 %503 }
 0x358   : > { %v506_v63 = vmax.f32 %v498_v61, %v504_v62  ;;  %v509_v5 = vmul.f32 1.442695, %v507_v4 }
 0x35a   : > { %v508_v2 = vsub.f32 %v498_v61, %v506_v63  ;;  %620 = vst.msk [vmem:[#allocation2 + $0x8] sm:$0xff] %vm541_vm9, %v506_v63  ;;  %559 = vrot.lane.b32.xlu1 %v972_v1, %s925_s22  ;;  %520 = vperm.xlu0 %867, %v506_v63   ;;  %878 = vpow2.f32 %v509_v5 }
 0x35b   : > { %868 = vset.pattern.permute.xlu1 %v921_v21 }
 0x35c   : > { %v511_v23 = vmul.f32 1.442695, %v508_v2 }
 0x367   : > { %v879_v7 = vpop.eup %878 }
 0x379   : > { %367 = vadd.xlane.f32.xlu0 %v366_v3 }
 0x37e   : > { %364 = vadd.xlane.f32.xlu1 %v363_v6 }
 0x38f   : > { %548 = vperm.xlu0 %867, %v879_v7  }
 0x3d1   : > { %v516_v8 = vpop.permute.xlu1 %515 }
 0x3d2   : > { %v523_v9 = vsub.f32 %v495_v50, %v516_v8 }
 0x3d4   : > { %v525_v10 = vmul.f32 1.442695, %v523_v9 }
 0x3d5   : > { %v521_v11 = vpop.permute.xlu0 %520  ;;  %v560_v12 = vpop.permute.xlu1 %559 }
 0x3d6   : > { %880 = vpow2.f32 %v525_v10  ;;  %v524_v1 = vsub.f32 %v496_v55, %v521_v11  ;;  %827 = vmatpush3.bf16.msra.mxu0 %v560_v12 }
 0x3d8   : > { %v527_v13 = vmul.f32 1.442695, %v524_v1 }
 0x3da   : > { %882 = vpow2.f32 %v527_v13 }
 0x3db   : > { %884 = vpow2.f32 %v339_v17 }
 0x3dc   : > { %886 = vpow2.f32 %v341_v20 }
 0x3dd   : > { %888 = vpow2.f32 %v511_v23 }
 0x3e3   : > { %v881_v14 = vpop.eup %880 }
 0x3e4   : > { %v533_v15 = vsel %vm275_vm1, %v881_v14, 0.0 }
 0x3e5   : > { %534 = vadd.xlane.f32.xlu1 %v533_v15 }
 0x3e7   : > { %v883_v16 = vpop.eup %882 }
 0x3e8   : > { %v536_v18 = vsel %vm275_vm1, %v883_v16, 0.0  ;;  %v558_v19 = vpack.c.bf16 %v883_v16, %v881_v14  ;;  %v885_v22 = vpop.eup %884 }
 0x3e9   : > { %537 = vadd.xlane.f32.xlu1 %v536_v18  ;;  %v887_v24 = vpop.eup %886  ;;  %v361_v29 = vmul.f32 %v885_v22, %v359_v28 }
 0x3ea   : > { %829 = vmatmul.mubr.msk.bf16.vlgmr.msra.gmra.mxu0 %vm275_vm1, %v558_v19  ;;  %v362_v27 = vmul.f32 %v887_v24, %v360_v26  ;;  %v889_v30 = vpop.eup %888 }
 0x3fa   : > { %378 = vperm.xlu1 %868, %v885_v22  }
 0x3fe   : > { %383 = vperm.xlu1 %868, %v887_v24  }
 0x402   : > { %869 = vset.pattern.permute.xlu1 %v924_v57  ;;  %v368_v31 = vpop.xlane.xlu0 %367 }
 0x403   : > { %v370_v25 = vadd.f32 %v368_v31, %v362_v27  ;;  %553 = vperm.xlu1 %869, %v889_v30  }
 0x405   : > { %373 = vst.msk [vmem:[#allocation3 + $0x8] sm:$0xff] %vm371_vm8, %v370_v25 }
 0x407   : > { %v365_v0 = vpop.xlane.xlu1 %364  ;;  %870 = vset.pattern.permute.xlu1 %v921_v21 }
 0x408   : > { %v369_v32 = vadd.f32 %v365_v0, %v361_v29 }
 0x40a   : > { %372 = vst.msk [vmem:[#allocation3] sm:$0xff] %vm371_vm8, %v369_v32  ;;  %v549_v60 = vpop.permute.xlu0 %548 }
 0x40c   : > { %v530_v36 = vld [vmem:[#allocation3 + $0x8] sm:$0xff] }
 0x40d   : > { %v532_v38 = vmul.f32 %v889_v30, %v530_v36 }
 0x411   : > { %v529_v33 = vld [vmem:[#allocation3] sm:$0xff] }
 0x412   : > { %v531_v34 = vmul.f32 %v879_v7, %v529_v33 }
 0x46e   : > { %v535_v35 = vpop.xlane.xlu1 %534 }
 0x46f   : > { %v539_v37 = vadd.f32 %v535_v35, %v531_v34 }
 0x471   : > { %542 = vst.msk [vmem:[#allocation3] sm:$0xff] %vm541_vm9, %v539_v37 }
 0x472   : > { %v538_v39 = vpop.xlane.xlu1 %537 }
 0x473   : > { %v540_v40 = vadd.f32 %v538_v39, %v532_v38 }
 0x475   : > { %543 = vst.msk [vmem:[#allocation3 + $0x8] sm:$0xff] %vm541_vm9, %v540_v40 }
 0x476   : > { %v379_v42 = vpop.permute.xlu1 %378 }
 0x477   : > { %v386_v44 = vmul.f32 %v379_v42, %v374_v41 }
 0x478   : > { %v624_v21 = vld [vmem:[#allocation3] sm:$0xff] }
 0x479   : > { %v436_v47 = vadd.f32 %v1029_v43, %v386_v44  ;;  %890 = vrcp.f32 %v624_v21 }
 0x47a   : > { %v384_v48 = vpop.permute.xlu1 %383 }
 0x47b   : > { %438 = vst.msk [vmem:[#allocation4] sm:$0xff] %vm275_vm1, %v436_v47  ;;  %v387_v49 = vmul.f32 %v384_v48, %v375_v46 }
 0x47c   : > { %v625_v52 = vld [vmem:[#allocation3 + $0x8] sm:$0xff] }
 0x47d   : > { %v437_v50 = vadd.f32 %v1031_v45, %v387_v49  ;;  %892 = vrcp.f32 %v625_v52 }
 0x47e   : > { %v554_v45 = vpop.permute.xlu1 %553 }
 0x47f   : > { %439 = vst.msk [vmem:[#allocation4 + $0x8] sm:$0xff] %vm275_vm1, %v437_v50 }
 0x482   : > { %v544_v59 = vld [vmem:[#allocation4] sm:$0xff] }
 0x483   : > { %v556_v61 = vmul.f32 %v549_v60, %v544_v59 }
 0x486   : > { %v891_v51 = vpop.eup %890  ;;  %v545_v62 = vld [vmem:[#allocation4 + $0x8] sm:$0xff] }
 0x487   : > { %643 = vperm.xlu0 %867, %v891_v51   ;;  %632 = vperm.xlu1 %870, %v891_v51   ;;  %v557_v3 = vmul.f32 %v554_v45, %v545_v62 }
 0x48a   : > { %v893_v56 = vpop.eup %892 }
 0x4aa   : > { %v599_v53 = vpop.f32.mrf.mxu0 }
 0x4ab   : > { %608 = vrot.lane.b32.xlu1 %v599_v53, %s926_s23 }
 0x4ac   : > { %v830_v54 = vpop.f32.mrf.mxu0 }
 0x4ae   : > { %v602_v55 = vpop.f32.mrf.mxu0 }
 0x4af   : > { %610 = vrot.lane.b32.xlu1 %v602_v55, %s926_s23 }
 0x4b0   : > { %v831_v43 = vpop.f32.mrf.mxu0 }
 0x4b3   : > { %637 = vperm.xlu1 %870, %v893_v56  }
 0x4b7   : > { %871 = vset.pattern.permute.xlu1 %v924_v57 }
 0x4b8   : > { %647 = vperm.xlu1 %871, %v893_v56  }
 0x502   : > { %v633_v58 = vpop.permute.xlu1 %632  ;;  %v644_v6 = vpop.permute.xlu0 %643 }
 0x51d   : > { %v609_v63 = vpop.permute.xlu1 %608 }
 0x51e   : > { %v614_v2 = vadd.f32 %v609_v63, %v556_v61 }
 0x520   : > { %617 = vst.msk [vmem:[#allocation4] sm:$0xff] %vm616_vm11, %v614_v2 }
 0x521   : > { %v611_v4 = vpop.permute.xlu1 %610 }
 0x522   : > { %v615_v5 = vadd.f32 %v611_v4, %v557_v3 }
 0x524   : > { %618 = vst.msk [vmem:[#allocation4 + $0x8] sm:$0xff] %vm616_vm11, %v615_v5 }
 0x527   : > { %v628_v7 = vld [vmem:[#allocation4] sm:$0xff] }
 0x528   : > { %v640_v8 = vmul.f32 %v633_v58, %v628_v7  ;;  %v650_v57 = vmul.f32 %v644_v6, %v628_v7 }
 0x52a   : > { %v653_v9 = vsel %vm275_vm1, %v640_v8, %v650_v57 }
 0x52b   : > { %v798_v10 = vpack.c.bf16 %v653_v9, %v653_v9  ;;  %v629_v12 = vld [vmem:[#allocation4 + $0x8] sm:$0xff] }
 0x52d   : > { %664 = vst.msk [vmem:[%s224_s26] sm:$0xf] %vm663_vm12, %v798_v10 }
 0x52e   : > { %v638_v11 = vpop.permute.xlu1 %637 }
 0x52f   : > { %v641_v13 = vmul.f32 %v638_v11, %v629_v12 }
 0x533   : > { %v648_v1 = vpop.permute.xlu1 %647 }
 0x534   : > { %v651_v14 = vmul.f32 %v648_v1, %v629_v12 }
 0x536   : > { %v654_v15 = vsel %vm275_vm1, %v641_v13, %v651_v14 }
 0x537   : > { %v799_v16 = vpack.c.bf16 %v654_v15, %v654_v15 }
 0x539   : > { %665 = vst.msk [vmem:[%s224_s26 + $0x4] sm:$0xf] %vm663_vm12, %v799_v16 }
 0x53a PF: > { %s12_s11 = sadd.s32 1, %s916_s11   ;;  %s1091_s9 = smov %s912_s10 }
 0x53b   : > { %p9_p5 = scmp.ge.s32.totalorder %s12_s11, 4   ;;  %s1092_s10 = smov %s1094_s12 }
 0x53d   :  { %11 = sbr.rel (!%p9_p5) target bundleno = 2 (0x2), region = 73 }

// kernel: _lambda_.17
= control target key start
LH: loop header
LB: loop body
LE: loop exit
PB: predicated region body
PF: predicated region fallthrough
CT: control target
= control target key end

     0   :  { %s89_s0 = inlined_call_operand.vmem [shape: bf16[8,128], index: 0, kind: input, shape index: {}]   ;;  %s90_s1 = inlined_call_operand.vmem [shape: f32[1,128], index: 1, kind: input, shape index: {}]   ;;  %s91_s2 = inlined_call_operand.vmem [shape: f32[1,128], index: 2, kind: input, shape index: {}]   ;;  %s92_s3 = inlined_call_operand.vmem [shape: bf16[8,128], index: 3, kind: output, shape index: {}]  }
   0x1   :  { %v14_v0 = vld [vmem:[%s89_s0] sm:$0xf] }
   0x2   :  { %v15_v1 = vunpack.c.l.bf16 %v14_v0  ;;  %v53_v13 = vld [vmem:[%s90_s1] ss:$0 sm:$0xff] }
   0x3   :  { %v54_v15 = vld [vmem:[%s91_s2] ss:$0 sm:$0xff] }
   0x4   :  { %16 = vadd.xlane.f32.xlu0 %v15_v1  ;;  %v20_v2 = vmul.f32 %v15_v1, %v15_v1 }
   0x8   :  { %21 = vadd.xlane.f32.xlu0 %v20_v2 }
  0x8d   :  { %v17_v3 = vpop.xlane.xlu0 %16 }
  0x8e   :  { %v19_v4 = vmul.f32 0.03125, %v17_v3 }
  0x90   :  { %v24_v6 = vmul.f32 %v19_v4, %v19_v4  ;;  %v27_v11 = vsub.f32 %v15_v1, %v19_v4 }
  0x91   :  { %v22_v5 = vpop.xlane.xlu0 %21 }
  0x92   :  { %v23_v7 = vmul.f32 0.03125, %v22_v5 }
  0x94   :  { %v25_v8 = vsub.f32 %v23_v7, %v24_v6 }
  0x96   :  { %v26_v9 = vmax.f32 %v25_v8, 0.0 }
  0x98   :  { %v28_v10 = vadd.f32 1e-05, %v26_v9 }
  0x9a   :  { %55 = vrsqrt.f32 %v28_v10 }
  0xa7   :  { %v56_v12 = vpop.eup %55 }
  0xa8   :  { %v30_v14 = vmul.f32 %v56_v12, %v27_v11 }
  0xaa   :  { %v38_v16 = vmul.f32 %v53_v13, %v30_v14 }
  0xac   :  { %v46_v17 = vadd.f32 %v54_v15, %v38_v16 }
  0xae   :  { %v47_v18 = vpack.c.bf16 %v46_v17, %v46_v17 }
  0xb0   :  { %48 = vst [vmem:[%s92_s3] sm:$0xf] %v47_v18 }

// kernel: _lambda_.19
= control target key start
LH: loop header
LB: loop body
LE: loop exit
PB: predicated region body
PF: predicated region fallthrough
CT: control target
= control target key end

     0   :  { %s942_s9 = smov 0   ;;  %s944_s10 = smov 0   ;;  %s1084_s0 = inlined_call_operand.vmem [shape: bf16[2,16,32], index: 0, kind: input, shape index: {}]   ;;  %s1085_s1 = inlined_call_operand.vmem [shape: bf16[2,16,64], index: 1, kind: input, shape index: {}]   ;;  %s1086_s2 = inlined_call_operand.vmem [shape: bf16[2,16,32], index: 2, kind: output, shape index: {}]  }
   0x1   :  { %s946_s11 = smov 0  }
   0x2 LB: > { %s31_s12 = sadd.s32 1, %s912_s10  ;;  %p778_p0 = scmp.ge.s32.totalorder %s916_s11, 1  ;;  %s916_s11 = sphi %s946_s11, %s12_s11   ;;  %s912_s10 = sphi %s944_s10, %s1092_s10   ;;  %s908_s9 = sphi %s942_s9, %s1091_s9  }
   0x3   : > { %p33_p1 = scmp.ge.s32.totalorder %s31_s12, 2  ;;  %p157_p2 = scmp.lt.s32.totalorder %s916_s11, 3 }
   0x5   : > { %s1094_s12 = smov (%p33_p1, %s31_s12), 0  ;;  %p158_p3 = pnand %p778_p0, %p157_p2 }
   0x6   : > { %p197_p4 = scmp.lt.s32.totalorder (!%p158_p3), %s908_s9, 1  ;;  %s922_s20 = smov (!%p158_p3), 96  }
   0x7   : > { %161 = sbr.rel (%p158_p3) target bundleno = 1338 (0x53a), region = 28  ;;  %s923_s21 = smov (!%p158_p3), 112  }
   0x8   : > { %s925_s22 = smov (!%p158_p3), 80   ;;  %s926_s23 = smov (!%p158_p3), 16  }
   0xc   : > { %v918_v0 = vmov 0.0   ;;  %vm919_vm0 = vmmov 0   ;;  %s1096_s9 = smov (!%p197_p4, %s908_s9), 1  ;;  %vm275_vm1 = vcmask 130048   ;;  %vm231_vm2 = vcmask 15360  }
   0xd   : > { %808 = vmatprep.subr.bf16.mxu0 %v918_v0  ;;  %810 = vmatprep.mubr.msk.bf16.mxu0 %vm919_vm0, %v918_v0  ;;  %s966_s13 = sshll.u32 %s1096_s9, 3  ;;  %v920_v4 = vmov -inf   ;;  %234 = vst.msk [vmem:[#allocation3] sm:$0xff] %vm231_vm2, %v918_v0  ;;  %235 = vst.msk [vmem:[#allocation3 + $0x8] sm:$0xff] %vm231_vm2, %v918_v0  ;;  %v250_v5 = vlaneseq  ;;  %v921_v21 = vmov 0   ;;  %vm371_vm8 = vcmask 7168  }
   0xe   : > { %814 = vmatprep.subr.bf16.mxu1 %v918_v0  ;;  %816 = vmatprep.mubr.msk.bf16.mxu1 %vm919_vm0, %v918_v0  ;;  %s214_s16 = scalar_lea.vmem %s1085_s1, %s966_s13  ;;  %s204_s19 = scalar_lea.vmem %s1084_s0, %s966_s13  ;;  %232 = vst.msk [vmem:[#allocation2] sm:$0xff] %vm231_vm2, %v920_v4  ;;  %233 = vst.msk [vmem:[#allocation2 + $0x8] sm:$0xff] %vm231_vm2, %v920_v4  ;;  %v924_v57 = vmov 1   ;;  %vm541_vm9 = vcmask 15368   ;;  %vm236_vm10 = vcmask 261120   ;;  %vm616_vm11 = vcmask 261248  }
   0xf   : > { %v972_v1 = vld [vmem:[%s214_s16] sm:$0xff]   ;;  %v251_v6 = vshrl.u32 %v250_v5, 7  ;;  %v257_v7 = vand.u32 127, %v250_v5  ;;  %865 = vset.pattern.permute.xlu1 %v921_v21  ;;  %867 = vset.pattern.permute.xlu0 %v924_v57  ;;  %237 = vst.msk [vmem:[#allocation4] sm:$0xff] %vm236_vm10, %v918_v0  ;;  %238 = vst.msk [vmem:[#allocation4 + $0x8] sm:$0xff] %vm236_vm10, %v918_v0  ;;  %s224_s26 = scalar_lea.vmem %s1086_s2, %s966_s13  ;;  %vm663_vm12 = vcmask 257024  }
  0x10   : > { %v280_v2 = vsel %vm275_vm1, %v972_v1, 0  ;;  %v873_v3 = vld [vmem:[%s204_s19] sm:$0xff]  }
  0x11   : > { %809 = vmatpush3.bf16.xpose.msra.mxu0 %v280_v2  ;;  %vm260_vm3 = vcmp.le.s32.totalorder %v257_v7, %v251_v6  ;;  %vm262_vm4 = vcmp.lt.s32.totalorder %v257_v7, 11  ;;  %v252_v8 = vadd.s32 8, %v251_v6 }
  0x12   : > { %826 = vmatprep.subr.bf16.mxu0 %v918_v0  ;;  %vm986_vm5 = vmand %vm260_vm3, %vm262_vm4 }
  0x13   : > { %vm261_vm6 = vcmp.le.s32.totalorder %v257_v7, %v252_v8 }
  0x14   : > { %vm993_vm7 = vmand %vm261_vm6, %vm262_vm4 }
  0x15   : > { %v1002_v22 = vld [vmem:[#allocation2] sm:$0xff]  ;;  %v1007_v25 = vld [vmem:[#allocation2 + $0x8] sm:$0xff] }
  0x18   : > { %811 = vmatmul.mubr.msk.bf16.vlgmr.msra.gmra.mxu0 %vm275_vm1, %v873_v3 }
  0x19   : > { %828 = vmatprep.mubr.msk.bf16.mxu0 %vm919_vm0, %v918_v0 }
  0xd8   : > { %v316_v9 = vpop.f32.mrf.mxu0 }
  0xd9   : > { %v323_v11 = vmul.f32 0.25, %v316_v9 }
  0xda   : > { %v812_v12 = vpop.f32.mrf.mxu0 }
  0xdb   : > { %v325_v13 = vsel %vm986_vm5, %v323_v11, -1e+30 }
  0xdc   : > { %v319_v14 = vpop.f32.mrf.mxu0  ;;  %v329_v15 = vsel %vm275_vm1, %v325_v13, -inf }
  0xdd   : > { %v324_v17 = vmul.f32 0.25, %v319_v14  ;;  %330 = vmax.xlane.f32.xlu0 %v329_v15 }
  0xde   : > { %v813_v18 = vpop.f32.mrf.mxu0 }
  0xdf   : > { %v326_v19 = vsel %vm993_vm7, %v324_v17, -1e+30 }
  0xe0   : > { %v332_v20 = vsel %vm275_vm1, %v326_v19, -inf }
  0xe1   : > { %333 = vmax.xlane.f32.xlu0 %v332_v20 }
  0xf7   : > { %389 = vrot.lane.b32.xlu0 %v972_v1, %s922_s20 }
 0x166   : > { %v331_v23 = vpop.xlane.xlu0 %330 }
 0x167   : > { %v1005_v24 = vmax.f32 %v1002_v22, %v331_v23 }
 0x169   : > { %v337_v26 = vsub.f32 %v1002_v22, %v1005_v24  ;;  %440 = vst.msk [vmem:[#allocation2] sm:$0xff] %vm371_vm8, %v1005_v24  ;;  %345 = vperm.xlu1 %865, %v1005_v24  }
 0x16a   : > { %v334_v27 = vpop.xlane.xlu0 %333 }
 0x16b   : > { %v1015_v28 = vmax.f32 %v1007_v25, %v334_v27  ;;  %v339_v17 = vmul.f32 1.442695, %v337_v26  ;;  %v360_v26 = vld [vmem:[#allocation3 + $0x8] sm:$0xff] }
 0x16d   : > { %v338_v29 = vsub.f32 %v1007_v25, %v1015_v28  ;;  %441 = vst.msk [vmem:[#allocation2 + $0x8] sm:$0xff] %vm371_vm8, %v1015_v28  ;;  %350 = vperm.xlu1 %865, %v1015_v28   ;;  %v359_v28 = vld [vmem:[#allocation3] sm:$0xff] }
 0x16e   : > { %v390_v30 = vpop.permute.xlu0 %389 }
 0x16f   : > { %815 = vmatpush3.bf16.msra.mxu1 %v390_v30  ;;  %v341_v20 = vmul.f32 1.442695, %v338_v29 }
 0x170   : > { %820 = vmatprep.subr.bf16.mxu1 %v918_v0  ;;  %v497_v58 = vld [vmem:[#allocation2] sm:$0xff] }
 0x171   : > { %444 = vrot.lane.b32.xlu1 %v972_v1, %s923_s21 }
 0x172   : > { %866 = vset.pattern.permute.xlu1 %v924_v57 }
 0x174   : > { %v498_v61 = vld [vmem:[#allocation2 + $0x8] sm:$0xff] }
 0x175   : > { %442 = vrot.lane.b32.xlu1 %v873_v3, %s923_s21 }
 0x1e4   : > { %v346_v31 = vpop.permute.xlu1 %345 }
 0x1e5   : > { %v353_v32 = vsub.f32 %v325_v13, %v346_v31 }
 0x1e7   : > { %v355_v33 = vmul.f32 1.442695, %v353_v32 }
 0x1e8   : > { %v351_v34 = vpop.permute.xlu1 %350 }
 0x1e9   : > { %v354_v35 = vsub.f32 %v326_v19, %v351_v34  ;;  %874 = vpow2.f32 %v355_v33 }
 0x1eb   : > { %v357_v36 = vmul.f32 1.442695, %v354_v35 }
 0x1ec   : > { %v445_v37 = vpop.permute.xlu1 %444 }
 0x1ed   : > { %876 = vpow2.f32 %v357_v36  ;;  %v450_v40 = vsel %vm275_vm1, %v445_v37, 0 }
 0x1f0   : > { %v443_v42 = vpop.permute.xlu1 %442 }
 0x1f6   : > { %v875_v38 = vpop.eup %874 }
 0x1f7   : > { %v363_v6 = vsel %vm275_vm1, %v875_v38, 0.0 }
 0x1fa   : > { %v877_v39 = vpop.eup %876 }
 0x1fb   : > { %v388_v41 = vpack.c.bf16 %v877_v39, %v875_v38  ;;  %v366_v3 = vsel %vm275_vm1, %v877_v39, 0.0 }
 0x1fd   : > { %817 = vmatmul.mubr.msk.bf16.vlgmr.msra.gmra.mxu1 %vm275_vm1, %v388_v41  ;;  %v374_v41 = vld [vmem:[#allocation4] sm:$0xff] }
 0x1fe   : > { %821 = vmatpush3.bf16.xpose.msra.mxu1 %v450_v40  ;;  %822 = vmatprep.mubr.msk.bf16.mxu1 %vm919_vm0, %v918_v0 }
 0x205   : > { %823 = vmatmul.mubr.msk.bf16.vlgmr.msra.gmra.mxu1 %vm275_vm1, %v443_v42 }
 0x2bd   : > { %v1029_v43 = vpop.f32.mrf.mxu1 }
 0x2bf   : > { %v818_v44 = vpop.f32.mrf.mxu1 }
 0x2c1   : > { %v1031_v45 = vpop.f32.mrf.mxu1 }
 0x2c3   : > { %v819_v46 = vpop.f32.mrf.mxu1 }
 0x2c4   : > { %v375_v46 = vld [vmem:[#allocation4 + $0x8] sm:$0xff] }
 0x2c5   : > { %v486_v47 = vpop.f32.mrf.mxu1 }
 0x2c6   : > { %v493_v48 = vmul.f32 0.25, %v486_v47 }
 0x2c7   : > { %v824_v49 = vpop.f32.mrf.mxu1 }
 0x2c8   : > { %v495_v50 = vsel %vm986_vm5, %v493_v48, -1e+30 }
 0x2c9   : > { %v489_v51 = vpop.f32.mrf.mxu1  ;;  %v499_v52 = vsel %vm275_vm1, %v495_v50, -inf }
 0x2ca   : > { %v494_v53 = vmul.f32 0.25, %v489_v51  ;;  %500 = vmax.xlane.f32.xlu1 %v499_v52 }
 0x2cb   : > { %v825_v54 = vpop.f32.mrf.mxu1 }
 0x2cc   : > { %v496_v55 = vsel %vm993_vm7, %v494_v53, -1e+30 }
 0x2cd   : > { %v502_v56 = vsel %vm275_vm1, %v496_v55, -inf }
 0x2ce   : > { %503 = vmax.xlane.f32.xlu0 %v502_v56 }
 0x353   : > { %v501_v59 = vpop.xlane.xlu1 %500 }
 0x354   : > { %v505_v60 = vmax.f32 %v497_v58, %v501_v59 }
 0x356   : > { %619 = vst.msk [vmem:[#allocation2] sm:$0xff] %vm541_vm9, %v505_v60  ;;  %515 = vperm.xlu1 %866, %v505_v60   ;;  %v507_v4 = vsub.f32 %v497_v58, %v505_v60 }
 0x357   : > { %v504_v62 = vpop.xlane.xlu0 %503 }
 0x358   : > { %v506_v63 = vmax.f32 %v498_v61, %v504_v62  ;;  %v509_v5 = vmul.f32 1.442695, %v507_v4 }
 0x35a   : > { %v508_v2 = vsub.f32 %v498_v61, %v506_v63  ;;  %620 = vst.msk [vmem:[#allocation2 + $0x8] sm:$0xff] %vm541_vm9, %v506_v63  ;;  %559 = vrot.lane.b32.xlu1 %v972_v1, %s925_s22  ;;  %520 = vperm.xlu0 %867, %v506_v63   ;;  %878 = vpow2.f32 %v509_v5 }
 0x35b   : > { %868 = vset.pattern.permute.xlu1 %v921_v21 }
 0x35c   : > { %v511_v23 = vmul.f32 1.442695, %v508_v2 }
 0x367   : > { %v879_v7 = vpop.eup %878 }
 0x379   : > { %367 = vadd.xlane.f32.xlu0 %v366_v3 }
 0x37e   : > { %364 = vadd.xlane.f32.xlu1 %v363_v6 }
 0x38f   : > { %548 = vperm.xlu0 %867, %v879_v7  }
 0x3d1   : > { %v516_v8 = vpop.permute.xlu1 %515 }
 0x3d2   : > { %v523_v9 = vsub.f32 %v495_v50, %v516_v8 }
 0x3d4   : > { %v525_v10 = vmul.f32 1.442695, %v523_v9 }
 0x3d5   : > { %v521_v11 = vpop.permute.xlu0 %520  ;;  %v560_v12 = vpop.permute.xlu1 %559 }
 0x3d6   : > { %880 = vpow2.f32 %v525_v10  ;;  %v524_v1 = vsub.f32 %v496_v55, %v521_v11  ;;  %827 = vmatpush3.bf16.msra.mxu0 %v560_v12 }
 0x3d8   : > { %v527_v13 = vmul.f32 1.442695, %v524_v1 }
 0x3da   : > { %882 = vpow2.f32 %v527_v13 }
 0x3db   : > { %884 = vpow2.f32 %v339_v17 }
 0x3dc   : > { %886 = vpow2.f32 %v341_v20 }
 0x3dd   : > { %888 = vpow2.f32 %v511_v23 }
 0x3e3   : > { %v881_v14 = vpop.eup %880 }
 0x3e4   : > { %v533_v15 = vsel %vm275_vm1, %v881_v14, 0.0 }
 0x3e5   : > { %534 = vadd.xlane.f32.xlu1 %v533_v15 }
 0x3e7   : > { %v883_v16 = vpop.eup %882 }
 0x3e8   : > { %v536_v18 = vsel %vm275_vm1, %v883_v16, 0.0  ;;  %v558_v19 = vpack.c.bf16 %v883_v16, %v881_v14  ;;  %v885_v22 = vpop.eup %884 }
 0x3e9   : > { %537 = vadd.xlane.f32.xlu1 %v536_v18  ;;  %v887_v24 = vpop.eup %886  ;;  %v361_v29 = vmul.f32 %v885_v22, %v359_v28 }
 0x3ea   : > { %829 = vmatmul.mubr.msk.bf16.vlgmr.msra.gmra.mxu0 %vm275_vm1, %v558_v19  ;;  %v362_v27 = vmul.f32 %v887_v24, %v360_v26  ;;  %v889_v30 = vpop.eup %888 }
 0x3fa   : > { %378 = vperm.xlu1 %868, %v885_v22  }
 0x3fe   : > { %383 = vperm.xlu1 %868, %v887_v24  }
 0x402   : > { %869 = vset.pattern.permute.xlu1 %v924_v57  ;;  %v368_v31 = vpop.xlane.xlu0 %367 }
 0x403   : > { %v370_v25 = vadd.f32 %v368_v31, %v362_v27  ;;  %553 = vperm.xlu1 %869, %v889_v30  }
 0x405   : > { %373 = vst.msk [vmem:[#allocation3 + $0x8] sm:$0xff] %vm371_vm8, %v370_v25 }
 0x407   : > { %v365_v0 = vpop.xlane.xlu1 %364  ;;  %870 = vset.pattern.permute.xlu1 %v921_v21 }
 0x408   : > { %v369_v32 = vadd.f32 %v365_v0, %v361_v29 }
 0x40a   : > { %372 = vst.msk [vmem:[#allocation3] sm:$0xff] %vm371_vm8, %v369_v32  ;;  %v549_v60 = vpop.permute.xlu0 %548 }
 0x40c   : > { %v530_v36 = vld [vmem:[#allocation3 + $0x8] sm:$0xff] }
 0x40d   : > { %v532_v38 = vmul.f32 %v889_v30, %v530_v36 }
 0x411   : > { %v529_v33 = vld [vmem:[#allocation3] sm:$0xff] }
 0x412   : > { %v531_v34 = vmul.f32 %v879_v7, %v529_v33 }
 0x46e   : > { %v535_v35 = vpop.xlane.xlu1 %534 }
 0x46f   : > { %v539_v37 = vadd.f32 %v535_v35, %v531_v34 }
 0x471   : > { %542 = vst.msk [vmem:[#allocation3] sm:$0xff] %vm541_vm9, %v539_v37 }
 0x472   : > { %v538_v39 = vpop.xlane.xlu1 %537 }
 0x473   : > { %v540_v40 = vadd.f32 %v538_v39, %v532_v38 }
 0x475   : > { %543 = vst.msk [vmem:[#allocation3 + $0x8] sm:$0xff] %vm541_vm9, %v540_v40 }
 0x476   : > { %v379_v42 = vpop.permute.xlu1 %378 }
 0x477   : > { %v386_v44 = vmul.f32 %v379_v42, %v374_v41 }
 0x478   : > { %v624_v21 = vld [vmem:[#allocation3] sm:$0xff] }
 0x479   : > { %v436_v47 = vadd.f32 %v1029_v43, %v386_v44  ;;  %890 = vrcp.f32 %v624_v21 }
 0x47a   : > { %v384_v48 = vpop.permute.xlu1 %383 }
 0x47b   : > { %438 = vst.msk [vmem:[#allocation4] sm:$0xff] %vm275_vm1, %v436_v47  ;;  %v387_v49 = vmul.f32 %v384_v48, %v375_v46 }
 0x47c   : > { %v625_v52 = vld [vmem:[#allocation3 + $0x8] sm:$0xff] }
 0x47d   : > { %v437_v50 = vadd.f32 %v1031_v45, %v387_v49  ;;  %892 = vrcp.f32 %v625_v52 }
 0x47e   : > { %v554_v45 = vpop.permute.xlu1 %553 }
 0x47f   : > { %439 = vst.msk [vmem:[#allocation4 + $0x8] sm:$0xff] %vm275_vm1, %v437_v50 }
 0x482   : > { %v544_v59 = vld [vmem:[#allocation4] sm:$0xff] }
 0x483   : > { %v556_v61 = vmul.f32 %v549_v60, %v544_v59 }
 0x486   : > { %v891_v51 = vpop.eup %890  ;;  %v545_v62 = vld [vmem:[#allocation4 + $0x8] sm:$0xff] }
 0x487   : > { %643 = vperm.xlu0 %867, %v891_v51   ;;  %632 = vperm.xlu1 %870, %v891_v51   ;;  %v557_v3 = vmul.f32 %v554_v45, %v545_v62 }
 0x48a   : > { %v893_v56 = vpop.eup %892 }
 0x4aa   : > { %v599_v53 = vpop.f32.mrf.mxu0 }
 0x4ab   : > { %608 = vrot.lane.b32.xlu1 %v599_v53, %s926_s23 }
 0x4ac   : > { %v830_v54 = vpop.f32.mrf.mxu0 }
 0x4ae   : > { %v602_v55 = vpop.f32.mrf.mxu0 }
 0x4af   : > { %610 = vrot.lane.b32.xlu1 %v602_v55, %s926_s23 }
 0x4b0   : > { %v831_v43 = vpop.f32.mrf.mxu0 }
 0x4b3   : > { %637 = vperm.xlu1 %870, %v893_v56  }
 0x4b7   : > { %871 = vset.pattern.permute.xlu1 %v924_v57 }
 0x4b8   : > { %647 = vperm.xlu1 %871, %v893_v56  }
 0x502   : > { %v633_v58 = vpop.permute.xlu1 %632  ;;  %v644_v6 = vpop.permute.xlu0 %643 }
 0x51d   : > { %v609_v63 = vpop.permute.xlu1 %608 }
 0x51e   : > { %v614_v2 = vadd.f32 %v609_v63, %v556_v61 }
 0x520   : > { %617 = vst.msk [vmem:[#allocation4] sm:$0xff] %vm616_vm11, %v614_v2 }
 0x521   : > { %v611_v4 = vpop.permute.xlu1 %610 }
 0x522   : > { %v615_v5 = vadd.f32 %v611_v4, %v557_v3 }
 0x524   : > { %618 = vst.msk [vmem:[#allocation4 + $0x8] sm:$0xff] %vm616_vm11, %v615_v5 }
 0x527   : > { %v628_v7 = vld [vmem:[#allocation4] sm:$0xff] }
 0x528   : > { %v640_v8 = vmul.f32 %v633_v58, %v628_v7  ;;  %v650_v57 = vmul.f32 %v644_v6, %v628_v7 }
 0x52a   : > { %v653_v9 = vsel %vm275_vm1, %v640_v8, %v650_v57 }
 0x52b   : > { %v798_v10 = vpack.c.bf16 %v653_v9, %v653_v9  ;;  %v629_v12 = vld [vmem:[#allocation4 + $0x8] sm:$0xff] }
 0x52d   : > { %664 = vst.msk [vmem:[%s224_s26] sm:$0xf] %vm663_vm12, %v798_v10 }
 0x52e   : > { %v638_v11 = vpop.permute.xlu1 %637 }
 0x52f   : > { %v641_v13 = vmul.f32 %v638_v11, %v629_v12 }
 0x533   : > { %v648_v1 = vpop.permute.xlu1 %647 }
 0x534   : > { %v651_v14 = vmul.f32 %v648_v1, %v629_v12 }
 0x536   : > { %v654_v15 = vsel %vm275_vm1, %v641_v13, %v651_v14 }
 0x537   : > { %v799_v16 = vpack.c.bf16 %v654_v15, %v654_v15 }
 0x539   : > { %665 = vst.msk [vmem:[%s224_s26 + $0x4] sm:$0xf] %vm663_vm12, %v799_v16 }
 0x53a PF: > { %s12_s11 = sadd.s32 1, %s916_s11   ;;  %s1091_s9 = smov %s912_s10 }
 0x53b   : > { %p9_p5 = scmp.ge.s32.totalorder %s12_s11, 4   ;;  %s1092_s10 = smov %s1094_s12 }
 0x53d   :  { %11 = sbr.rel (!%p9_p5) target bundleno = 2 (0x2), region = 73 }

// kernel: _lambda_.23
= control target key start
LH: loop header
LB: loop body
LE: loop exit
PB: predicated region body
PF: predicated region fallthrough
CT: control target
= control target key end

     0   :  { %v374_v6 = vmov 0.0   ;;  %vm375_vm0 = vmmov 0   ;;  %vm27_vm1 = vcmask 7168   ;;  %v376_v43 = vmov -inf   ;;  %s499_s0 = inlined_call_operand.vmem [shape: bf16[16,128], index: 0, kind: input, shape index: {}]   ;;  %s500_s3 = inlined_call_operand.vmem [shape: bf16[128,128], index: 3, kind: input, shape index: {}]   ;;  %s501_s1 = inlined_call_operand.vmem [shape: f32[1,128], index: 1, kind: input, shape index: {}]   ;;  %s502_s2 = inlined_call_operand.vmem [shape: f32[1,128], index: 2, kind: input, shape index: {}]   ;;  %s503_s5 = inlined_call_operand.vmem [shape: f32[16,128], index: 5, kind: output, shape index: {0}]   ;;  %s504_s4 = inlined_call_operand.vmem [shape: s32[16,1], index: 4, kind: input, shape index: {}]   ;;  %s505_s6 = inlined_call_operand.vmem [shape: f32[16,1], index: 6, kind: output, shape index: {1}]  }
   0x1   :  { %v312_v0 = vld [vmem:[%s499_s0] sm:$0xff]   ;;  %v350_v5 = vld [vmem:[%s500_s3 + $0x38] sm:$0xff]   ;;  %324 = vmatprep.subr.bf16.mxu0 %v374_v6  ;;  %v351_v7 = vld [vmem:[%s500_s3 + $0x30] sm:$0xff]   ;;  %340 = vmatprep.mubr.msk.bf16.mxu0 %vm375_vm0, %v374_v6  ;;  %28 = vst.msk [vmem:[#allocation2] sm:$0xff] %vm27_vm1, %v376_v43  ;;  %v194_v44 = vlaneseq  ;;  %v377_v52 = vmov 0  }
   0x2   :  { %v313_v1 = vunpack.c.l.bf16 %v312_v0  ;;  %v314_v2 = vunpack.c.h.bf16 %v312_v0  ;;  %325 = vmatpush3.bf16.msra.mxu0 %v350_v5  ;;  %v352_v8 = vld [vmem:[%s500_s3 + $0x28] sm:$0xff]   ;;  %v353_v9 = vld [vmem:[%s500_s3 + $0x20] sm:$0xff]   ;;  %v354_v10 = vld [vmem:[%s500_s3 + $0x18] sm:$0xff]   ;;  %29 = vst.msk [vmem:[#allocation2 + $0x8] sm:$0xff] %vm27_vm1, %v376_v43  ;;  %348 = vset.pattern.permute.xlu0 %v377_v52 }
   0x3   :  { %326 = vmatprep.subr.bf16.mxu0 %v374_v6  ;;  %v355_v11 = vld [vmem:[%s500_s3 + $0x10] sm:$0xff]   ;;  %v356_v12 = vld [vmem:[%s500_s3 + $0x8] sm:$0xff]   ;;  %v357_v13 = vld [vmem:[%s500_s3] sm:$0xff]   ;;  %30 = vst.msk [vmem:[#allocation3] sm:$0xff] %vm27_vm1, %v374_v6  ;;  %v195_v45 = vand.u32 127, %v194_v44  ;;  %349 = vset.pattern.permute.xlu1 %v377_v52 }
   0x4   :  { %38 = vadd.xlane.f32.xlu0 %v313_v1  ;;  %v45_v3 = vmul.f32 %v313_v1, %v313_v1  ;;  %v46_v4 = vmul.f32 %v314_v2, %v314_v2  ;;  %v301_v33 = vld [vmem:[%s501_s1] ss:$0 sm:$0xff]  ;;  %31 = vst.msk [vmem:[#allocation3 + $0x8] sm:$0xff] %vm27_vm1, %v374_v6  ;;  %32 = vst.msk [vmem:[#allocation4] sm:$0xff] %vm27_vm1, %v374_v6  ;;  %v482_v62 = vld [vmem:[%s504_s4 + $0x8] sm:$0xff] }
   0x5   :  { %v302_v38 = vld [vmem:[%s502_s2] ss:$0 sm:$0xff]  ;;  %33 = vst.msk [vmem:[#allocation4 + $0x8] sm:$0xff] %vm27_vm1, %v374_v6  ;;  %vm198_vm2 = vcmp.lt.s32.totalorder %v195_v45, 64  ;;  %vm288_vm6 = vcmp.ge.s32.totalorder %v482_v62, 0 }
   0x6   :  { %47 = vadd.xlane.f32.xlu1 %v45_v3  ;;  %327 = vmatpush3.bf16.msra.mxu0 %v351_v7  ;;  %v476_v61 = vld [vmem:[%s504_s4] sm:$0xff] }
   0x7   :  { %328 = vmatprep.subr.bf16.mxu0 %v374_v6  ;;  %vm287_vm5 = vcmp.ge.s32.totalorder %v476_v61, 0 }
   0x8   :  { %40 = vadd.xlane.f32.xlu0 %v314_v2  ;;  %v201_v53 = vld [vmem:[#allocation2] sm:$0xff] }
   0x9   :  { %v202_v56 = vld [vmem:[#allocation2 + $0x8] sm:$0xff] }
   0xa   :  { %49 = vadd.xlane.f32.xlu1 %v46_v4  ;;  %329 = vmatpush3.bf16.msra.mxu0 %v352_v8 }
   0xb   :  { %330 = vmatprep.subr.bf16.mxu0 %v374_v6 }
   0xe   :  { %331 = vmatpush3.bf16.msra.mxu0 %v353_v9 }
   0xf   :  { %332 = vmatprep.subr.bf16.mxu0 %v374_v6 }
  0x12   :  { %333 = vmatpush3.bf16.msra.mxu0 %v354_v10 }
  0x13   :  { %334 = vmatprep.subr.bf16.mxu0 %v374_v6 }
  0x16   :  { %335 = vmatpush3.bf16.msra.mxu0 %v355_v11 }
  0x17   :  { %336 = vmatprep.subr.bf16.mxu0 %v374_v6 }
  0x1a   :  { %337 = vmatpush3.bf16.msra.mxu0 %v356_v12 }
  0x1b   :  { %338 = vmatprep.subr.bf16.mxu0 %v374_v6 }
  0x1e   :  { %339 = vmatpush3.bf16.msra.mxu0 %v357_v13 }
  0x8d   :  { %v39_v14 = vpop.xlane.xlu0 %38 }
  0x8e   :  { %v43_v15 = vmul.f32 0.03125, %v39_v14  ;;  %v215_v14 = vld [vmem:[#allocation3] sm:$0xff] }
  0x8f   :  { %v48_v16 = vpop.xlane.xlu1 %47 }
  0x90   :  { %v53_v17 = vmul.f32 %v43_v15, %v43_v15  ;;  %v51_v18 = vmul.f32 0.03125, %v48_v16  ;;  %v59_v30 = vsub.f32 %v313_v1, %v43_v15 }
  0x91   :  { %v41_v19 = vpop.xlane.xlu0 %40 }
  0x92   :  { %v55_v20 = vsub.f32 %v51_v18, %v53_v17  ;;  %v44_v21 = vmul.f32 0.03125, %v41_v19  ;;  %v216_v18 = vld [vmem:[#allocation3 + $0x8] sm:$0xff] }
  0x93   :  { %v50_v22 = vpop.xlane.xlu1 %49 }
  0x94   :  { %v57_v23 = vmax.f32 %v55_v20, 0.0  ;;  %v54_v24 = vmul.f32 %v44_v21, %v44_v21  ;;  %v52_v25 = vmul.f32 0.03125, %v50_v22  ;;  %v60_v34 = vsub.f32 %v314_v2, %v44_v21  ;;  %v248_v20 = vld [vmem:[#allocation4] sm:$0xff] }
  0x96   :  { %v61_v26 = vadd.f32 1e-05, %v57_v23  ;;  %v56_v27 = vsub.f32 %v52_v25, %v54_v24 }
  0x98   :  { %358 = vrsqrt.f32 %v61_v26  ;;  %v58_v28 = vmax.f32 %v56_v27, 0.0  ;;  %v249_v26 = vld [vmem:[#allocation4 + $0x8] sm:$0xff] }
  0x9a   :  { %v62_v29 = vadd.f32 1e-05, %v58_v28 }
  0x9c   :  { %360 = vrsqrt.f32 %v62_v29 }
  0xa5   :  { %v359_v31 = vpop.eup %358 }
  0xa6   :  { %v65_v32 = vmul.f32 %v359_v31, %v59_v30 }
  0xa8   :  { %v74_v37 = vmul.f32 %v301_v33, %v65_v32 }
  0xa9   :  { %v361_v35 = vpop.eup %360 }
  0xaa   :  { %v66_v36 = vmul.f32 %v361_v35, %v60_v34  ;;  %v83_v40 = vadd.f32 %v302_v38, %v74_v37 }
  0xac   :  { %v75_v39 = vmul.f32 %v301_v33, %v66_v36 }
  0xae   :  { %v84_v41 = vadd.f32 %v302_v38, %v75_v39 }
  0xb0   :  { %v85_v42 = vpack.c.bf16 %v84_v41, %v83_v40 }
  0xb2   :  { %341 = vmatmul.mubr.bf16.vlgmr.msra.gmra.mxu0 %v85_v42 }
 0x172   :  { %v184_v46 = vpop.f32.mrf.mxu0 }
 0x173   :  { %191 = vst [vmem:[%s503_s5] sm:$0xff] %v184_v46  ;;  %v199_v47 = vsel %vm198_vm2, %v184_v46, -1e+30 }
 0x174   :  { %203 = vmax.xlane.f32.xlu0 %v199_v47  ;;  %v342_v48 = vpop.f32.mrf.mxu0 }
 0x176   :  { %v187_v49 = vpop.f32.mrf.mxu0 }
 0x177   :  { %192 = vst [vmem:[%s503_s5 + $0x8] sm:$0xff] %v187_v49  ;;  %v200_v50 = vsel %vm198_vm2, %v187_v49, -1e+30 }
 0x178   :  { %205 = vmax.xlane.f32.xlu1 %v200_v50  ;;  %v343_v51 = vpop.f32.mrf.mxu0 }
 0x1fd   :  { %v204_v54 = vpop.xlane.xlu0 %203 }
 0x1fe   :  { %v207_v55 = vmax.f32 %v201_v53, %v204_v54 }
 0x200   :  { %v209_v57 = vsub.f32 %v201_v53, %v207_v55  ;;  %244 = vst.msk [vmem:[#allocation2] sm:$0xff] %vm27_vm1, %v207_v55  ;;  %221 = vperm.xlu0 %348, %v207_v55  }
 0x201   :  { %v206_v58 = vpop.xlane.xlu1 %205 }
 0x202   :  { %v208_v59 = vmax.f32 %v202_v56, %v206_v58  ;;  %v211_v11 = vmul.f32 1.442695, %v209_v57 }
 0x204   :  { %v210_v60 = vsub.f32 %v202_v56, %v208_v59  ;;  %245 = vst.msk [vmem:[#allocation2 + $0x8] sm:$0xff] %vm27_vm1, %v208_v59  ;;  %226 = vperm.xlu1 %349, %v208_v59  }
 0x206   :  { %v213_v12 = vmul.f32 1.442695, %v210_v60 }
 0x207   :  { %v271_v33 = vld [vmem:[#allocation2] sm:$0xff] }
 0x208   :  { %251 = vperm.xlu1 %349, %v476_v61  }
 0x20b   :  { %v272_v39 = vld [vmem:[#allocation2 + $0x8] sm:$0xff] }
 0x20c   :  { %254 = vperm.xlu1 %349, %v482_v62  }
 0x27b   :  { %v222_v63 = vpop.permute.xlu0 %221 }
 0x27c   :  { %v229_v0 = vsub.f32 %v199_v47, %v222_v63 }
 0x27e   :  { %v231_v1 = vmul.f32 1.442695, %v229_v0 }
 0x27f   :  { %v227_v2 = vpop.permute.xlu1 %226 }
 0x280   :  { %362 = vpow2.f32 %v231_v1  ;;  %v230_v3 = vsub.f32 %v200_v50, %v227_v2 }
 0x282   :  { %v233_v4 = vmul.f32 1.442695, %v230_v3 }
 0x283   :  { %v252_v5 = vpop.permute.xlu1 %251 }
 0x284   :  { %364 = vpow2.f32 %v233_v4  ;;  %vm256_vm3 = vcmp.eq.s32.totalorder %v195_v45, %v252_v5 }
 0x285   :  { %v258_v9 = vsel %vm256_vm3, %v184_v46, 0.0  ;;  %366 = vpow2.f32 %v211_v11 }
 0x286   :  { %368 = vpow2.f32 %v213_v12 }
 0x287   :  { %v255_v7 = vpop.permute.xlu1 %254 }
 0x288   :  { %vm257_vm4 = vcmp.eq.s32.totalorder %v195_v45, %v255_v7 }
 0x289   :  { %v259_v10 = vsel %vm257_vm4, %v187_v49, 0.0 }
 0x28d   :  { %v363_v6 = vpop.eup %362 }
 0x28e   :  { %235 = vadd.xlane.f32.xlu1 %v363_v6 }
 0x291   :  { %v365_v8 = vpop.eup %364 }
 0x292   :  { %237 = vadd.xlane.f32.xlu0 %v365_v8  ;;  %260 = vadd.xlane.f32.xlu1 %v258_v9  ;;  %v367_v13 = vpop.eup %366 }
 0x293   :  { %v217_v15 = vmul.f32 %v367_v13, %v215_v14  ;;  %v369_v16 = vpop.eup %368 }
 0x294   :  { %v218_v21 = vmul.f32 %v369_v16, %v216_v18 }
 0x296   :  { %262 = vadd.xlane.f32.xlu1 %v259_v10 }
 0x317   :  { %v236_v17 = vpop.xlane.xlu1 %235 }
 0x318   :  { %v239_v19 = vadd.f32 %v236_v17, %v217_v15 }
 0x31a   :  { %242 = vst.msk [vmem:[#allocation3] sm:$0xff] %vm27_vm1, %v239_v19 }
 0x31b   :  { %v238_v22 = vpop.xlane.xlu0 %237  ;;  %v261_v23 = vpop.xlane.xlu1 %260 }
 0x31c   :  { %v240_v24 = vadd.f32 %v238_v22, %v218_v21  ;;  %v264_v25 = vadd.f32 %v261_v23, %v248_v20 }
 0x31e   :  { %243 = vst.msk [vmem:[#allocation3 + $0x8] sm:$0xff] %vm27_vm1, %v240_v24  ;;  %266 = vst.msk [vmem:[#allocation4] sm:$0xff] %vm27_vm1, %v264_v25 }
 0x31f   :  { %v263_v27 = vpop.xlane.xlu1 %262 }
 0x320   :  { %v265_v28 = vadd.f32 %v263_v27, %v249_v26 }
 0x321   :  { %v273_v29 = vld [vmem:[#allocation3] sm:$0xff] }
 0x322   :  { %370 = vlog2.f32 %v273_v29  ;;  %267 = vst.msk [vmem:[#allocation4 + $0x8] sm:$0xff] %vm27_vm1, %v265_v28 }
 0x325   :  { %v274_v30 = vld [vmem:[#allocation3 + $0x8] sm:$0xff]  ;;  %v281_v36 = vld [vmem:[#allocation4] sm:$0xff] }
 0x326   :  { %372 = vlog2.f32 %v274_v30 }
 0x329   :  { %v282_v42 = vld [vmem:[#allocation4 + $0x8] sm:$0xff] }
 0x32f   :  { %v371_v31 = vpop.eup %370 }
 0x330   :  { %v276_v32 = vmul.f32 0.6931472, %v371_v31 }
 0x332   :  { %v279_v34 = vadd.f32 %v276_v32, %v271_v33 }
 0x333   :  { %v373_v35 = vpop.eup %372 }
 0x334   :  { %v283_v37 = vsub.f32 %v279_v34, %v281_v36  ;;  %v278_v38 = vmul.f32 0.6931472, %v373_v35 }
 0x336   :  { %v289_v40 = vsel %vm287_vm5, %v283_v37, 0.0  ;;  %v280_v41 = vadd.f32 %v278_v38, %v272_v39 }
 0x337   :  { %291 = vst.msk [vmem:[%s505_s6] sm:$0xff] %vm27_vm1, %v289_v40 }
 0x338   :  { %v284_v43 = vsub.f32 %v280_v41, %v282_v42 }
 0x33a   :  { %v290_v44 = vsel %vm288_vm6, %v284_v43, 0.0 }
 0x33b   :  { %292 = vst.msk [vmem:[%s505_s6 + $0x8] sm:$0xff] %vm27_vm1, %v290_v44 }

</bundles_post_ra>
